<compile_context>
chip_gen: v7x
topology: tpu7x:2x2x1
jax: 0.10.0
libtpu: 0.0.40
codegen_flags: <defaults>
</compile_context>

<pallas_src>
import functools
import math

import jax
import jax.numpy as jnp
from jax import lax
from jax.experimental import pallas as pl
from jax.experimental.pallas import tpu as pltpu

LN_EPS = 1e-5          # PyTorch nn.LayerNorm default
F32 = jnp.float32
BF16 = jnp.bfloat16

_ROW_TILE = 256        # target query-row tile (MXU M-dim sweet spot on v6e/v7x)
_KV_TILE = 512         # softmax tiled over the key axis in chunks of <= this many keys

# Flipped off (once) if this jax build rejects pipeline_mode=pl.Buffered(1) on
# top-level pallas_call BlockSpecs.
_SINGLE_BUFFER_RESIDENT = [True]


# ----------------------------- spec / compiler-params helpers -----------------------------

def _resident_spec(block_shape, index_map):
    """BlockSpec for an operand whose block is constant (weights/LN) or changes only with
    the batch axis (full-sequence K/V source): single-buffered when supported, since the
    default double buffer is pure VMEM waste for these."""
    if _SINGLE_BUFFER_RESIDENT[0]:
        try:
            return pl.BlockSpec(block_shape, index_map, pipeline_mode=pl.Buffered(1))
        except Exception:                      # pipeline_mode unavailable on this build
            _SINGLE_BUFFER_RESIDENT[0] = False
    return pl.BlockSpec(block_shape, index_map)


def _call_with_fallback(build, args):
    """build() constructs the pallas_call; retry once with default double buffering if the
    single-buffered resident specs fail to lower on this jax build."""
    try:
        return build()(*args)
    except Exception:
        if not _SINGLE_BUFFER_RESIDENT[0]:
            raise
        _SINGLE_BUFFER_RESIDENT[0] = False
        return build()(*args)


def _vmem_limit_bytes():
    """Generation-aware scoped-VMEM budget: ~52 MiB on v7x (64 MiB physical), ~108 MiB on
    v5e/v6e (128 MiB physical); conservative 48 MiB if the hardware query fails."""
    try:
        cap = int(pltpu.get_tpu_info().vmem_capacity_bytes)
    except Exception:
        cap = 0
    if cap <= 0:
        return 48 * 1024 * 1024
    return max(32 << 20, min(int(cap * 0.85), cap - (12 << 20)))


@functools.lru_cache(maxsize=1)
def _compiler_params():
    # NOTE: the row-tile axis MUST stay "arbitrary" - the K|V VMEM caches are filled at
    # row-tile 0 and reused by later tiles of the same batch. Only the batch axis is
    # megacore-shardable; sharding the row axis would need per-core K|V recomputation.
    return pltpu.CompilerParams(
        dimension_semantics=("parallel", "arbitrary"),
        vmem_limit_bytes=_vmem_limit_bytes(),
    )


def _pick_row_tile(n, target=_ROW_TILE):
    """Query-row tile: the full sequence if small, else the largest multiple-of-8 divisor
    <= target; if none exists, fall back to `target` with a masked partial last tile
    (the grid uses ceil-div) - never to T=n."""
    if n <= target:
        return n
    best = 0
    for t in range(8, target + 1, 8):
        if n % t == 0:
            best = t
    return best if best else target


# ----------------------------- in-kernel math helpers -----------------------------

def _layernorm(t, ln_ref, row):
    """LayerNorm(t) with gamma = ln_ref[row], beta = ln_ref[row + 1]."""
    g = ln_ref[pl.ds(row, 1), :]           # (1, E)
    b = ln_ref[pl.ds(row + 1, 1), :]       # (1, E)
    mu = jnp.mean(t, axis=-1, keepdims=True)
    var = jnp.mean(jnp.square(t - mu), axis=-1, keepdims=True)
    return (t - mu) * lax.rsqrt(var + LN_EPS) * g + b


def _erf(x):
    # Abramowitz & Stegun 7.1.26 rational approximation, |err| < 1.5e-7 (fp32-accurate).
    a1, a2, a3, a4, a5 = 0.254829592, -0.284496736, 1.421413741, -1.453152027, 1.061405429
    p = 0.3275911
    ax = jnp.abs(x)
    t = 1.0 / (1.0 + p * ax)
    poly = ((((a5 * t + a4) * t + a3) * t + a2) * t + a1) * t
    y = 1.0 - poly * jnp.exp(-ax * ax)
    return jnp.where(x >= 0.0, y, -y)


def _gelu_exact(x):
    # nn.GELU() default == exact (erf-based) GELU; kept in f32 for parity with PyTorch
    # (a bf16/tanh variant would offload the VALU on v6e/v7x at some accuracy cost).
    return 0.5 * x * (1.0 + _erf(x * (1.0 / math.sqrt(2.0))))


# ----------------------------- in-kernel building blocks -----------------------------

def _project_kv(src_full, ln_ref, ln_row, wqkv_ref, kv_sc):
    """kv_sc <- [K | V] = LN_x(src) @ W_kv  (bf16 cache, computed once per batch)."""
    E = src_full.shape[-1]
    xn = _layernorm(src_full, ln_ref, ln_row)
    kv_sc[...] = jnp.dot(xn.astype(BF16), wqkv_ref[:, pl.ds(E, 2 * E)],
                         preferred_element_type=F32).astype(BF16)


def _attend(rows, ln_ref, ln_row_q, wqkv_ref, kv_sc, q_sc, attn_sc, *, num_heads):
    """Multi-head attention for a tile of query rows; K|V read from the per-batch VMEM
    cache. Softmax is tiled over the key axis (online running max / denominator) so the
    (T, S) f32 score intermediate is bounded to (T, <=_KV_TILE)."""
    T, E = rows.shape
    D = E // num_heads
    S = kv_sc.shape[0]
    kt = min(S, _KV_TILE)

    yn = _layernorm(rows, ln_ref, ln_row_q)                       # norm_y (queries)
    # Q projection; scale (head_dim**-0.5) is pre-folded into the Q columns of wqkv.
    q_sc[...] = jnp.dot(yn.astype(BF16), wqkv_ref[:, pl.ds(0, E)],
                        preferred_element_type=F32).astype(BF16)

    # Static unroll over heads (head_dim < 128 here; an (H, T, D) layout + batched
    # dot_general only pays once D reaches the lane width).
    for h in range(num_heads):
        qh = q_sc[:, pl.ds(h * D, D)]                             # (T, D)  bf16
        m = jnp.full((T, 1), -jnp.inf, dtype=F32)
        l = jnp.zeros((T, 1), dtype=F32)
        acc = jnp.zeros((T, D), dtype=F32)
        for c0 in range(0, S, kt):                                # online softmax over keys
            cs = min(kt, S - c0)
            kh = kv_sc[pl.ds(c0, cs), pl.ds(h * D, D)]            # (cs, D) bf16
            vh = kv_sc[pl.ds(c0, cs), pl.ds(E + h * D, D)]        # (cs, D) bf16
            s = lax.dot_general(qh, kh, (((1,), (1,)), ((), ())), # q @ k^T -> (T, cs) f32
                                preferred_element_type=F32)
            m_new = jnp.maximum(m, jnp.max(s, axis=-1, keepdims=True))
            alpha = jnp.exp(m - m_new)
            p = jnp.exp(s - m_new)
            l = alpha * l + jnp.sum(p, axis=-1, keepdims=True)
            acc = alpha * acc + jnp.dot(p.astype(BF16), vh, preferred_element_type=F32)
            m = m_new
        out_h = acc * pl.reciprocal(l, approx=True)               # EUP slot
        attn_sc[:, pl.ds(h * D, D)] = out_h.astype(BF16)          # bf16 store traffic
    return attn_sc[...].astype(F32)                               # (T, E)


def _feed_forward(rows, ln_ref, ln_row, w1_ref, b1_ref, w2_ref, b2_ref):
    """Linear2(GELU(Linear1(LN(LN(rows)))))  (dropout == identity)."""
    z = _layernorm(rows, ln_ref, ln_row)                          # FeedForward.norm
    z = _layernorm(z, ln_ref, ln_row + 2)                         # net's LayerNorm
    f = jnp.dot(z.astype(BF16), w1_ref[...], preferred_element_type=F32) + b1_ref[...]
    f = _gelu_exact(f)
    # TODO(synk): Dropout(p=0.1) is implemented as identity (inference mode).
    f = jnp.dot(f.astype(BF16), w2_ref[...], preferred_element_type=F32) + b2_ref[...]
    return f


# ----------------------------- fused per-layer kernels -----------------------------

def _encoder_layer_kernel(xrow_ref, xfull_ref, ln_ref, wqkv_ref, w1_ref, b1_ref,
                          w2_ref, b2_ref, o_ref, kv_sc, q_sc, attn_sc, *, num_heads):
    @pl.when(pl.program_id(1) == 0)        # once per batch: cache K|V for the whole sequence
    def _():
        _project_kv(xfull_ref[0], ln_ref, 0, wqkv_ref, kv_sc)

    x_rows = xrow_ref[0]                                          # (T, E) f32, residual src
    h1 = x_rows + _attend(x_rows, ln_ref, 2, wqkv_ref, kv_sc, q_sc, attn_sc,
                          num_heads=num_heads)
    out = h1 + _feed_forward(h1, ln_ref, 4, w1_ref, b1_ref, w2_ref, b2_ref)
    o_ref[0] = out.astype(o_ref.dtype)


def _decoder_layer_kernel(yrow_ref, yfull_ref, xfull_ref, ln_ref, wqkv_s_ref, wqkv_c_ref,
                          w1_ref, b1_ref, w2_ref, b2_ref, o_ref,
                          kvs_sc, kvc_sc, q_sc, attn_sc, *, num_heads):
    @pl.when(pl.program_id(1) == 0)        # once per batch: cache self- and cross-attn K|V
    def _():
        _project_kv(yfull_ref[0], ln_ref, 0, wqkv_s_ref, kvs_sc)  # from the ORIGINAL y
        _project_kv(xfull_ref[0], ln_ref, 4, wqkv_c_ref, kvc_sc)  # from x

    y_rows = yrow_ref[0]
    h1 = y_rows + _attend(y_rows, ln_ref, 2, wqkv_s_ref, kvs_sc, q_sc, attn_sc,
                          num_heads=num_heads)                    # y + s_attn((y, y))
    h2 = h1 + _attend(h1, ln_ref, 6, wqkv_c_ref, kvc_sc, q_sc, attn_sc,
                      num_heads=num_heads)                        # y + c_attn((x, y))
    out = h2 + _feed_forward(h2, ln_ref, 8, w1_ref, b1_ref, w2_ref, b2_ref)
    o_ref[0] = out.astype(o_ref.dtype)


# ----------------------------- pallas_call wrappers -----------------------------

_c00 = lambda b, i: (0, 0)   # constant index map for packed LN / weight operands


def encoder_layer(x, p, num_heads, *, row_tile=_ROW_TILE):
    B, N, E = x.shape
    T = _pick_row_tile(N, row_tile)
    n_tiles = -(-N // T)
    kernel = functools.partial(_encoder_layer_kernel, num_heads=num_heads)

    flops = 2 * B * N * E * 3 * E + 4 * B * N * N * E + 16 * B * N * E * E
    trans = B * num_heads * N * N + B * N * 4 * E
    bytes_acc = 3 * B * N * E * 4 + (11 * E * E) * 2 + (13 * E) * 4
    ce = pl.CostEstimate(flops=int(flops), transcendentals=int(trans),
                         bytes_accessed=int(bytes_acc))

    def build():
        return pl.pallas_call(
            kernel,
            out_shape=jax.ShapeDtypeStruct((B, N, E), x.dtype),
            grid=(B, n_tiles),
            in_specs=[
                pl.BlockSpec((1, T, E), lambda b, i: (b, i, 0)),      # row tile (residual+Q)
                _resident_spec((1, N, E), lambda b, i: (b, 0, 0)),    # full x (K/V source)
                _resident_spec(p["ln"].shape, _c00),                  # packed LN gamma/beta
                _resident_spec(p["wqkv"].shape, _c00),                # [W_q*scale|W_k|W_v]
                _resident_spec(p["w1"].shape, _c00),
                _resident_spec(p["b1"].shape, _c00),
                _resident_spec(p["w2"].shape, _c00),
                _resident_spec(p["b2"].shape, _c00),
            ],
            out_specs=pl.BlockSpec((1, T, E), lambda b, i: (b, i, 0)),
            scratch_shapes=[
                pltpu.VMEM((N, 2 * E), BF16),      # cached K|V for the layer
                pltpu.VMEM((T, E), BF16),          # staged Q (ref-sliced per head)
                pltpu.VMEM((T, E), BF16),          # per-head attention outputs
            ],
            compiler_params=_compiler_params(),
            cost_estimate=ce,
        )

    return _call_with_fallback(
        build, (x, x, p["ln"], p["wqkv"], p["w1"], p["b1"], p["w2"], p["b2"]))


def decoder_layer(x, y, p, num_heads, *, row_tile=_ROW_TILE):
    B, N, E = x.shape
    _, M, _ = y.shape
    T = _pick_row_tile(M, row_tile)
    n_tiles = -(-M // T)
    kernel = functools.partial(_decoder_layer_kernel, num_heads=num_heads)

    flops = (2 * B * M * E * 3 * E + 2 * B * N * E * 2 * E + 2 * B * M * E * E
             + 4 * B * M * (M + N) * E + 16 * B * M * E * E)
    trans = B * num_heads * M * (M + N) + B * M * 4 * E
    bytes_acc = (3 * B * M * E + B * N * E) * 4 + (14 * E * E) * 2 + (17 * E) * 4
    ce = pl.CostEstimate(flops=int(flops), transcendentals=int(trans),
                         bytes_accessed=int(bytes_acc))

    def build():
        return pl.pallas_call(
            kernel,
            out_shape=jax.ShapeDtypeStruct((B, M, E), y.dtype),
            grid=(B, n_tiles),
            in_specs=[
                pl.BlockSpec((1, T, E), lambda b, i: (b, i, 0)),      # y row tile
                _resident_spec((1, M, E), lambda b, i: (b, 0, 0)),    # full y (self K/V src)
                _resident_spec((1, N, E), lambda b, i: (b, 0, 0)),    # full x (cross K/V src)
                _resident_spec(p["ln"].shape, _c00),
                _resident_spec(p["wqkv_s"].shape, _c00),
                _resident_spec(p["wqkv_c"].shape, _c00),
                _resident_spec(p["w1"].shape, _c00),
                _resident_spec(p["b1"].shape, _c00),
                _resident_spec(p["w2"].shape, _c00),
                _resident_spec(p["b2"].shape, _c00),
            ],
            out_specs=pl.BlockSpec((1, T, E), lambda b, i: (b, i, 0)),
            scratch_shapes=[
                pltpu.VMEM((M, 2 * E), BF16),      # self-attn K|V cache
                pltpu.VMEM((N, 2 * E), BF16),      # cross-attn K|V cache
                pltpu.VMEM((T, E), BF16),          # staged Q
                pltpu.VMEM((T, E), BF16),          # per-head attention outputs
            ],
            compiler_params=_compiler_params(),
            cost_estimate=ce,
        )

    return _call_with_fallback(
        build, (y, y, x, p["ln"], p["wqkv_s"], p["wqkv_c"],
                p["w1"], p["b1"], p["w2"], p["b2"]))


# ----------------------------- parameter init (deterministic) -----------------------------

def _init_mha(key, E, num_heads):
    kq, kk, kv = jax.random.split(key, 3)
    bound = 1.0 / math.sqrt(E)
    wq = jax.random.uniform(kq, (E, E), F32, -bound, bound)
    wk = jax.random.uniform(kk, (E, E), F32, -bound, bound)
    wv = jax.random.uniform(kv, (E, E), F32, -bound, bound)
    scale = (E // num_heads) ** (-0.5)                      # qk_scale=None default
    wqkv = jnp.concatenate([wq * scale, wk, wv], axis=1).astype(BF16)   # (E, 3E)
    ln = jnp.stack([jnp.ones((E,), F32), jnp.zeros((E,), F32),          # norm_x g, b
                    jnp.ones((E,), F32), jnp.zeros((E,), F32)], axis=0) # norm_y g, b
    return wqkv, ln


def _init_ffn(key, E):
    hid = 4 * E
    k1, k2, k3, k4 = jax.random.split(key, 4)
    b1 = 1.0 / math.sqrt(E)
    b2 = 1.0 / math.sqrt(hid)
    w1 = jax.random.uniform(k1, (E, hid), F32, -b1, b1).astype(BF16)
    bb1 = jax.random.uniform(k2, (1, hid), F32, -b1, b1)
    w2 = jax.random.uniform(k3, (hid, E), F32, -b2, b2).astype(BF16)
    bb2 = jax.random.uniform(k4, (1, E), F32, -b2, b2)
    ln = jnp.stack([jnp.ones((E,), F32), jnp.zeros((E,), F32),          # FeedForward.norm
                    jnp.ones((E,), F32), jnp.zeros((E,), F32)], axis=0) # net's LayerNorm
    return dict(w1=w1, b1=bb1, w2=w2, b2=bb2), ln


def init_transformer(key, n_layer, E, num_heads):
    params = {"encoder": [], "decoder": []}
    keys = jax.random.split(key, 2 * n_layer)
    for i in range(n_layer):
        ka, kf = jax.random.split(keys[i])
        wqkv, ln_a = _init_mha(ka, E, num_heads)
        ffn, ln_f = _init_ffn(kf, E)
        params["encoder"].append(dict(wqkv=wqkv,
                                      ln=jnp.concatenate([ln_a, ln_f], axis=0), **ffn))
    for i in range(n_layer):
        ks, kc, kf = jax.random.split(keys[n_layer + i], 3)
        wqkv_s, ln_s = _init_mha(ks, E, num_heads)
        wqkv_c, ln_c = _init_mha(kc, E, num_heads)
        ffn, ln_f = _init_ffn(kf, E)
        params["decoder"].append(dict(wqkv_s=wqkv_s, wqkv_c=wqkv_c,
                                      ln=jnp.concatenate([ln_s, ln_c, ln_f], axis=0), **ffn))
    return params


# ----------------------------- full model forward -----------------------------

def transformer_forward(x, y, params, num_heads):
    # Encoder stack: x = x + s_attn((x, x)); x = x + ff(x)   (fused per layer)
    for lp in params["encoder"]:
        x = encoder_layer(x, lp, num_heads)
    # Decoder stack: y = y + s_attn((y, y)); y = y + c_attn((x, y)); y = y + ff(y)
    for lp in params["decoder"]:
        y = decoder_layer(x, y, lp, num_heads)
    return x, y


if __name__ == "__main__":
    B, N, M, E, H = 2, 16, 8, 32, 8      # batch, seq_len_x, seq_len_y, dim, heads
    n_layer = 2

    key = jax.random.PRNGKey(0)
    kx, ky, kp = jax.random.split(key, 3)
    x = jax.random.normal(kx, (B, N, E), jnp.float32)   # 3d latent embedding
    y = jax.random.normal(ky, (B, M, E), jnp.float32)   # 2d latent embedding

    params = init_transformer(kp, n_layer, E, H)

    x_out, y_out = transformer_forward(x, y, params, H)
    jax.block_until_ready((x_out, y_out))

    assert x_out.shape == (B, N, E) and y_out.shape == (B, M, E)
    assert bool(jnp.all(jnp.isfinite(x_out))) and bool(jnp.all(jnp.isfinite(y_out)))
    print("KERNEL_OK")
</pallas_src>

<mosaic_0001>
module attributes {stable_mosaic.version = 11 : i64} {
  func.func @_encoder_layer_kernel(%arg0: i32, %arg1: i32, %arg2: memref<1x16x32xf32, #tpu.memory_space<vmem>>, %arg3: memref<1x16x32xf32, #tpu.memory_space<vmem>>, %arg4: memref<8x32xf32, #tpu.memory_space<vmem>>, %arg5: memref<32x96xbf16, #tpu.memory_space<vmem>>, %arg6: memref<32x128xbf16, #tpu.memory_space<vmem>>, %arg7: memref<1x128xf32, #tpu.memory_space<vmem>>, %arg8: memref<128x32xbf16, #tpu.memory_space<vmem>>, %arg9: memref<1x32xf32, #tpu.memory_space<vmem>>, %arg10: memref<1x16x32xf32, #tpu.memory_space<vmem>>, %arg11: memref<16x64xbf16, #tpu.memory_space<vmem>>, %arg12: memref<16x32xbf16, #tpu.memory_space<vmem>>, %arg13: memref<16x32xbf16, #tpu.memory_space<vmem>>) attributes {dimension_semantics = [#tpu.dimension_semantics<parallel>, #tpu.dimension_semantics<arbitrary>], iteration_bounds = array<i64: 2, 1>, scalar_prefetch = 0 : i64, scratch_operands = 3 : i64, tpu.core_type = #tpu.core_type<tc>, window_params = [{transform_indices = @transform_0, window_bounds = array<i64: 1, 16, 32>}, {pipeline_mode = #tpu.pipeline_mode<synchronous>, transform_indices = @transform_1, window_bounds = array<i64: 1, 16, 32>}, {pipeline_mode = #tpu.pipeline_mode<synchronous>, transform_indices = @transform_2, window_bounds = array<i64: 8, 32>}, {pipeline_mode = #tpu.pipeline_mode<synchronous>, transform_indices = @transform_3, window_bounds = array<i64: 32, 96>}, {pipeline_mode = #tpu.pipeline_mode<synchronous>, transform_indices = @transform_4, window_bounds = array<i64: 32, 128>}, {pipeline_mode = #tpu.pipeline_mode<synchronous>, transform_indices = @transform_5, window_bounds = array<i64: 1, 128>}, {pipeline_mode = #tpu.pipeline_mode<synchronous>, transform_indices = @transform_6, window_bounds = array<i64: 128, 32>}, {pipeline_mode = #tpu.pipeline_mode<synchronous>, transform_indices = @transform_7, window_bounds = array<i64: 1, 32>}, {transform_indices = @transform_8, window_bounds = array<i64: 1, 16, 32>}]} {
    %c0_i32 = arith.constant 0 : i32
    %0 = arith.cmpi eq, %arg1, %c0_i32 : i32
    %1 = arith.extui %0 : i1 to i32
    %c0_i32_0 = arith.constant 0 : i32
    %2 = arith.cmpi ne, %1, %c0_i32_0 : i32
    scf.if %2 {
      %c0_164 = arith.constant 0 : index
      %c0_165 = arith.constant 0 : index
      %c0_166 = arith.constant 0 : index
      %373 = vector.load %arg3[%c0_164, %c0_165, %c0_166] : memref<1x16x32xf32, #tpu.memory_space<vmem>>, vector<1x16x32xf32>
      %374 = vector.shape_cast %373 : vector<1x16x32xf32> to vector<16x32xf32>
      %c0_167 = arith.constant 0 : index
      %c0_168 = arith.constant 0 : index
      %375 = vector.load %arg4[%c0_167, %c0_168] : memref<8x32xf32, #tpu.memory_space<vmem>>, vector<1x32xf32>
      %c1 = arith.constant 1 : index
      %c0_169 = arith.constant 0 : index
      %376 = vector.load %arg4[%c1, %c0_169] : memref<8x32xf32, #tpu.memory_space<vmem>>, vector<1x32xf32>
      %cst_170 = arith.constant dense<0.000000e+00> : vector<16xf32>
      %377 = vector.multi_reduction <add>, %374, %cst_170 [1] : vector<16x32xf32> to vector<16xf32>
      %378 = vector.shape_cast %377 : vector<16xf32> to vector<16x1xf32>
      %cst_171 = arith.constant 3.200000e+01 : f32
      %379 = vector.broadcast %cst_171 : f32 to vector<16x1xf32>
      %380 = arith.divf %378, %379 : vector<16x1xf32>
      %381 = vector.broadcast %380 : vector<16x1xf32> to vector<16x32xf32>
      %382 = arith.subf %374, %381 : vector<16x32xf32>
      %383 = arith.mulf %382, %382 : vector<16x32xf32>
      %cst_172 = arith.constant dense<0.000000e+00> : vector<16xf32>
      %384 = vector.multi_reduction <add>, %383, %cst_172 [1] : vector<16x32xf32> to vector<16xf32>
      %385 = vector.shape_cast %384 : vector<16xf32> to vector<16x1xf32>
      %cst_173 = arith.constant 3.200000e+01 : f32
      %386 = vector.broadcast %cst_173 : f32 to vector<16x1xf32>
      %387 = arith.divf %385, %386 : vector<16x1xf32>
      %388 = vector.broadcast %380 : vector<16x1xf32> to vector<16x32xf32>
      %389 = arith.subf %374, %388 : vector<16x32xf32>
      %cst_174 = arith.constant 9.99999974E-6 : f32
      %390 = vector.broadcast %cst_174 : f32 to vector<16x1xf32>
      %391 = arith.addf %387, %390 : vector<16x1xf32>
      %392 = math.rsqrt %391 : vector<16x1xf32>
      %393 = vector.broadcast %392 : vector<16x1xf32> to vector<16x32xf32>
      %394 = arith.mulf %389, %393 : vector<16x32xf32>
      %395 = vector.broadcast %375 : vector<1x32xf32> to vector<16x32xf32>
      %396 = arith.mulf %394, %395 : vector<16x32xf32>
      %397 = vector.broadcast %376 : vector<1x32xf32> to vector<16x32xf32>
      %398 = arith.addf %396, %397 : vector<16x32xf32>
      %399 = arith.truncf %398 : vector<16x32xf32> to vector<16x32xbf16>
      %c0_175 = arith.constant 0 : index
      %c32_176 = arith.constant 32 : index
      %400 = vector.load %arg5[%c0_175, %c32_176] : memref<32x96xbf16, #tpu.memory_space<vmem>>, vector<32x64xbf16>
      %cst_177 = arith.constant dense<0.000000e+00> : vector<16x64xf32>
      %401 = tpu.matmul %399, %400, %cst_177 {dimension_numbers = #tpu.dot_dimension_numbers<[1], [0], [0], [1], [0, 0, 1, 1], [], []>} : vector<16x32xbf16>, vector<32x64xbf16>, vector<16x64xf32> -> vector<16x64xf32>
      %402 = arith.truncf %401 : vector<16x64xf32> to vector<16x64xbf16>
      %c0_178 = arith.constant 0 : index
      %c0_179 = arith.constant 0 : index
      %403 = vector.load %arg11[%c0_178, %c0_179] : memref<16x64xbf16, #tpu.memory_space<vmem>>, vector<16x64xbf16>
      tpu.vector_store %arg11[%c0_178, %c0_179], %402 {strides = array<i32>} : memref<16x64xbf16, #tpu.memory_space<vmem>>, vector<16x64xbf16>,
    } else {
    }
    %c0 = arith.constant 0 : index
    %c0_1 = arith.constant 0 : index
    %c0_2 = arith.constant 0 : index
    %3 = vector.load %arg2[%c0, %c0_1, %c0_2] : memref<1x16x32xf32, #tpu.memory_space<vmem>>, vector<1x16x32xf32>
    %4 = vector.shape_cast %3 : vector<1x16x32xf32> to vector<16x32xf32>
    %c2 = arith.constant 2 : index
    %c0_3 = arith.constant 0 : index
    %5 = vector.load %arg4[%c2, %c0_3] : memref<8x32xf32, #tpu.memory_space<vmem>>, vector<1x32xf32>
    %c3 = arith.constant 3 : index
    %c0_4 = arith.constant 0 : index
    %6 = vector.load %arg4[%c3, %c0_4] : memref<8x32xf32, #tpu.memory_space<vmem>>, vector<1x32xf32>
    %cst = arith.constant dense<0.000000e+00> : vector<16xf32>
    %7 = vector.multi_reduction <add>, %4, %cst [1] : vector<16x32xf32> to vector<16xf32>
    %8 = vector.shape_cast %7 : vector<16xf32> to vector<16x1xf32>
    %cst_5 = arith.constant 3.200000e+01 : f32
    %9 = vector.broadcast %cst_5 : f32 to vector<16x1xf32>
    %10 = arith.divf %8, %9 : vector<16x1xf32>
    %11 = vector.broadcast %10 : vector<16x1xf32> to vector<16x32xf32>
    %12 = arith.subf %4, %11 : vector<16x32xf32>
    %13 = arith.mulf %12, %12 : vector<16x32xf32>
    %cst_6 = arith.constant dense<0.000000e+00> : vector<16xf32>
    %14 = vector.multi_reduction <add>, %13, %cst_6 [1] : vector<16x32xf32> to vector<16xf32>
    %15 = vector.shape_cast %14 : vector<16xf32> to vector<16x1xf32>
    %cst_7 = arith.constant 3.200000e+01 : f32
    %16 = vector.broadcast %cst_7 : f32 to vector<16x1xf32>
    %17 = arith.divf %15, %16 : vector<16x1xf32>
    %18 = vector.broadcast %10 : vector<16x1xf32> to vector<16x32xf32>
    %19 = arith.subf %4, %18 : vector<16x32xf32>
    %cst_8 = arith.constant 9.99999974E-6 : f32
    %20 = vector.broadcast %cst_8 : f32 to vector<16x1xf32>
    %21 = arith.addf %17, %20 : vector<16x1xf32>
    %22 = math.rsqrt %21 : vector<16x1xf32>
    %23 = vector.broadcast %22 : vector<16x1xf32> to vector<16x32xf32>
    %24 = arith.mulf %19, %23 : vector<16x32xf32>
    %25 = vector.broadcast %5 : vector<1x32xf32> to vector<16x32xf32>
    %26 = arith.mulf %24, %25 : vector<16x32xf32>
    %27 = vector.broadcast %6 : vector<1x32xf32> to vector<16x32xf32>
    %28 = arith.addf %26, %27 : vector<16x32xf32>
    %29 = arith.truncf %28 : vector<16x32xf32> to vector<16x32xbf16>
    %c0_9 = arith.constant 0 : index
    %c0_10 = arith.constant 0 : index
    %30 = vector.load %arg5[%c0_9, %c0_10] : memref<32x96xbf16, #tpu.memory_space<vmem>>, vector<32x32xbf16>
    %cst_11 = arith.constant dense<0.000000e+00> : vector<16x32xf32>
    %31 = tpu.matmul %29, %30, %cst_11 {dimension_numbers = #tpu.dot_dimension_numbers<[1], [0], [0], [1], [0, 0, 1, 1], [], []>} : vector<16x32xbf16>, vector<32x32xbf16>, vector<16x32xf32> -> vector<16x32xf32>
    %32 = arith.truncf %31 : vector<16x32xf32> to vector<16x32xbf16>
    %c0_12 = arith.constant 0 : index
    %c0_13 = arith.constant 0 : index
    %33 = vector.load %arg12[%c0_12, %c0_13] : memref<16x32xbf16, #tpu.memory_space<vmem>>, vector<16x32xbf16>
    tpu.vector_store %arg12[%c0_12, %c0_13], %32 {strides = array<i32>} : memref<16x32xbf16, #tpu.memory_space<vmem>>, vector<16x32xbf16>,
    %c0_14 = arith.constant 0 : index
    %c0_15 = arith.constant 0 : index
    %34 = vector.load %arg12[%c0_14, %c0_15] : memref<16x32xbf16, #tpu.memory_space<vmem>>, vector<16x4xbf16>
    %cst_16 = arith.constant 0xFF800000 : f32
    %35 = vector.broadcast %cst_16 : f32 to vector<16x1xf32>
    %cst_17 = arith.constant 0.000000e+00 : f32
    %36 = vector.broadcast %cst_17 : f32 to vector<16x1xf32>
    %cst_18 = arith.constant 0.000000e+00 : f32
    %37 = vector.broadcast %cst_18 : f32 to vector<16x4xf32>
    %c0_19 = arith.constant 0 : index
    %c0_20 = arith.constant 0 : index
    %38 = vector.load %arg11[%c0_19, %c0_20] : memref<16x64xbf16, #tpu.memory_space<vmem>>, vector<16x4xbf16>
    %c0_21 = arith.constant 0 : index
    %c32 = arith.constant 32 : index
    %39 = vector.load %arg11[%c0_21, %c32] : memref<16x64xbf16, #tpu.memory_space<vmem>>, vector<16x4xbf16>
    %cst_22 = arith.constant dense<0.000000e+00> : vector<16x16xf32>
    %40 = tpu.matmul %34, %38, %cst_22 {dimension_numbers = #tpu.dot_dimension_numbers<[1], [1], [0], [0], [0, 0, 1, 0], [], []>} : vector<16x4xbf16>, vector<16x4xbf16>, vector<16x16xf32> -> vector<16x16xf32>
    %cst_23 = arith.constant dense<0xFF800000> : vector<16xf32>
    %41 = vector.multi_reduction <maximumf>, %40, %cst_23 [1] : vector<16x16xf32> to vector<16xf32>
    %42 = vector.shape_cast %41 : vector<16xf32> to vector<16x1xf32>
    %43 = arith.maximumf %35, %42 : vector<16x1xf32>
    %44 = arith.subf %35, %43 : vector<16x1xf32>
    %45 = math.exp %44 : vector<16x1xf32>
    %46 = vector.broadcast %43 : vector<16x1xf32> to vector<16x16xf32>
    %47 = arith.subf %40, %46 : vector<16x16xf32>
    %48 = math.exp %47 : vector<16x16xf32>
    %49 = arith.mulf %45, %36 : vector<16x1xf32>
    %cst_24 = arith.constant dense<0.000000e+00> : vector<16xf32>
    %50 = vector.multi_reduction <add>, %48, %cst_24 [1] : vector<16x16xf32> to vector<16xf32>
    %51 = vector.shape_cast %50 : vector<16xf32> to vector<16x1xf32>
    %52 = arith.addf %49, %51 : vector<16x1xf32>
    %53 = vector.broadcast %45 : vector<16x1xf32> to vector<16x4xf32>
    %54 = arith.mulf %53, %37 : vector<16x4xf32>
    %55 = arith.truncf %48 : vector<16x16xf32> to vector<16x16xbf16>
    %cst_25 = arith.constant dense<0.000000e+00> : vector<16x4xf32>
    %56 = tpu.matmul %55, %39, %cst_25 {dimension_numbers = #tpu.dot_dimension_numbers<[1], [0], [0], [1], [0, 0, 1, 1], [], []>} : vector<16x16xbf16>, vector<16x4xbf16>, vector<16x4xf32> -> vector<16x4xf32>
    %57 = arith.addf %54, %56 : vector<16x4xf32>
    %58 = tpu.reciprocal %52 {approx = true} : vector<16x1xf32> -> vector<16x1xf32>
    %59 = vector.broadcast %58 : vector<16x1xf32> to vector<16x4xf32>
    %60 = arith.mulf %57, %59 : vector<16x4xf32>
    %61 = arith.truncf %60 : vector<16x4xf32> to vector<16x4xbf16>
    %c0_26 = arith.constant 0 : index
    %c0_27 = arith.constant 0 : index
    %62 = vector.load %arg13[%c0_26, %c0_27] : memref<16x32xbf16, #tpu.memory_space<vmem>>, vector<16x4xbf16>
    tpu.vector_store %arg13[%c0_26, %c0_27], %61 {strides = array<i32>} : memref<16x32xbf16, #tpu.memory_space<vmem>>, vector<16x4xbf16>,
    %c0_28 = arith.constant 0 : index
    %c4 = arith.constant 4 : index
    %63 = vector.load %arg12[%c0_28, %c4] : memref<16x32xbf16, #tpu.memory_space<vmem>>, vector<16x4xbf16>
    %cst_29 = arith.constant 0xFF800000 : f32
    %64 = vector.broadcast %cst_29 : f32 to vector<16x1xf32>
    %cst_30 = arith.constant 0.000000e+00 : f32
    %65 = vector.broadcast %cst_30 : f32 to vector<16x1xf32>
    %cst_31 = arith.constant 0.000000e+00 : f32
    %66 = vector.broadcast %cst_31 : f32 to vector<16x4xf32>
    %c0_32 = arith.constant 0 : index
    %c4_33 = arith.constant 4 : index
    %67 = vector.load %arg11[%c0_32, %c4_33] : memref<16x64xbf16, #tpu.memory_space<vmem>>, vector<16x4xbf16>
    %c0_34 = arith.constant 0 : index
    %c36 = arith.constant 36 : index
    %68 = vector.load %arg11[%c0_34, %c36] : memref<16x64xbf16, #tpu.memory_space<vmem>>, vector<16x4xbf16>
    %cst_35 = arith.constant dense<0.000000e+00> : vector<16x16xf32>
    %69 = tpu.matmul %63, %67, %cst_35 {dimension_numbers = #tpu.dot_dimension_numbers<[1], [1], [0], [0], [0, 0, 1, 0], [], []>} : vector<16x4xbf16>, vector<16x4xbf16>, vector<16x16xf32> -> vector<16x16xf32>
    %cst_36 = arith.constant dense<0xFF800000> : vector<16xf32>
    %70 = vector.multi_reduction <maximumf>, %69, %cst_36 [1] : vector<16x16xf32> to vector<16xf32>
    %71 = vector.shape_cast %70 : vector<16xf32> to vector<16x1xf32>
    %72 = arith.maximumf %64, %71 : vector<16x1xf32>
    %73 = arith.subf %64, %72 : vector<16x1xf32>
    %74 = math.exp %73 : vector<16x1xf32>
    %75 = vector.broadcast %72 : vector<16x1xf32> to vector<16x16xf32>
    %76 = arith.subf %69, %75 : vector<16x16xf32>
    %77 = math.exp %76 : vector<16x16xf32>
    %78 = arith.mulf %74, %65 : vector<16x1xf32>
    %cst_37 = arith.constant dense<0.000000e+00> : vector<16xf32>
    %79 = vector.multi_reduction <add>, %77, %cst_37 [1] : vector<16x16xf32> to vector<16xf32>
    %80 = vector.shape_cast %79 : vector<16xf32> to vector<16x1xf32>
    %81 = arith.addf %78, %80 : vector<16x1xf32>
    %82 = vector.broadcast %74 : vector<16x1xf32> to vector<16x4xf32>
    %83 = arith.mulf %82, %66 : vector<16x4xf32>
    %84 = arith.truncf %77 : vector<16x16xf32> to vector<16x16xbf16>
    %cst_38 = arith.constant dense<0.000000e+00> : vector<16x4xf32>
    %85 = tpu.matmul %84, %68, %cst_38 {dimension_numbers = #tpu.dot_dimension_numbers<[1], [0], [0], [1], [0, 0, 1, 1], [], []>} : vector<16x16xbf16>, vector<16x4xbf16>, vector<16x4xf32> -> vector<16x4xf32>
    %86 = arith.addf %83, %85 : vector<16x4xf32>
    %87 = tpu.reciprocal %81 {approx = true} : vector<16x1xf32> -> vector<16x1xf32>
    %88 = vector.broadcast %87 : vector<16x1xf32> to vector<16x4xf32>
    %89 = arith.mulf %86, %88 : vector<16x4xf32>
    %90 = arith.truncf %89 : vector<16x4xf32> to vector<16x4xbf16>
    %c0_39 = arith.constant 0 : index
    %c4_40 = arith.constant 4 : index
    %91 = vector.load %arg13[%c0_39, %c4_40] : memref<16x32xbf16, #tpu.memory_space<vmem>>, vector<16x4xbf16>
    tpu.vector_store %arg13[%c0_39, %c4_40], %90 {strides = array<i32>} : memref<16x32xbf16, #tpu.memory_space<vmem>>, vector<16x4xbf16>,
    %c0_41 = arith.constant 0 : index
    %c8 = arith.constant 8 : index
    %92 = vector.load %arg12[%c0_41, %c8] : memref<16x32xbf16, #tpu.memory_space<vmem>>, vector<16x4xbf16>
    %cst_42 = arith.constant 0xFF800000 : f32
    %93 = vector.broadcast %cst_42 : f32 to vector<16x1xf32>
    %cst_43 = arith.constant 0.000000e+00 : f32
    %94 = vector.broadcast %cst_43 : f32 to vector<16x1xf32>
    %cst_44 = arith.constant 0.000000e+00 : f32
    %95 = vector.broadcast %cst_44 : f32 to vector<16x4xf32>
    %c0_45 = arith.constant 0 : index
    %c8_46 = arith.constant 8 : index
    %96 = vector.load %arg11[%c0_45, %c8_46] : memref<16x64xbf16, #tpu.memory_space<vmem>>, vector<16x4xbf16>
    %c0_47 = arith.constant 0 : index
    %c40 = arith.constant 40 : index
    %97 = vector.load %arg11[%c0_47, %c40] : memref<16x64xbf16, #tpu.memory_space<vmem>>, vector<16x4xbf16>
    %cst_48 = arith.constant dense<0.000000e+00> : vector<16x16xf32>
    %98 = tpu.matmul %92, %96, %cst_48 {dimension_numbers = #tpu.dot_dimension_numbers<[1], [1], [0], [0], [0, 0, 1, 0], [], []>} : vector<16x4xbf16>, vector<16x4xbf16>, vector<16x16xf32> -> vector<16x16xf32>
    %cst_49 = arith.constant dense<0xFF800000> : vector<16xf32>
    %99 = vector.multi_reduction <maximumf>, %98, %cst_49 [1] : vector<16x16xf32> to vector<16xf32>
    %100 = vector.shape_cast %99 : vector<16xf32> to vector<16x1xf32>
    %101 = arith.maximumf %93, %100 : vector<16x1xf32>
    %102 = arith.subf %93, %101 : vector<16x1xf32>
    %103 = math.exp %102 : vector<16x1xf32>
    %104 = vector.broadcast %101 : vector<16x1xf32> to vector<16x16xf32>
    %105 = arith.subf %98, %104 : vector<16x16xf32>
    %106 = math.exp %105 : vector<16x16xf32>
    %107 = arith.mulf %103, %94 : vector<16x1xf32>
    %cst_50 = arith.constant dense<0.000000e+00> : vector<16xf32>
    %108 = vector.multi_reduction <add>, %106, %cst_50 [1] : vector<16x16xf32> to vector<16xf32>
    %109 = vector.shape_cast %108 : vector<16xf32> to vector<16x1xf32>
    %110 = arith.addf %107, %109 : vector<16x1xf32>
    %111 = vector.broadcast %103 : vector<16x1xf32> to vector<16x4xf32>
    %112 = arith.mulf %111, %95 : vector<16x4xf32>
    %113 = arith.truncf %106 : vector<16x16xf32> to vector<16x16xbf16>
    %cst_51 = arith.constant dense<0.000000e+00> : vector<16x4xf32>
    %114 = tpu.matmul %113, %97, %cst_51 {dimension_numbers = #tpu.dot_dimension_numbers<[1], [0], [0], [1], [0, 0, 1, 1], [], []>} : vector<16x16xbf16>, vector<16x4xbf16>, vector<16x4xf32> -> vector<16x4xf32>
    %115 = arith.addf %112, %114 : vector<16x4xf32>
    %116 = tpu.reciprocal %110 {approx = true} : vector<16x1xf32> -> vector<16x1xf32>
    %117 = vector.broadcast %116 : vector<16x1xf32> to vector<16x4xf32>
    %118 = arith.mulf %115, %117 : vector<16x4xf32>
    %119 = arith.truncf %118 : vector<16x4xf32> to vector<16x4xbf16>
    %c0_52 = arith.constant 0 : index
    %c8_53 = arith.constant 8 : index
    %120 = vector.load %arg13[%c0_52, %c8_53] : memref<16x32xbf16, #tpu.memory_space<vmem>>, vector<16x4xbf16>
    tpu.vector_store %arg13[%c0_52, %c8_53], %119 {strides = array<i32>} : memref<16x32xbf16, #tpu.memory_space<vmem>>, vector<16x4xbf16>,
    %c0_54 = arith.constant 0 : index
    %c12 = arith.constant 12 : index
    %121 = vector.load %arg12[%c0_54, %c12] : memref<16x32xbf16, #tpu.memory_space<vmem>>, vector<16x4xbf16>
    %cst_55 = arith.constant 0xFF800000 : f32
    %122 = vector.broadcast %cst_55 : f32 to vector<16x1xf32>
    %cst_56 = arith.constant 0.000000e+00 : f32
    %123 = vector.broadcast %cst_56 : f32 to vector<16x1xf32>
    %cst_57 = arith.constant 0.000000e+00 : f32
    %124 = vector.broadcast %cst_57 : f32 to vector<16x4xf32>
    %c0_58 = arith.constant 0 : index
    %c12_59 = arith.constant 12 : index
    %125 = vector.load %arg11[%c0_58, %c12_59] : memref<16x64xbf16, #tpu.memory_space<vmem>>, vector<16x4xbf16>
    %c0_60 = arith.constant 0 : index
    %c44 = arith.constant 44 : index
    %126 = vector.load %arg11[%c0_60, %c44] : memref<16x64xbf16, #tpu.memory_space<vmem>>, vector<16x4xbf16>
    %cst_61 = arith.constant dense<0.000000e+00> : vector<16x16xf32>
    %127 = tpu.matmul %121, %125, %cst_61 {dimension_numbers = #tpu.dot_dimension_numbers<[1], [1], [0], [0], [0, 0, 1, 0], [], []>} : vector<16x4xbf16>, vector<16x4xbf16>, vector<16x16xf32> -> vector<16x16xf32>
    %cst_62 = arith.constant dense<0xFF800000> : vector<16xf32>
    %128 = vector.multi_reduction <maximumf>, %127, %cst_62 [1] : vector<16x16xf32> to vector<16xf32>
    %129 = vector.shape_cast %128 : vector<16xf32> to vector<16x1xf32>
    %130 = arith.maximumf %122, %129 : vector<16x1xf32>
    %131 = arith.subf %122, %130 : vector<16x1xf32>
    %132 = math.exp %131 : vector<16x1xf32>
    %133 = vector.broadcast %130 : vector<16x1xf32> to vector<16x16xf32>
    %134 = arith.subf %127, %133 : vector<16x16xf32>
    %135 = math.exp %134 : vector<16x16xf32>
    %136 = arith.mulf %132, %123 : vector<16x1xf32>
    %cst_63 = arith.constant dense<0.000000e+00> : vector<16xf32>
    %137 = vector.multi_reduction <add>, %135, %cst_63 [1] : vector<16x16xf32> to vector<16xf32>
    %138 = vector.shape_cast %137 : vector<16xf32> to vector<16x1xf32>
    %139 = arith.addf %136, %138 : vector<16x1xf32>
    %140 = vector.broadcast %132 : vector<16x1xf32> to vector<16x4xf32>
    %141 = arith.mulf %140, %124 : vector<16x4xf32>
    %142 = arith.truncf %135 : vector<16x16xf32> to vector<16x16xbf16>
    %cst_64 = arith.constant dense<0.000000e+00> : vector<16x4xf32>
    %143 = tpu.matmul %142, %126, %cst_64 {dimension_numbers = #tpu.dot_dimension_numbers<[1], [0], [0], [1], [0, 0, 1, 1], [], []>} : vector<16x16xbf16>, vector<16x4xbf16>, vector<16x4xf32> -> vector<16x4xf32>
    %144 = arith.addf %141, %143 : vector<16x4xf32>
    %145 = tpu.reciprocal %139 {approx = true} : vector<16x1xf32> -> vector<16x1xf32>
    %146 = vector.broadcast %145 : vector<16x1xf32> to vector<16x4xf32>
    %147 = arith.mulf %144, %146 : vector<16x4xf32>
    %148 = arith.truncf %147 : vector<16x4xf32> to vector<16x4xbf16>
    %c0_65 = arith.constant 0 : index
    %c12_66 = arith.constant 12 : index
    %149 = vector.load %arg13[%c0_65, %c12_66] : memref<16x32xbf16, #tpu.memory_space<vmem>>, vector<16x4xbf16>
    tpu.vector_store %arg13[%c0_65, %c12_66], %148 {strides = array<i32>} : memref<16x32xbf16, #tpu.memory_space<vmem>>, vector<16x4xbf16>,
    %c0_67 = arith.constant 0 : index
    %c16 = arith.constant 16 : index
    %150 = vector.load %arg12[%c0_67, %c16] : memref<16x32xbf16, #tpu.memory_space<vmem>>, vector<16x4xbf16>
    %cst_68 = arith.constant 0xFF800000 : f32
    %151 = vector.broadcast %cst_68 : f32 to vector<16x1xf32>
    %cst_69 = arith.constant 0.000000e+00 : f32
    %152 = vector.broadcast %cst_69 : f32 to vector<16x1xf32>
    %cst_70 = arith.constant 0.000000e+00 : f32
    %153 = vector.broadcast %cst_70 : f32 to vector<16x4xf32>
    %c0_71 = arith.constant 0 : index
    %c16_72 = arith.constant 16 : index
    %154 = vector.load %arg11[%c0_71, %c16_72] : memref<16x64xbf16, #tpu.memory_space<vmem>>, vector<16x4xbf16>
    %c0_73 = arith.constant 0 : index
    %c48 = arith.constant 48 : index
    %155 = vector.load %arg11[%c0_73, %c48] : memref<16x64xbf16, #tpu.memory_space<vmem>>, vector<16x4xbf16>
    %cst_74 = arith.constant dense<0.000000e+00> : vector<16x16xf32>
    %156 = tpu.matmul %150, %154, %cst_74 {dimension_numbers = #tpu.dot_dimension_numbers<[1], [1], [0], [0], [0, 0, 1, 0], [], []>} : vector<16x4xbf16>, vector<16x4xbf16>, vector<16x16xf32> -> vector<16x16xf32>
    %cst_75 = arith.constant dense<0xFF800000> : vector<16xf32>
    %157 = vector.multi_reduction <maximumf>, %156, %cst_75 [1] : vector<16x16xf32> to vector<16xf32>
    %158 = vector.shape_cast %157 : vector<16xf32> to vector<16x1xf32>
    %159 = arith.maximumf %151, %158 : vector<16x1xf32>
    %160 = arith.subf %151, %159 : vector<16x1xf32>
    %161 = math.exp %160 : vector<16x1xf32>
    %162 = vector.broadcast %159 : vector<16x1xf32> to vector<16x16xf32>
    %163 = arith.subf %156, %162 : vector<16x16xf32>
    %164 = math.exp %163 : vector<16x16xf32>
    %165 = arith.mulf %161, %152 : vector<16x1xf32>
    %cst_76 = arith.constant dense<0.000000e+00> : vector<16xf32>
    %166 = vector.multi_reduction <add>, %164, %cst_76 [1] : vector<16x16xf32> to vector<16xf32>
    %167 = vector.shape_cast %166 : vector<16xf32> to vector<16x1xf32>
    %168 = arith.addf %165, %167 : vector<16x1xf32>
    %169 = vector.broadcast %161 : vector<16x1xf32> to vector<16x4xf32>
    %170 = arith.mulf %169, %153 : vector<16x4xf32>
    %171 = arith.truncf %164 : vector<16x16xf32> to vector<16x16xbf16>
    %cst_77 = arith.constant dense<0.000000e+00> : vector<16x4xf32>
    %172 = tpu.matmul %171, %155, %cst_77 {dimension_numbers = #tpu.dot_dimension_numbers<[1], [0], [0], [1], [0, 0, 1, 1], [], []>} : vector<16x16xbf16>, vector<16x4xbf16>, vector<16x4xf32> -> vector<16x4xf32>
    %173 = arith.addf %170, %172 : vector<16x4xf32>
    %174 = tpu.reciprocal %168 {approx = true} : vector<16x1xf32> -> vector<16x1xf32>
    %175 = vector.broadcast %174 : vector<16x1xf32> to vector<16x4xf32>
    %176 = arith.mulf %173, %175 : vector<16x4xf32>
    %177 = arith.truncf %176 : vector<16x4xf32> to vector<16x4xbf16>
    %c0_78 = arith.constant 0 : index
    %c16_79 = arith.constant 16 : index
    %178 = vector.load %arg13[%c0_78, %c16_79] : memref<16x32xbf16, #tpu.memory_space<vmem>>, vector<16x4xbf16>
    tpu.vector_store %arg13[%c0_78, %c16_79], %177 {strides = array<i32>} : memref<16x32xbf16, #tpu.memory_space<vmem>>, vector<16x4xbf16>,
    %c0_80 = arith.constant 0 : index
    %c20 = arith.constant 20 : index
    %179 = vector.load %arg12[%c0_80, %c20] : memref<16x32xbf16, #tpu.memory_space<vmem>>, vector<16x4xbf16>
    %cst_81 = arith.constant 0xFF800000 : f32
    %180 = vector.broadcast %cst_81 : f32 to vector<16x1xf32>
    %cst_82 = arith.constant 0.000000e+00 : f32
    %181 = vector.broadcast %cst_82 : f32 to vector<16x1xf32>
    %cst_83 = arith.constant 0.000000e+00 : f32
    %182 = vector.broadcast %cst_83 : f32 to vector<16x4xf32>
    %c0_84 = arith.constant 0 : index
    %c20_85 = arith.constant 20 : index
    %183 = vector.load %arg11[%c0_84, %c20_85] : memref<16x64xbf16, #tpu.memory_space<vmem>>, vector<16x4xbf16>
    %c0_86 = arith.constant 0 : index
    %c52 = arith.constant 52 : index
    %184 = vector.load %arg11[%c0_86, %c52] : memref<16x64xbf16, #tpu.memory_space<vmem>>, vector<16x4xbf16>
    %cst_87 = arith.constant dense<0.000000e+00> : vector<16x16xf32>
    %185 = tpu.matmul %179, %183, %cst_87 {dimension_numbers = #tpu.dot_dimension_numbers<[1], [1], [0], [0], [0, 0, 1, 0], [], []>} : vector<16x4xbf16>, vector<16x4xbf16>, vector<16x16xf32> -> vector<16x16xf32>
    %cst_88 = arith.constant dense<0xFF800000> : vector<16xf32>
    %186 = vector.multi_reduction <maximumf>, %185, %cst_88 [1] : vector<16x16xf32> to vector<16xf32>
    %187 = vector.shape_cast %186 : vector<16xf32> to vector<16x1xf32>
    %188 = arith.maximumf %180, %187 : vector<16x1xf32>
    %189 = arith.subf %180, %188 : vector<16x1xf32>
    %190 = math.exp %189 : vector<16x1xf32>
    %191 = vector.broadcast %188 : vector<16x1xf32> to vector<16x16xf32>
    %192 = arith.subf %185, %191 : vector<16x16xf32>
    %193 = math.exp %192 : vector<16x16xf32>
    %194 = arith.mulf %190, %181 : vector<16x1xf32>
    %cst_89 = arith.constant dense<0.000000e+00> : vector<16xf32>
    %195 = vector.multi_reduction <add>, %193, %cst_89 [1] : vector<16x16xf32> to vector<16xf32>
    %196 = vector.shape_cast %195 : vector<16xf32> to vector<16x1xf32>
    %197 = arith.addf %194, %196 : vector<16x1xf32>
    %198 = vector.broadcast %190 : vector<16x1xf32> to vector<16x4xf32>
    %199 = arith.mulf %198, %182 : vector<16x4xf32>
    %200 = arith.truncf %193 : vector<16x16xf32> to vector<16x16xbf16>
    %cst_90 = arith.constant dense<0.000000e+00> : vector<16x4xf32>
    %201 = tpu.matmul %200, %184, %cst_90 {dimension_numbers = #tpu.dot_dimension_numbers<[1], [0], [0], [1], [0, 0, 1, 1], [], []>} : vector<16x16xbf16>, vector<16x4xbf16>, vector<16x4xf32> -> vector<16x4xf32>
    %202 = arith.addf %199, %201 : vector<16x4xf32>
    %203 = tpu.reciprocal %197 {approx = true} : vector<16x1xf32> -> vector<16x1xf32>
    %204 = vector.broadcast %203 : vector<16x1xf32> to vector<16x4xf32>
    %205 = arith.mulf %202, %204 : vector<16x4xf32>
    %206 = arith.truncf %205 : vector<16x4xf32> to vector<16x4xbf16>
    %c0_91 = arith.constant 0 : index
    %c20_92 = arith.constant 20 : index
    %207 = vector.load %arg13[%c0_91, %c20_92] : memref<16x32xbf16, #tpu.memory_space<vmem>>, vector<16x4xbf16>
    tpu.vector_store %arg13[%c0_91, %c20_92], %206 {strides = array<i32>} : memref<16x32xbf16, #tpu.memory_space<vmem>>, vector<16x4xbf16>,
    %c0_93 = arith.constant 0 : index
    %c24 = arith.constant 24 : index
    %208 = vector.load %arg12[%c0_93, %c24] : memref<16x32xbf16, #tpu.memory_space<vmem>>, vector<16x4xbf16>
    %cst_94 = arith.constant 0xFF800000 : f32
    %209 = vector.broadcast %cst_94 : f32 to vector<16x1xf32>
    %cst_95 = arith.constant 0.000000e+00 : f32
    %210 = vector.broadcast %cst_95 : f32 to vector<16x1xf32>
    %cst_96 = arith.constant 0.000000e+00 : f32
    %211 = vector.broadcast %cst_96 : f32 to vector<16x4xf32>
    %c0_97 = arith.constant 0 : index
    %c24_98 = arith.constant 24 : index
    %212 = vector.load %arg11[%c0_97, %c24_98] : memref<16x64xbf16, #tpu.memory_space<vmem>>, vector<16x4xbf16>
    %c0_99 = arith.constant 0 : index
    %c56 = arith.constant 56 : index
    %213 = vector.load %arg11[%c0_99, %c56] : memref<16x64xbf16, #tpu.memory_space<vmem>>, vector<16x4xbf16>
    %cst_100 = arith.constant dense<0.000000e+00> : vector<16x16xf32>
    %214 = tpu.matmul %208, %212, %cst_100 {dimension_numbers = #tpu.dot_dimension_numbers<[1], [1], [0], [0], [0, 0, 1, 0], [], []>} : vector<16x4xbf16>, vector<16x4xbf16>, vector<16x16xf32> -> vector<16x16xf32>
    %cst_101 = arith.constant dense<0xFF800000> : vector<16xf32>
    %215 = vector.multi_reduction <maximumf>, %214, %cst_101 [1] : vector<16x16xf32> to vector<16xf32>
    %216 = vector.shape_cast %215 : vector<16xf32> to vector<16x1xf32>
    %217 = arith.maximumf %209, %216 : vector<16x1xf32>
    %218 = arith.subf %209, %217 : vector<16x1xf32>
    %219 = math.exp %218 : vector<16x1xf32>
    %220 = vector.broadcast %217 : vector<16x1xf32> to vector<16x16xf32>
    %221 = arith.subf %214, %220 : vector<16x16xf32>
    %222 = math.exp %221 : vector<16x16xf32>
    %223 = arith.mulf %219, %210 : vector<16x1xf32>
    %cst_102 = arith.constant dense<0.000000e+00> : vector<16xf32>
    %224 = vector.multi_reduction <add>, %222, %cst_102 [1] : vector<16x16xf32> to vector<16xf32>
    %225 = vector.shape_cast %224 : vector<16xf32> to vector<16x1xf32>
    %226 = arith.addf %223, %225 : vector<16x1xf32>
    %227 = vector.broadcast %219 : vector<16x1xf32> to vector<16x4xf32>
    %228 = arith.mulf %227, %211 : vector<16x4xf32>
    %229 = arith.truncf %222 : vector<16x16xf32> to vector<16x16xbf16>
    %cst_103 = arith.constant dense<0.000000e+00> : vector<16x4xf32>
    %230 = tpu.matmul %229, %213, %cst_103 {dimension_numbers = #tpu.dot_dimension_numbers<[1], [0], [0], [1], [0, 0, 1, 1], [], []>} : vector<16x16xbf16>, vector<16x4xbf16>, vector<16x4xf32> -> vector<16x4xf32>
    %231 = arith.addf %228, %230 : vector<16x4xf32>
    %232 = tpu.reciprocal %226 {approx = true} : vector<16x1xf32> -> vector<16x1xf32>
    %233 = vector.broadcast %232 : vector<16x1xf32> to vector<16x4xf32>
    %234 = arith.mulf %231, %233 : vector<16x4xf32>
    %235 = arith.truncf %234 : vector<16x4xf32> to vector<16x4xbf16>
    %c0_104 = arith.constant 0 : index
    %c24_105 = arith.constant 24 : index
    %236 = vector.load %arg13[%c0_104, %c24_105] : memref<16x32xbf16, #tpu.memory_space<vmem>>, vector<16x4xbf16>
    tpu.vector_store %arg13[%c0_104, %c24_105], %235 {strides = array<i32>} : memref<16x32xbf16, #tpu.memory_space<vmem>>, vector<16x4xbf16>,
    %c0_106 = arith.constant 0 : index
    %c28 = arith.constant 28 : index
    %237 = vector.load %arg12[%c0_106, %c28] : memref<16x32xbf16, #tpu.memory_space<vmem>>, vector<16x4xbf16>
    %cst_107 = arith.constant 0xFF800000 : f32
    %238 = vector.broadcast %cst_107 : f32 to vector<16x1xf32>
    %cst_108 = arith.constant 0.000000e+00 : f32
    %239 = vector.broadcast %cst_108 : f32 to vector<16x1xf32>
    %cst_109 = arith.constant 0.000000e+00 : f32
    %240 = vector.broadcast %cst_109 : f32 to vector<16x4xf32>
    %c0_110 = arith.constant 0 : index
    %c28_111 = arith.constant 28 : index
    %241 = vector.load %arg11[%c0_110, %c28_111] : memref<16x64xbf16, #tpu.memory_space<vmem>>, vector<16x4xbf16>
    %c0_112 = arith.constant 0 : index
    %c60 = arith.constant 60 : index
    %242 = vector.load %arg11[%c0_112, %c60] : memref<16x64xbf16, #tpu.memory_space<vmem>>, vector<16x4xbf16>
    %cst_113 = arith.constant dense<0.000000e+00> : vector<16x16xf32>
    %243 = tpu.matmul %237, %241, %cst_113 {dimension_numbers = #tpu.dot_dimension_numbers<[1], [1], [0], [0], [0, 0, 1, 0], [], []>} : vector<16x4xbf16>, vector<16x4xbf16>, vector<16x16xf32> -> vector<16x16xf32>
    %cst_114 = arith.constant dense<0xFF800000> : vector<16xf32>
    %244 = vector.multi_reduction <maximumf>, %243, %cst_114 [1] : vector<16x16xf32> to vector<16xf32>
    %245 = vector.shape_cast %244 : vector<16xf32> to vector<16x1xf32>
    %246 = arith.maximumf %238, %245 : vector<16x1xf32>
    %247 = arith.subf %238, %246 : vector<16x1xf32>
    %248 = math.exp %247 : vector<16x1xf32>
    %249 = vector.broadcast %246 : vector<16x1xf32> to vector<16x16xf32>
    %250 = arith.subf %243, %249 : vector<16x16xf32>
    %251 = math.exp %250 : vector<16x16xf32>
    %252 = arith.mulf %248, %239 : vector<16x1xf32>
    %cst_115 = arith.constant dense<0.000000e+00> : vector<16xf32>
    %253 = vector.multi_reduction <add>, %251, %cst_115 [1] : vector<16x16xf32> to vector<16xf32>
    %254 = vector.shape_cast %253 : vector<16xf32> to vector<16x1xf32>
    %255 = arith.addf %252, %254 : vector<16x1xf32>
    %256 = vector.broadcast %248 : vector<16x1xf32> to vector<16x4xf32>
    %257 = arith.mulf %256, %240 : vector<16x4xf32>
    %258 = arith.truncf %251 : vector<16x16xf32> to vector<16x16xbf16>
    %cst_116 = arith.constant dense<0.000000e+00> : vector<16x4xf32>
    %259 = tpu.matmul %258, %242, %cst_116 {dimension_numbers = #tpu.dot_dimension_numbers<[1], [0], [0], [1], [0, 0, 1, 1], [], []>} : vector<16x16xbf16>, vector<16x4xbf16>, vector<16x4xf32> -> vector<16x4xf32>
    %260 = arith.addf %257, %259 : vector<16x4xf32>
    %261 = tpu.reciprocal %255 {approx = true} : vector<16x1xf32> -> vector<16x1xf32>
    %262 = vector.broadcast %261 : vector<16x1xf32> to vector<16x4xf32>
    %263 = arith.mulf %260, %262 : vector<16x4xf32>
    %264 = arith.truncf %263 : vector<16x4xf32> to vector<16x4xbf16>
    %c0_117 = arith.constant 0 : index
    %c28_118 = arith.constant 28 : index
    %265 = vector.load %arg13[%c0_117, %c28_118] : memref<16x32xbf16, #tpu.memory_space<vmem>>, vector<16x4xbf16>
    tpu.vector_store %arg13[%c0_117, %c28_118], %264 {strides = array<i32>} : memref<16x32xbf16, #tpu.memory_space<vmem>>, vector<16x4xbf16>,
    %c0_119 = arith.constant 0 : index
    %c0_120 = arith.constant 0 : index
    %266 = vector.load %arg13[%c0_119, %c0_120] : memref<16x32xbf16, #tpu.memory_space<vmem>>, vector<16x32xbf16>
    %267 = arith.extf %266 : vector<16x32xbf16> to vector<16x32xf32>
    %268 = arith.addf %4, %267 : vector<16x32xf32>
    %c4_121 = arith.constant 4 : index
    %c0_122 = arith.constant 0 : index
    %269 = vector.load %arg4[%c4_121, %c0_122] : memref<8x32xf32, #tpu.memory_space<vmem>>, vector<1x32xf32>
    %c5 = arith.constant 5 : index
    %c0_123 = arith.constant 0 : index
    %270 = vector.load %arg4[%c5, %c0_123] : memref<8x32xf32, #tpu.memory_space<vmem>>, vector<1x32xf32>
    %cst_124 = arith.constant dense<0.000000e+00> : vector<16xf32>
    %271 = vector.multi_reduction <add>, %268, %cst_124 [1] : vector<16x32xf32> to vector<16xf32>
    %272 = vector.shape_cast %271 : vector<16xf32> to vector<16x1xf32>
    %cst_125 = arith.constant 3.200000e+01 : f32
    %273 = vector.broadcast %cst_125 : f32 to vector<16x1xf32>
    %274 = arith.divf %272, %273 : vector<16x1xf32>
    %275 = vector.broadcast %274 : vector<16x1xf32> to vector<16x32xf32>
    %276 = arith.subf %268, %275 : vector<16x32xf32>
    %277 = arith.mulf %276, %276 : vector<16x32xf32>
    %cst_126 = arith.constant dense<0.000000e+00> : vector<16xf32>
    %278 = vector.multi_reduction <add>, %277, %cst_126 [1] : vector<16x32xf32> to vector<16xf32>
    %279 = vector.shape_cast %278 : vector<16xf32> to vector<16x1xf32>
    %cst_127 = arith.constant 3.200000e+01 : f32
    %280 = vector.broadcast %cst_127 : f32 to vector<16x1xf32>
    %281 = arith.divf %279, %280 : vector<16x1xf32>
    %282 = vector.broadcast %274 : vector<16x1xf32> to vector<16x32xf32>
    %283 = arith.subf %268, %282 : vector<16x32xf32>
    %cst_128 = arith.constant 9.99999974E-6 : f32
    %284 = vector.broadcast %cst_128 : f32 to vector<16x1xf32>
    %285 = arith.addf %281, %284 : vector<16x1xf32>
    %286 = math.rsqrt %285 : vector<16x1xf32>
    %287 = vector.broadcast %286 : vector<16x1xf32> to vector<16x32xf32>
    %288 = arith.mulf %283, %287 : vector<16x32xf32>
    %289 = vector.broadcast %269 : vector<1x32xf32> to vector<16x32xf32>
    %290 = arith.mulf %288, %289 : vector<16x32xf32>
    %291 = vector.broadcast %270 : vector<1x32xf32> to vector<16x32xf32>
    %292 = arith.addf %290, %291 : vector<16x32xf32>
    %c6 = arith.constant 6 : index
    %c0_129 = arith.constant 0 : index
    %293 = vector.load %arg4[%c6, %c0_129] : memref<8x32xf32, #tpu.memory_space<vmem>>, vector<1x32xf32>
    %c7 = arith.constant 7 : index
    %c0_130 = arith.constant 0 : index
    %294 = vector.load %arg4[%c7, %c0_130] : memref<8x32xf32, #tpu.memory_space<vmem>>, vector<1x32xf32>
    %cst_131 = arith.constant dense<0.000000e+00> : vector<16xf32>
    %295 = vector.multi_reduction <add>, %292, %cst_131 [1] : vector<16x32xf32> to vector<16xf32>
    %296 = vector.shape_cast %295 : vector<16xf32> to vector<16x1xf32>
    %cst_132 = arith.constant 3.200000e+01 : f32
    %297 = vector.broadcast %cst_132 : f32 to vector<16x1xf32>
    %298 = arith.divf %296, %297 : vector<16x1xf32>
    %299 = vector.broadcast %298 : vector<16x1xf32> to vector<16x32xf32>
    %300 = arith.subf %292, %299 : vector<16x32xf32>
    %301 = arith.mulf %300, %300 : vector<16x32xf32>
    %cst_133 = arith.constant dense<0.000000e+00> : vector<16xf32>
    %302 = vector.multi_reduction <add>, %301, %cst_133 [1] : vector<16x32xf32> to vector<16xf32>
    %303 = vector.shape_cast %302 : vector<16xf32> to vector<16x1xf32>
    %cst_134 = arith.constant 3.200000e+01 : f32
    %304 = vector.broadcast %cst_134 : f32 to vector<16x1xf32>
    %305 = arith.divf %303, %304 : vector<16x1xf32>
    %306 = vector.broadcast %298 : vector<16x1xf32> to vector<16x32xf32>
    %307 = arith.subf %292, %306 : vector<16x32xf32>
    %cst_135 = arith.constant 9.99999974E-6 : f32
    %308 = vector.broadcast %cst_135 : f32 to vector<16x1xf32>
    %309 = arith.addf %305, %308 : vector<16x1xf32>
    %310 = math.rsqrt %309 : vector<16x1xf32>
    %311 = vector.broadcast %310 : vector<16x1xf32> to vector<16x32xf32>
    %312 = arith.mulf %307, %311 : vector<16x32xf32>
    %313 = vector.broadcast %293 : vector<1x32xf32> to vector<16x32xf32>
    %314 = arith.mulf %312, %313 : vector<16x32xf32>
    %315 = vector.broadcast %294 : vector<1x32xf32> to vector<16x32xf32>
    %316 = arith.addf %314, %315 : vector<16x32xf32>
    %317 = arith.truncf %316 : vector<16x32xf32> to vector<16x32xbf16>
    %c0_136 = arith.constant 0 : index
    %c0_137 = arith.constant 0 : index
    %318 = vector.load %arg6[%c0_136, %c0_137] : memref<32x128xbf16, #tpu.memory_space<vmem>>, vector<32x128xbf16>
    %cst_138 = arith.constant dense<0.000000e+00> : vector<16x128xf32>
    %319 = tpu.matmul %317, %318, %cst_138 {dimension_numbers = #tpu.dot_dimension_numbers<[1], [0], [0], [1], [0, 0, 1, 1], [], []>} : vector<16x32xbf16>, vector<32x128xbf16>, vector<16x128xf32> -> vector<16x128xf32>
    %c0_139 = arith.constant 0 : index
    %c0_140 = arith.constant 0 : index
    %320 = vector.load %arg7[%c0_139, %c0_140] : memref<1x128xf32, #tpu.memory_space<vmem>>, vector<1x128xf32>
    %321 = vector.broadcast %320 : vector<1x128xf32> to vector<16x128xf32>
    %322 = arith.addf %319, %321 : vector<16x128xf32>
    %cst_141 = arith.constant 5.000000e-01 : f32
    %323 = vector.broadcast %cst_141 : f32 to vector<16x128xf32>
    %324 = arith.mulf %323, %322 : vector<16x128xf32>
    %cst_142 = arith.constant 0.707106769 : f32
    %325 = vector.broadcast %cst_142 : f32 to vector<16x128xf32>
    %326 = arith.mulf %322, %325 : vector<16x128xf32>
    %327 = math.absf %326 : vector<16x128xf32>
    %cst_143 = arith.constant 0.327591091 : f32
    %328 = vector.broadcast %cst_143 : f32 to vector<16x128xf32>
    %329 = arith.mulf %328, %327 : vector<16x128xf32>
    %cst_144 = arith.constant 1.000000e+00 : f32
    %330 = vector.broadcast %cst_144 : f32 to vector<16x128xf32>
    %331 = arith.addf %330, %329 : vector<16x128xf32>
    %cst_145 = arith.constant 1.000000e+00 : f32
    %332 = vector.broadcast %cst_145 : f32 to vector<16x128xf32>
    %333 = arith.divf %332, %331 : vector<16x128xf32>
    %cst_146 = arith.constant 1.06140542 : f32
    %334 = vector.broadcast %cst_146 : f32 to vector<16x128xf32>
    %335 = arith.mulf %334, %333 : vector<16x128xf32>
    %cst_147 = arith.constant -1.45315206 : f32
    %336 = vector.broadcast %cst_147 : f32 to vector<16x128xf32>
    %337 = arith.addf %335, %336 : vector<16x128xf32>
    %338 = arith.mulf %337, %333 : vector<16x128xf32>
    %cst_148 = arith.constant 1.42141378 : f32
    %339 = vector.broadcast %cst_148 : f32 to vector<16x128xf32>
    %340 = arith.addf %338, %339 : vector<16x128xf32>
    %341 = arith.mulf %340, %333 : vector<16x128xf32>
    %cst_149 = arith.constant -0.284496725 : f32
    %342 = vector.broadcast %cst_149 : f32 to vector<16x128xf32>
    %343 = arith.addf %341, %342 : vector<16x128xf32>
    %344 = arith.mulf %343, %333 : vector<16x128xf32>
    %cst_150 = arith.constant 0.254829586 : f32
    %345 = vector.broadcast %cst_150 : f32 to vector<16x128xf32>
    %346 = arith.addf %344, %345 : vector<16x128xf32>
    %347 = arith.mulf %346, %333 : vector<16x128xf32>
    %cst_151 = arith.constant 0.000000e+00 : f32
    %348 = vector.broadcast %cst_151 : f32 to vector<16x128xf32>
    %349 = arith.subf %348, %327 : vector<16x128xf32>
    %350 = arith.mulf %349, %327 : vector<16x128xf32>
    %351 = math.exp %350 : vector<16x128xf32>
    %352 = arith.mulf %347, %351 : vector<16x128xf32>
    %cst_152 = arith.constant 1.000000e+00 : f32
    %353 = vector.broadcast %cst_152 : f32 to vector<16x128xf32>
    %354 = arith.subf %353, %352 : vector<16x128xf32>
    %cst_153 = arith.constant 0.000000e+00 : f32
    %355 = vector.broadcast %cst_153 : f32 to vector<16x128xf32>
    %356 = arith.cmpf oge, %326, %355 : vector<16x128xf32>
    %cst_154 = arith.constant 0.000000e+00 : f32
    %357 = vector.broadcast %cst_154 : f32 to vector<16x128xf32>
    %358 = arith.subf %357, %354 : vector<16x128xf32>
    %359 = arith.select %356, %354, %358 : vector<16x128xi1>, vector<16x128xf32>
    %cst_155 = arith.constant 1.000000e+00 : f32
    %360 = vector.broadcast %cst_155 : f32 to vector<16x128xf32>
    %361 = arith.addf %360, %359 : vector<16x128xf32>
    %362 = arith.mulf %324, %361 : vector<16x128xf32>
    %363 = arith.truncf %362 : vector<16x128xf32> to vector<16x128xbf16>
    %c0_156 = arith.constant 0 : index
    %c0_157 = arith.constant 0 : index
    %364 = vector.load %arg8[%c0_156, %c0_157] : memref<128x32xbf16, #tpu.memory_space<vmem>>, vector<128x32xbf16>
    %cst_158 = arith.constant dense<0.000000e+00> : vector<16x32xf32>
    %365 = tpu.matmul %363, %364, %cst_158 {dimension_numbers = #tpu.dot_dimension_numbers<[1], [0], [0], [1], [0, 0, 1, 1], [], []>} : vector<16x128xbf16>, vector<128x32xbf16>, vector<16x32xf32> -> vector<16x32xf32>
    %c0_159 = arith.constant 0 : index
    %c0_160 = arith.constant 0 : index
    %366 = vector.load %arg9[%c0_159, %c0_160] : memref<1x32xf32, #tpu.memory_space<vmem>>, vector<1x32xf32>
    %367 = vector.broadcast %366 : vector<1x32xf32> to vector<16x32xf32>
    %368 = arith.addf %365, %367 : vector<16x32xf32>
    %369 = arith.addf %268, %368 : vector<16x32xf32>
    %c0_161 = arith.constant 0 : index
    %c0_162 = arith.constant 0 : index
    %c0_163 = arith.constant 0 : index
    %370 = vector.load %arg10[%c0_161, %c0_162, %c0_163] : memref<1x16x32xf32, #tpu.memory_space<vmem>>, vector<1x16x32xf32>
    %371 = vector.shape_cast %370 : vector<1x16x32xf32> to vector<16x32xf32>
    %372 = vector.shape_cast %369 : vector<16x32xf32> to vector<1x16x32xf32>
    tpu.vector_store %arg10[%c0_161, %c0_162, %c0_163], %372 {strides = array<i32>} : memref<1x16x32xf32, #tpu.memory_space<vmem>>, vector<1x16x32xf32>,
    return
  }
  func.func @transform_0(%arg0: i32, %arg1: i32) -> (i32, i32, i32) {
    %c0_i32 = arith.constant 0 : i32
    %c0_i32_0 = arith.constant 0 : i32
    return %arg0, %arg1, %c0_i32 : i32, i32, i32
  }
  func.func @transform_1(%arg0: i32, %arg1: i32) -> (i32, i32, i32) {
    %c0_i32 = arith.constant 0 : i32
    %c0_i32_0 = arith.constant 0 : i32
    %c0_i32_1 = arith.constant 0 : i32
    return %arg0, %c0_i32, %c0_i32_0 : i32, i32, i32
  }
  func.func @transform_2(%arg0: i32, %arg1: i32) -> (i32, i32) {
    %c0_i32 = arith.constant 0 : i32
    %c0_i32_0 = arith.constant 0 : i32
    %c0_i32_1 = arith.constant 0 : i32
    return %c0_i32, %c0_i32_0 : i32, i32
  }
  func.func @transform_3(%arg0: i32, %arg1: i32) -> (i32, i32) {
    %c0_i32 = arith.constant 0 : i32
    %c0_i32_0 = arith.constant 0 : i32
    %c0_i32_1 = arith.constant 0 : i32
    return %c0_i32, %c0_i32_0 : i32, i32
  }
  func.func @transform_4(%arg0: i32, %arg1: i32) -> (i32, i32) {
    %c0_i32 = arith.constant 0 : i32
    %c0_i32_0 = arith.constant 0 : i32
    %c0_i32_1 = arith.constant 0 : i32
    return %c0_i32, %c0_i32_0 : i32, i32
  }
  func.func @transform_5(%arg0: i32, %arg1: i32) -> (i32, i32) {
    %c0_i32 = arith.constant 0 : i32
    %c0_i32_0 = arith.constant 0 : i32
    %c0_i32_1 = arith.constant 0 : i32
    return %c0_i32, %c0_i32_0 : i32, i32
  }
  func.func @transform_6(%arg0: i32, %arg1: i32) -> (i32, i32) {
    %c0_i32 = arith.constant 0 : i32
    %c0_i32_0 = arith.constant 0 : i32
    %c0_i32_1 = arith.constant 0 : i32
    return %c0_i32, %c0_i32_0 : i32, i32
  }
  func.func @transform_7(%arg0: i32, %arg1: i32) -> (i32, i32) {
    %c0_i32 = arith.constant 0 : i32
    %c0_i32_0 = arith.constant 0 : i32
    %c0_i32_1 = arith.constant 0 : i32
    return %c0_i32, %c0_i32_0 : i32, i32
  }
  func.func @transform_8(%arg0: i32, %arg1: i32) -> (i32, i32, i32) {
    %c0_i32 = arith.constant 0 : i32
    %c0_i32_0 = arith.constant 0 : i32
    return %arg0, %arg1, %c0_i32 : i32, i32, i32
  }
}

module attributes {stable_mosaic.version = 11 : i64} {
  func.func @_encoder_layer_kernel(%arg0: i32, %arg1: i32, %arg2: memref<1x16x32xf32, #tpu.memory_space<vmem>>, %arg3: memref<1x16x32xf32, #tpu.memory_space<vmem>>, %arg4: memref<8x32xf32, #tpu.memory_space<vmem>>, %arg5: memref<32x96xbf16, #tpu.memory_space<vmem>>, %arg6: memref<32x128xbf16, #tpu.memory_space<vmem>>, %arg7: memref<1x128xf32, #tpu.memory_space<vmem>>, %arg8: memref<128x32xbf16, #tpu.memory_space<vmem>>, %arg9: memref<1x32xf32, #tpu.memory_space<vmem>>, %arg10: memref<1x16x32xf32, #tpu.memory_space<vmem>>, %arg11: memref<16x64xbf16, #tpu.memory_space<vmem>>, %arg12: memref<16x32xbf16, #tpu.memory_space<vmem>>, %arg13: memref<16x32xbf16, #tpu.memory_space<vmem>>) attributes {dimension_semantics = [#tpu.dimension_semantics<parallel>, #tpu.dimension_semantics<arbitrary>], iteration_bounds = array<i64: 2, 1>, scalar_prefetch = 0 : i64, scratch_operands = 3 : i64, tpu.core_type = #tpu.core_type<tc>, window_params = [{transform_indices = @transform_0, window_bounds = array<i64: 1, 16, 32>}, {transform_indices = @transform_1, window_bounds = array<i64: 1, 16, 32>}, {pipeline_mode = #tpu.pipeline_mode<synchronous>, transform_indices = @transform_2, window_bounds = array<i64: 8, 32>}, {pipeline_mode = #tpu.pipeline_mode<synchronous>, transform_indices = @transform_3, window_bounds = array<i64: 32, 96>}, {pipeline_mode = #tpu.pipeline_mode<synchronous>, transform_indices = @transform_4, window_bounds = array<i64: 32, 128>}, {pipeline_mode = #tpu.pipeline_mode<synchronous>, transform_indices = @transform_5, window_bounds = array<i64: 1, 128>}, {pipeline_mode = #tpu.pipeline_mode<synchronous>, transform_indices = @transform_6, window_bounds = array<i64: 128, 32>}, {pipeline_mode = #tpu.pipeline_mode<synchronous>, transform_indices = @transform_7, window_bounds = array<i64: 1, 32>}, {transform_indices = @transform_8, window_bounds = array<i64: 1, 16, 32>}]} {
    %c0_i32 = arith.constant 0 : i32
    %0 = arith.cmpi eq, %arg1, %c0_i32 : i32
    %1 = arith.extui %0 : i1 to i32
    %c0_i32_0 = arith.constant 0 : i32
    %2 = arith.cmpi ne, %1, %c0_i32_0 : i32
    scf.if %2 {
      %c0_164 = arith.constant 0 : index
      %c0_165 = arith.constant 0 : index
      %c0_166 = arith.constant 0 : index
      %373 = vector.load %arg3[%c0_164, %c0_165, %c0_166] : memref<1x16x32xf32, #tpu.memory_space<vmem>>, vector<1x16x32xf32>
      %374 = vector.shape_cast %373 : vector<1x16x32xf32> to vector<16x32xf32>
      %c0_167 = arith.constant 0 : index
      %c0_168 = arith.constant 0 : index
      %375 = vector.load %arg4[%c0_167, %c0_168] : memref<8x32xf32, #tpu.memory_space<vmem>>, vector<1x32xf32>
      %c1 = arith.constant 1 : index
      %c0_169 = arith.constant 0 : index
      %376 = vector.load %arg4[%c1, %c0_169] : memref<8x32xf32, #tpu.memory_space<vmem>>, vector<1x32xf32>
      %cst_170 = arith.constant dense<0.000000e+00> : vector<16xf32>
      %377 = vector.multi_reduction <add>, %374, %cst_170 [1] : vector<16x32xf32> to vector<16xf32>
      %378 = vector.shape_cast %377 : vector<16xf32> to vector<16x1xf32>
      %cst_171 = arith.constant 3.200000e+01 : f32
      %379 = vector.broadcast %cst_171 : f32 to vector<16x1xf32>
      %380 = arith.divf %378, %379 : vector<16x1xf32>
      %381 = vector.broadcast %380 : vector<16x1xf32> to vector<16x32xf32>
      %382 = arith.subf %374, %381 : vector<16x32xf32>
      %383 = arith.mulf %382, %382 : vector<16x32xf32>
      %cst_172 = arith.constant dense<0.000000e+00> : vector<16xf32>
      %384 = vector.multi_reduction <add>, %383, %cst_172 [1] : vector<16x32xf32> to vector<16xf32>
      %385 = vector.shape_cast %384 : vector<16xf32> to vector<16x1xf32>
      %cst_173 = arith.constant 3.200000e+01 : f32
      %386 = vector.broadcast %cst_173 : f32 to vector<16x1xf32>
      %387 = arith.divf %385, %386 : vector<16x1xf32>
      %388 = vector.broadcast %380 : vector<16x1xf32> to vector<16x32xf32>
      %389 = arith.subf %374, %388 : vector<16x32xf32>
      %cst_174 = arith.constant 9.99999974E-6 : f32
      %390 = vector.broadcast %cst_174 : f32 to vector<16x1xf32>
      %391 = arith.addf %387, %390 : vector<16x1xf32>
      %392 = math.rsqrt %391 : vector<16x1xf32>
      %393 = vector.broadcast %392 : vector<16x1xf32> to vector<16x32xf32>
      %394 = arith.mulf %389, %393 : vector<16x32xf32>
      %395 = vector.broadcast %375 : vector<1x32xf32> to vector<16x32xf32>
      %396 = arith.mulf %394, %395 : vector<16x32xf32>
      %397 = vector.broadcast %376 : vector<1x32xf32> to vector<16x32xf32>
      %398 = arith.addf %396, %397 : vector<16x32xf32>
      %399 = arith.truncf %398 : vector<16x32xf32> to vector<16x32xbf16>
      %c0_175 = arith.constant 0 : index
      %c32_176 = arith.constant 32 : index
      %400 = vector.load %arg5[%c0_175, %c32_176] : memref<32x96xbf16, #tpu.memory_space<vmem>>, vector<32x64xbf16>
      %cst_177 = arith.constant dense<0.000000e+00> : vector<16x64xf32>
      %401 = tpu.matmul %399, %400, %cst_177 {dimension_numbers = #tpu.dot_dimension_numbers<[1], [0], [0], [1], [0, 0, 1, 1], [], []>} : vector<16x32xbf16>, vector<32x64xbf16>, vector<16x64xf32> -> vector<16x64xf32>
      %402 = arith.truncf %401 : vector<16x64xf32> to vector<16x64xbf16>
      %c0_178 = arith.constant 0 : index
      %c0_179 = arith.constant 0 : index
      %403 = vector.load %arg11[%c0_178, %c0_179] : memref<16x64xbf16, #tpu.memory_space<vmem>>, vector<16x64xbf16>
      tpu.vector_store %arg11[%c0_178, %c0_179], %402 {strides = array<i32>} : memref<16x64xbf16, #tpu.memory_space<vmem>>, vector<16x64xbf16>,
    } else {
    }
    %c0 = arith.constant 0 : index
    %c0_1 = arith.constant 0 : index
    %c0_2 = arith.constant 0 : index
    %3 = vector.load %arg2[%c0, %c0_1, %c0_2] : memref<1x16x32xf32, #tpu.memory_space<vmem>>, vector<1x16x32xf32>
    %4 = vector.shape_cast %3 : vector<1x16x32xf32> to vector<16x32xf32>
    %c2 = arith.constant 2 : index
    %c0_3 = arith.constant 0 : index
    %5 = vector.load %arg4[%c2, %c0_3] : memref<8x32xf32, #tpu.memory_space<vmem>>, vector<1x32xf32>
    %c3 = arith.constant 3 : index
    %c0_4 = arith.constant 0 : index
    %6 = vector.load %arg4[%c3, %c0_4] : memref<8x32xf32, #tpu.memory_space<vmem>>, vector<1x32xf32>
    %cst = arith.constant dense<0.000000e+00> : vector<16xf32>
    %7 = vector.multi_reduction <add>, %4, %cst [1] : vector<16x32xf32> to vector<16xf32>
    %8 = vector.shape_cast %7 : vector<16xf32> to vector<16x1xf32>
    %cst_5 = arith.constant 3.200000e+01 : f32
    %9 = vector.broadcast %cst_5 : f32 to vector<16x1xf32>
    %10 = arith.divf %8, %9 : vector<16x1xf32>
    %11 = vector.broadcast %10 : vector<16x1xf32> to vector<16x32xf32>
    %12 = arith.subf %4, %11 : vector<16x32xf32>
    %13 = arith.mulf %12, %12 : vector<16x32xf32>
    %cst_6 = arith.constant dense<0.000000e+00> : vector<16xf32>
    %14 = vector.multi_reduction <add>, %13, %cst_6 [1] : vector<16x32xf32> to vector<16xf32>
    %15 = vector.shape_cast %14 : vector<16xf32> to vector<16x1xf32>
    %cst_7 = arith.constant 3.200000e+01 : f32
    %16 = vector.broadcast %cst_7 : f32 to vector<16x1xf32>
    %17 = arith.divf %15, %16 : vector<16x1xf32>
    %18 = vector.broadcast %10 : vector<16x1xf32> to vector<16x32xf32>
    %19 = arith.subf %4, %18 : vector<16x32xf32>
    %cst_8 = arith.constant 9.99999974E-6 : f32
    %20 = vector.broadcast %cst_8 : f32 to vector<16x1xf32>
    %21 = arith.addf %17, %20 : vector<16x1xf32>
    %22 = math.rsqrt %21 : vector<16x1xf32>
    %23 = vector.broadcast %22 : vector<16x1xf32> to vector<16x32xf32>
    %24 = arith.mulf %19, %23 : vector<16x32xf32>
    %25 = vector.broadcast %5 : vector<1x32xf32> to vector<16x32xf32>
    %26 = arith.mulf %24, %25 : vector<16x32xf32>
    %27 = vector.broadcast %6 : vector<1x32xf32> to vector<16x32xf32>
    %28 = arith.addf %26, %27 : vector<16x32xf32>
    %29 = arith.truncf %28 : vector<16x32xf32> to vector<16x32xbf16>
    %c0_9 = arith.constant 0 : index
    %c0_10 = arith.constant 0 : index
    %30 = vector.load %arg5[%c0_9, %c0_10] : memref<32x96xbf16, #tpu.memory_space<vmem>>, vector<32x32xbf16>
    %cst_11 = arith.constant dense<0.000000e+00> : vector<16x32xf32>
    %31 = tpu.matmul %29, %30, %cst_11 {dimension_numbers = #tpu.dot_dimension_numbers<[1], [0], [0], [1], [0, 0, 1, 1], [], []>} : vector<16x32xbf16>, vector<32x32xbf16>, vector<16x32xf32> -> vector<16x32xf32>
    %32 = arith.truncf %31 : vector<16x32xf32> to vector<16x32xbf16>
    %c0_12 = arith.constant 0 : index
    %c0_13 = arith.constant 0 : index
    %33 = vector.load %arg12[%c0_12, %c0_13] : memref<16x32xbf16, #tpu.memory_space<vmem>>, vector<16x32xbf16>
    tpu.vector_store %arg12[%c0_12, %c0_13], %32 {strides = array<i32>} : memref<16x32xbf16, #tpu.memory_space<vmem>>, vector<16x32xbf16>,
    %c0_14 = arith.constant 0 : index
    %c0_15 = arith.constant 0 : index
    %34 = vector.load %arg12[%c0_14, %c0_15] : memref<16x32xbf16, #tpu.memory_space<vmem>>, vector<16x4xbf16>
    %cst_16 = arith.constant 0xFF800000 : f32
    %35 = vector.broadcast %cst_16 : f32 to vector<16x1xf32>
    %cst_17 = arith.constant 0.000000e+00 : f32
    %36 = vector.broadcast %cst_17 : f32 to vector<16x1xf32>
    %cst_18 = arith.constant 0.000000e+00 : f32
    %37 = vector.broadcast %cst_18 : f32 to vector<16x4xf32>
    %c0_19 = arith.constant 0 : index
    %c0_20 = arith.constant 0 : index
    %38 = vector.load %arg11[%c0_19, %c0_20] : memref<16x64xbf16, #tpu.memory_space<vmem>>, vector<16x4xbf16>
    %c0_21 = arith.constant 0 : index
    %c32 = arith.constant 32 : index
    %39 = vector.load %arg11[%c0_21, %c32] : memref<16x64xbf16, #tpu.memory_space<vmem>>, vector<16x4xbf16>
    %cst_22 = arith.constant dense<0.000000e+00> : vector<16x16xf32>
    %40 = tpu.matmul %34, %38, %cst_22 {dimension_numbers = #tpu.dot_dimension_numbers<[1], [1], [0], [0], [0, 0, 1, 0], [], []>} : vector<16x4xbf16>, vector<16x4xbf16>, vector<16x16xf32> -> vector<16x16xf32>
    %cst_23 = arith.constant dense<0xFF800000> : vector<16xf32>
    %41 = vector.multi_reduction <maximumf>, %40, %cst_23 [1] : vector<16x16xf32> to vector<16xf32>
    %42 = vector.shape_cast %41 : vector<16xf32> to vector<16x1xf32>
    %43 = arith.maximumf %35, %42 : vector<16x1xf32>
    %44 = arith.subf %35, %43 : vector<16x1xf32>
    %45 = math.exp %44 : vector<16x1xf32>
    %46 = vector.broadcast %43 : vector<16x1xf32> to vector<16x16xf32>
    %47 = arith.subf %40, %46 : vector<16x16xf32>
    %48 = math.exp %47 : vector<16x16xf32>
    %49 = arith.mulf %45, %36 : vector<16x1xf32>
    %cst_24 = arith.constant dense<0.000000e+00> : vector<16xf32>
    %50 = vector.multi_reduction <add>, %48, %cst_24 [1] : vector<16x16xf32> to vector<16xf32>
    %51 = vector.shape_cast %50 : vector<16xf32> to vector<16x1xf32>
    %52 = arith.addf %49, %51 : vector<16x1xf32>
    %53 = vector.broadcast %45 : vector<16x1xf32> to vector<16x4xf32>
    %54 = arith.mulf %53, %37 : vector<16x4xf32>
    %55 = arith.truncf %48 : vector<16x16xf32> to vector<16x16xbf16>
    %cst_25 = arith.constant dense<0.000000e+00> : vector<16x4xf32>
    %56 = tpu.matmul %55, %39, %cst_25 {dimension_numbers = #tpu.dot_dimension_numbers<[1], [0], [0], [1], [0, 0, 1, 1], [], []>} : vector<16x16xbf16>, vector<16x4xbf16>, vector<16x4xf32> -> vector<16x4xf32>
    %57 = arith.addf %54, %56 : vector<16x4xf32>
    %58 = tpu.reciprocal %52 {approx = true} : vector<16x1xf32> -> vector<16x1xf32>
    %59 = vector.broadcast %58 : vector<16x1xf32> to vector<16x4xf32>
    %60 = arith.mulf %57, %59 : vector<16x4xf32>
    %61 = arith.truncf %60 : vector<16x4xf32> to vector<16x4xbf16>
    %c0_26 = arith.constant 0 : index
    %c0_27 = arith.constant 0 : index
    %62 = vector.load %arg13[%c0_26, %c0_27] : memref<16x32xbf16, #tpu.memory_space<vmem>>, vector<16x4xbf16>
    tpu.vector_store %arg13[%c0_26, %c0_27], %61 {strides = array<i32>} : memref<16x32xbf16, #tpu.memory_space<vmem>>, vector<16x4xbf16>,
    %c0_28 = arith.constant 0 : index
    %c4 = arith.constant 4 : index
    %63 = vector.load %arg12[%c0_28, %c4] : memref<16x32xbf16, #tpu.memory_space<vmem>>, vector<16x4xbf16>
    %cst_29 = arith.constant 0xFF800000 : f32
    %64 = vector.broadcast %cst_29 : f32 to vector<16x1xf32>
    %cst_30 = arith.constant 0.000000e+00 : f32
    %65 = vector.broadcast %cst_30 : f32 to vector<16x1xf32>
    %cst_31 = arith.constant 0.000000e+00 : f32
    %66 = vector.broadcast %cst_31 : f32 to vector<16x4xf32>
    %c0_32 = arith.constant 0 : index
    %c4_33 = arith.constant 4 : index
    %67 = vector.load %arg11[%c0_32, %c4_33] : memref<16x64xbf16, #tpu.memory_space<vmem>>, vector<16x4xbf16>
    %c0_34 = arith.constant 0 : index
    %c36 = arith.constant 36 : index
    %68 = vector.load %arg11[%c0_34, %c36] : memref<16x64xbf16, #tpu.memory_space<vmem>>, vector<16x4xbf16>
    %cst_35 = arith.constant dense<0.000000e+00> : vector<16x16xf32>
    %69 = tpu.matmul %63, %67, %cst_35 {dimension_numbers = #tpu.dot_dimension_numbers<[1], [1], [0], [0], [0, 0, 1, 0], [], []>} : vector<16x4xbf16>, vector<16x4xbf16>, vector<16x16xf32> -> vector<16x16xf32>
    %cst_36 = arith.constant dense<0xFF800000> : vector<16xf32>
    %70 = vector.multi_reduction <maximumf>, %69, %cst_36 [1] : vector<16x16xf32> to vector<16xf32>
    %71 = vector.shape_cast %70 : vector<16xf32> to vector<16x1xf32>
    %72 = arith.maximumf %64, %71 : vector<16x1xf32>
    %73 = arith.subf %64, %72 : vector<16x1xf32>
    %74 = math.exp %73 : vector<16x1xf32>
    %75 = vector.broadcast %72 : vector<16x1xf32> to vector<16x16xf32>
    %76 = arith.subf %69, %75 : vector<16x16xf32>
    %77 = math.exp %76 : vector<16x16xf32>
    %78 = arith.mulf %74, %65 : vector<16x1xf32>
    %cst_37 = arith.constant dense<0.000000e+00> : vector<16xf32>
    %79 = vector.multi_reduction <add>, %77, %cst_37 [1] : vector<16x16xf32> to vector<16xf32>
    %80 = vector.shape_cast %79 : vector<16xf32> to vector<16x1xf32>
    %81 = arith.addf %78, %80 : vector<16x1xf32>
    %82 = vector.broadcast %74 : vector<16x1xf32> to vector<16x4xf32>
    %83 = arith.mulf %82, %66 : vector<16x4xf32>
    %84 = arith.truncf %77 : vector<16x16xf32> to vector<16x16xbf16>
    %cst_38 = arith.constant dense<0.000000e+00> : vector<16x4xf32>
    %85 = tpu.matmul %84, %68, %cst_38 {dimension_numbers = #tpu.dot_dimension_numbers<[1], [0], [0], [1], [0, 0, 1, 1], [], []>} : vector<16x16xbf16>, vector<16x4xbf16>, vector<16x4xf32> -> vector<16x4xf32>
    %86 = arith.addf %83, %85 : vector<16x4xf32>
    %87 = tpu.reciprocal %81 {approx = true} : vector<16x1xf32> -> vector<16x1xf32>
    %88 = vector.broadcast %87 : vector<16x1xf32> to vector<16x4xf32>
    %89 = arith.mulf %86, %88 : vector<16x4xf32>
    %90 = arith.truncf %89 : vector<16x4xf32> to vector<16x4xbf16>
    %c0_39 = arith.constant 0 : index
    %c4_40 = arith.constant 4 : index
    %91 = vector.load %arg13[%c0_39, %c4_40] : memref<16x32xbf16, #tpu.memory_space<vmem>>, vector<16x4xbf16>
    tpu.vector_store %arg13[%c0_39, %c4_40], %90 {strides = array<i32>} : memref<16x32xbf16, #tpu.memory_space<vmem>>, vector<16x4xbf16>,
    %c0_41 = arith.constant 0 : index
    %c8 = arith.constant 8 : index
    %92 = vector.load %arg12[%c0_41, %c8] : memref<16x32xbf16, #tpu.memory_space<vmem>>, vector<16x4xbf16>
    %cst_42 = arith.constant 0xFF800000 : f32
    %93 = vector.broadcast %cst_42 : f32 to vector<16x1xf32>
    %cst_43 = arith.constant 0.000000e+00 : f32
    %94 = vector.broadcast %cst_43 : f32 to vector<16x1xf32>
    %cst_44 = arith.constant 0.000000e+00 : f32
    %95 = vector.broadcast %cst_44 : f32 to vector<16x4xf32>
    %c0_45 = arith.constant 0 : index
    %c8_46 = arith.constant 8 : index
    %96 = vector.load %arg11[%c0_45, %c8_46] : memref<16x64xbf16, #tpu.memory_space<vmem>>, vector<16x4xbf16>
    %c0_47 = arith.constant 0 : index
    %c40 = arith.constant 40 : index
    %97 = vector.load %arg11[%c0_47, %c40] : memref<16x64xbf16, #tpu.memory_space<vmem>>, vector<16x4xbf16>
    %cst_48 = arith.constant dense<0.000000e+00> : vector<16x16xf32>
    %98 = tpu.matmul %92, %96, %cst_48 {dimension_numbers = #tpu.dot_dimension_numbers<[1], [1], [0], [0], [0, 0, 1, 0], [], []>} : vector<16x4xbf16>, vector<16x4xbf16>, vector<16x16xf32> -> vector<16x16xf32>
    %cst_49 = arith.constant dense<0xFF800000> : vector<16xf32>
    %99 = vector.multi_reduction <maximumf>, %98, %cst_49 [1] : vector<16x16xf32> to vector<16xf32>
    %100 = vector.shape_cast %99 : vector<16xf32> to vector<16x1xf32>
    %101 = arith.maximumf %93, %100 : vector<16x1xf32>
    %102 = arith.subf %93, %101 : vector<16x1xf32>
    %103 = math.exp %102 : vector<16x1xf32>
    %104 = vector.broadcast %101 : vector<16x1xf32> to vector<16x16xf32>
    %105 = arith.subf %98, %104 : vector<16x16xf32>
    %106 = math.exp %105 : vector<16x16xf32>
    %107 = arith.mulf %103, %94 : vector<16x1xf32>
    %cst_50 = arith.constant dense<0.000000e+00> : vector<16xf32>
    %108 = vector.multi_reduction <add>, %106, %cst_50 [1] : vector<16x16xf32> to vector<16xf32>
    %109 = vector.shape_cast %108 : vector<16xf32> to vector<16x1xf32>
    %110 = arith.addf %107, %109 : vector<16x1xf32>
    %111 = vector.broadcast %103 : vector<16x1xf32> to vector<16x4xf32>
    %112 = arith.mulf %111, %95 : vector<16x4xf32>
    %113 = arith.truncf %106 : vector<16x16xf32> to vector<16x16xbf16>
    %cst_51 = arith.constant dense<0.000000e+00> : vector<16x4xf32>
    %114 = tpu.matmul %113, %97, %cst_51 {dimension_numbers = #tpu.dot_dimension_numbers<[1], [0], [0], [1], [0, 0, 1, 1], [], []>} : vector<16x16xbf16>, vector<16x4xbf16>, vector<16x4xf32> -> vector<16x4xf32>
    %115 = arith.addf %112, %114 : vector<16x4xf32>
    %116 = tpu.reciprocal %110 {approx = true} : vector<16x1xf32> -> vector<16x1xf32>
    %117 = vector.broadcast %116 : vector<16x1xf32> to vector<16x4xf32>
    %118 = arith.mulf %115, %117 : vector<16x4xf32>
    %119 = arith.truncf %118 : vector<16x4xf32> to vector<16x4xbf16>
    %c0_52 = arith.constant 0 : index
    %c8_53 = arith.constant 8 : index
    %120 = vector.load %arg13[%c0_52, %c8_53] : memref<16x32xbf16, #tpu.memory_space<vmem>>, vector<16x4xbf16>
    tpu.vector_store %arg13[%c0_52, %c8_53], %119 {strides = array<i32>} : memref<16x32xbf16, #tpu.memory_space<vmem>>, vector<16x4xbf16>,
    %c0_54 = arith.constant 0 : index
    %c12 = arith.constant 12 : index
    %121 = vector.load %arg12[%c0_54, %c12] : memref<16x32xbf16, #tpu.memory_space<vmem>>, vector<16x4xbf16>
    %cst_55 = arith.constant 0xFF800000 : f32
    %122 = vector.broadcast %cst_55 : f32 to vector<16x1xf32>
    %cst_56 = arith.constant 0.000000e+00 : f32
    %123 = vector.broadcast %cst_56 : f32 to vector<16x1xf32>
    %cst_57 = arith.constant 0.000000e+00 : f32
    %124 = vector.broadcast %cst_57 : f32 to vector<16x4xf32>
    %c0_58 = arith.constant 0 : index
    %c12_59 = arith.constant 12 : index
    %125 = vector.load %arg11[%c0_58, %c12_59] : memref<16x64xbf16, #tpu.memory_space<vmem>>, vector<16x4xbf16>
    %c0_60 = arith.constant 0 : index
    %c44 = arith.constant 44 : index
    %126 = vector.load %arg11[%c0_60, %c44] : memref<16x64xbf16, #tpu.memory_space<vmem>>, vector<16x4xbf16>
    %cst_61 = arith.constant dense<0.000000e+00> : vector<16x16xf32>
    %127 = tpu.matmul %121, %125, %cst_61 {dimension_numbers = #tpu.dot_dimension_numbers<[1], [1], [0], [0], [0, 0, 1, 0], [], []>} : vector<16x4xbf16>, vector<16x4xbf16>, vector<16x16xf32> -> vector<16x16xf32>
    %cst_62 = arith.constant dense<0xFF800000> : vector<16xf32>
    %128 = vector.multi_reduction <maximumf>, %127, %cst_62 [1] : vector<16x16xf32> to vector<16xf32>
    %129 = vector.shape_cast %128 : vector<16xf32> to vector<16x1xf32>
    %130 = arith.maximumf %122, %129 : vector<16x1xf32>
    %131 = arith.subf %122, %130 : vector<16x1xf32>
    %132 = math.exp %131 : vector<16x1xf32>
    %133 = vector.broadcast %130 : vector<16x1xf32> to vector<16x16xf32>
    %134 = arith.subf %127, %133 : vector<16x16xf32>
    %135 = math.exp %134 : vector<16x16xf32>
    %136 = arith.mulf %132, %123 : vector<16x1xf32>
    %cst_63 = arith.constant dense<0.000000e+00> : vector<16xf32>
    %137 = vector.multi_reduction <add>, %135, %cst_63 [1] : vector<16x16xf32> to vector<16xf32>
    %138 = vector.shape_cast %137 : vector<16xf32> to vector<16x1xf32>
    %139 = arith.addf %136, %138 : vector<16x1xf32>
    %140 = vector.broadcast %132 : vector<16x1xf32> to vector<16x4xf32>
    %141 = arith.mulf %140, %124 : vector<16x4xf32>
    %142 = arith.truncf %135 : vector<16x16xf32> to vector<16x16xbf16>
    %cst_64 = arith.constant dense<0.000000e+00> : vector<16x4xf32>
    %143 = tpu.matmul %142, %126, %cst_64 {dimension_numbers = #tpu.dot_dimension_numbers<[1], [0], [0], [1], [0, 0, 1, 1], [], []>} : vector<16x16xbf16>, vector<16x4xbf16>, vector<16x4xf32> -> vector<16x4xf32>
    %144 = arith.addf %141, %143 : vector<16x4xf32>
    %145 = tpu.reciprocal %139 {approx = true} : vector<16x1xf32> -> vector<16x1xf32>
    %146 = vector.broadcast %145 : vector<16x1xf32> to vector<16x4xf32>
    %147 = arith.mulf %144, %146 : vector<16x4xf32>
    %148 = arith.truncf %147 : vector<16x4xf32> to vector<16x4xbf16>
    %c0_65 = arith.constant 0 : index
    %c12_66 = arith.constant 12 : index
    %149 = vector.load %arg13[%c0_65, %c12_66] : memref<16x32xbf16, #tpu.memory_space<vmem>>, vector<16x4xbf16>
    tpu.vector_store %arg13[%c0_65, %c12_66], %148 {strides = array<i32>} : memref<16x32xbf16, #tpu.memory_space<vmem>>, vector<16x4xbf16>,
    %c0_67 = arith.constant 0 : index
    %c16 = arith.constant 16 : index
    %150 = vector.load %arg12[%c0_67, %c16] : memref<16x32xbf16, #tpu.memory_space<vmem>>, vector<16x4xbf16>
    %cst_68 = arith.constant 0xFF800000 : f32
    %151 = vector.broadcast %cst_68 : f32 to vector<16x1xf32>
    %cst_69 = arith.constant 0.000000e+00 : f32
    %152 = vector.broadcast %cst_69 : f32 to vector<16x1xf32>
    %cst_70 = arith.constant 0.000000e+00 : f32
    %153 = vector.broadcast %cst_70 : f32 to vector<16x4xf32>
    %c0_71 = arith.constant 0 : index
    %c16_72 = arith.constant 16 : index
    %154 = vector.load %arg11[%c0_71, %c16_72] : memref<16x64xbf16, #tpu.memory_space<vmem>>, vector<16x4xbf16>
    %c0_73 = arith.constant 0 : index
    %c48 = arith.constant 48 : index
    %155 = vector.load %arg11[%c0_73, %c48] : memref<16x64xbf16, #tpu.memory_space<vmem>>, vector<16x4xbf16>
    %cst_74 = arith.constant dense<0.000000e+00> : vector<16x16xf32>
    %156 = tpu.matmul %150, %154, %cst_74 {dimension_numbers = #tpu.dot_dimension_numbers<[1], [1], [0], [0], [0, 0, 1, 0], [], []>} : vector<16x4xbf16>, vector<16x4xbf16>, vector<16x16xf32> -> vector<16x16xf32>
    %cst_75 = arith.constant dense<0xFF800000> : vector<16xf32>
    %157 = vector.multi_reduction <maximumf>, %156, %cst_75 [1] : vector<16x16xf32> to vector<16xf32>
    %158 = vector.shape_cast %157 : vector<16xf32> to vector<16x1xf32>
    %159 = arith.maximumf %151, %158 : vector<16x1xf32>
    %160 = arith.subf %151, %159 : vector<16x1xf32>
    %161 = math.exp %160 : vector<16x1xf32>
    %162 = vector.broadcast %159 : vector<16x1xf32> to vector<16x16xf32>
    %163 = arith.subf %156, %162 : vector<16x16xf32>
    %164 = math.exp %163 : vector<16x16xf32>
    %165 = arith.mulf %161, %152 : vector<16x1xf32>
    %cst_76 = arith.constant dense<0.000000e+00> : vector<16xf32>
    %166 = vector.multi_reduction <add>, %164, %cst_76 [1] : vector<16x16xf32> to vector<16xf32>
    %167 = vector.shape_cast %166 : vector<16xf32> to vector<16x1xf32>
    %168 = arith.addf %165, %167 : vector<16x1xf32>
    %169 = vector.broadcast %161 : vector<16x1xf32> to vector<16x4xf32>
    %170 = arith.mulf %169, %153 : vector<16x4xf32>
    %171 = arith.truncf %164 : vector<16x16xf32> to vector<16x16xbf16>
    %cst_77 = arith.constant dense<0.000000e+00> : vector<16x4xf32>
    %172 = tpu.matmul %171, %155, %cst_77 {dimension_numbers = #tpu.dot_dimension_numbers<[1], [0], [0], [1], [0, 0, 1, 1], [], []>} : vector<16x16xbf16>, vector<16x4xbf16>, vector<16x4xf32> -> vector<16x4xf32>
    %173 = arith.addf %170, %172 : vector<16x4xf32>
    %174 = tpu.reciprocal %168 {approx = true} : vector<16x1xf32> -> vector<16x1xf32>
    %175 = vector.broadcast %174 : vector<16x1xf32> to vector<16x4xf32>
    %176 = arith.mulf %173, %175 : vector<16x4xf32>
    %177 = arith.truncf %176 : vector<16x4xf32> to vector<16x4xbf16>
    %c0_78 = arith.constant 0 : index
    %c16_79 = arith.constant 16 : index
    %178 = vector.load %arg13[%c0_78, %c16_79] : memref<16x32xbf16, #tpu.memory_space<vmem>>, vector<16x4xbf16>
    tpu.vector_store %arg13[%c0_78, %c16_79], %177 {strides = array<i32>} : memref<16x32xbf16, #tpu.memory_space<vmem>>, vector<16x4xbf16>,
    %c0_80 = arith.constant 0 : index
    %c20 = arith.constant 20 : index
    %179 = vector.load %arg12[%c0_80, %c20] : memref<16x32xbf16, #tpu.memory_space<vmem>>, vector<16x4xbf16>
    %cst_81 = arith.constant 0xFF800000 : f32
    %180 = vector.broadcast %cst_81 : f32 to vector<16x1xf32>
    %cst_82 = arith.constant 0.000000e+00 : f32
    %181 = vector.broadcast %cst_82 : f32 to vector<16x1xf32>
    %cst_83 = arith.constant 0.000000e+00 : f32
    %182 = vector.broadcast %cst_83 : f32 to vector<16x4xf32>
    %c0_84 = arith.constant 0 : index
    %c20_85 = arith.constant 20 : index
    %183 = vector.load %arg11[%c0_84, %c20_85] : memref<16x64xbf16, #tpu.memory_space<vmem>>, vector<16x4xbf16>
    %c0_86 = arith.constant 0 : index
    %c52 = arith.constant 52 : index
    %184 = vector.load %arg11[%c0_86, %c52] : memref<16x64xbf16, #tpu.memory_space<vmem>>, vector<16x4xbf16>
    %cst_87 = arith.constant dense<0.000000e+00> : vector<16x16xf32>
    %185 = tpu.matmul %179, %183, %cst_87 {dimension_numbers = #tpu.dot_dimension_numbers<[1], [1], [0], [0], [0, 0, 1, 0], [], []>} : vector<16x4xbf16>, vector<16x4xbf16>, vector<16x16xf32> -> vector<16x16xf32>
    %cst_88 = arith.constant dense<0xFF800000> : vector<16xf32>
    %186 = vector.multi_reduction <maximumf>, %185, %cst_88 [1] : vector<16x16xf32> to vector<16xf32>
    %187 = vector.shape_cast %186 : vector<16xf32> to vector<16x1xf32>
    %188 = arith.maximumf %180, %187 : vector<16x1xf32>
    %189 = arith.subf %180, %188 : vector<16x1xf32>
    %190 = math.exp %189 : vector<16x1xf32>
    %191 = vector.broadcast %188 : vector<16x1xf32> to vector<16x16xf32>
    %192 = arith.subf %185, %191 : vector<16x16xf32>
    %193 = math.exp %192 : vector<16x16xf32>
    %194 = arith.mulf %190, %181 : vector<16x1xf32>
    %cst_89 = arith.constant dense<0.000000e+00> : vector<16xf32>
    %195 = vector.multi_reduction <add>, %193, %cst_89 [1] : vector<16x16xf32> to vector<16xf32>
    %196 = vector.shape_cast %195 : vector<16xf32> to vector<16x1xf32>
    %197 = arith.addf %194, %196 : vector<16x1xf32>
    %198 = vector.broadcast %190 : vector<16x1xf32> to vector<16x4xf32>
    %199 = arith.mulf %198, %182 : vector<16x4xf32>
    %200 = arith.truncf %193 : vector<16x16xf32> to vector<16x16xbf16>
    %cst_90 = arith.constant dense<0.000000e+00> : vector<16x4xf32>
    %201 = tpu.matmul %200, %184, %cst_90 {dimension_numbers = #tpu.dot_dimension_numbers<[1], [0], [0], [1], [0, 0, 1, 1], [], []>} : vector<16x16xbf16>, vector<16x4xbf16>, vector<16x4xf32> -> vector<16x4xf32>
    %202 = arith.addf %199, %201 : vector<16x4xf32>
    %203 = tpu.reciprocal %197 {approx = true} : vector<16x1xf32> -> vector<16x1xf32>
    %204 = vector.broadcast %203 : vector<16x1xf32> to vector<16x4xf32>
    %205 = arith.mulf %202, %204 : vector<16x4xf32>
    %206 = arith.truncf %205 : vector<16x4xf32> to vector<16x4xbf16>
    %c0_91 = arith.constant 0 : index
    %c20_92 = arith.constant 20 : index
    %207 = vector.load %arg13[%c0_91, %c20_92] : memref<16x32xbf16, #tpu.memory_space<vmem>>, vector<16x4xbf16>
    tpu.vector_store %arg13[%c0_91, %c20_92], %206 {strides = array<i32>} : memref<16x32xbf16, #tpu.memory_space<vmem>>, vector<16x4xbf16>,
    %c0_93 = arith.constant 0 : index
    %c24 = arith.constant 24 : index
    %208 = vector.load %arg12[%c0_93, %c24] : memref<16x32xbf16, #tpu.memory_space<vmem>>, vector<16x4xbf16>
    %cst_94 = arith.constant 0xFF800000 : f32
    %209 = vector.broadcast %cst_94 : f32 to vector<16x1xf32>
    %cst_95 = arith.constant 0.000000e+00 : f32
    %210 = vector.broadcast %cst_95 : f32 to vector<16x1xf32>
    %cst_96 = arith.constant 0.000000e+00 : f32
    %211 = vector.broadcast %cst_96 : f32 to vector<16x4xf32>
    %c0_97 = arith.constant 0 : index
    %c24_98 = arith.constant 24 : index
    %212 = vector.load %arg11[%c0_97, %c24_98] : memref<16x64xbf16, #tpu.memory_space<vmem>>, vector<16x4xbf16>
    %c0_99 = arith.constant 0 : index
    %c56 = arith.constant 56 : index
    %213 = vector.load %arg11[%c0_99, %c56] : memref<16x64xbf16, #tpu.memory_space<vmem>>, vector<16x4xbf16>
    %cst_100 = arith.constant dense<0.000000e+00> : vector<16x16xf32>
    %214 = tpu.matmul %208, %212, %cst_100 {dimension_numbers = #tpu.dot_dimension_numbers<[1], [1], [0], [0], [0, 0, 1, 0], [], []>} : vector<16x4xbf16>, vector<16x4xbf16>, vector<16x16xf32> -> vector<16x16xf32>
    %cst_101 = arith.constant dense<0xFF800000> : vector<16xf32>
    %215 = vector.multi_reduction <maximumf>, %214, %cst_101 [1] : vector<16x16xf32> to vector<16xf32>
    %216 = vector.shape_cast %215 : vector<16xf32> to vector<16x1xf32>
    %217 = arith.maximumf %209, %216 : vector<16x1xf32>
    %218 = arith.subf %209, %217 : vector<16x1xf32>
    %219 = math.exp %218 : vector<16x1xf32>
    %220 = vector.broadcast %217 : vector<16x1xf32> to vector<16x16xf32>
    %221 = arith.subf %214, %220 : vector<16x16xf32>
    %222 = math.exp %221 : vector<16x16xf32>
    %223 = arith.mulf %219, %210 : vector<16x1xf32>
    %cst_102 = arith.constant dense<0.000000e+00> : vector<16xf32>
    %224 = vector.multi_reduction <add>, %222, %cst_102 [1] : vector<16x16xf32> to vector<16xf32>
    %225 = vector.shape_cast %224 : vector<16xf32> to vector<16x1xf32>
    %226 = arith.addf %223, %225 : vector<16x1xf32>
    %227 = vector.broadcast %219 : vector<16x1xf32> to vector<16x4xf32>
    %228 = arith.mulf %227, %211 : vector<16x4xf32>
    %229 = arith.truncf %222 : vector<16x16xf32> to vector<16x16xbf16>
    %cst_103 = arith.constant dense<0.000000e+00> : vector<16x4xf32>
    %230 = tpu.matmul %229, %213, %cst_103 {dimension_numbers = #tpu.dot_dimension_numbers<[1], [0], [0], [1], [0, 0, 1, 1], [], []>} : vector<16x16xbf16>, vector<16x4xbf16>, vector<16x4xf32> -> vector<16x4xf32>
    %231 = arith.addf %228, %230 : vector<16x4xf32>
    %232 = tpu.reciprocal %226 {approx = true} : vector<16x1xf32> -> vector<16x1xf32>
    %233 = vector.broadcast %232 : vector<16x1xf32> to vector<16x4xf32>
    %234 = arith.mulf %231, %233 : vector<16x4xf32>
    %235 = arith.truncf %234 : vector<16x4xf32> to vector<16x4xbf16>
    %c0_104 = arith.constant 0 : index
    %c24_105 = arith.constant 24 : index
    %236 = vector.load %arg13[%c0_104, %c24_105] : memref<16x32xbf16, #tpu.memory_space<vmem>>, vector<16x4xbf16>
    tpu.vector_store %arg13[%c0_104, %c24_105], %235 {strides = array<i32>} : memref<16x32xbf16, #tpu.memory_space<vmem>>, vector<16x4xbf16>,
    %c0_106 = arith.constant 0 : index
    %c28 = arith.constant 28 : index
    %237 = vector.load %arg12[%c0_106, %c28] : memref<16x32xbf16, #tpu.memory_space<vmem>>, vector<16x4xbf16>
    %cst_107 = arith.constant 0xFF800000 : f32
    %238 = vector.broadcast %cst_107 : f32 to vector<16x1xf32>
    %cst_108 = arith.constant 0.000000e+00 : f32
    %239 = vector.broadcast %cst_108 : f32 to vector<16x1xf32>
    %cst_109 = arith.constant 0.000000e+00 : f32
    %240 = vector.broadcast %cst_109 : f32 to vector<16x4xf32>
    %c0_110 = arith.constant 0 : index
    %c28_111 = arith.constant 28 : index
    %241 = vector.load %arg11[%c0_110, %c28_111] : memref<16x64xbf16, #tpu.memory_space<vmem>>, vector<16x4xbf16>
    %c0_112 = arith.constant 0 : index
    %c60 = arith.constant 60 : index
    %242 = vector.load %arg11[%c0_112, %c60] : memref<16x64xbf16, #tpu.memory_space<vmem>>, vector<16x4xbf16>
    %cst_113 = arith.constant dense<0.000000e+00> : vector<16x16xf32>
    %243 = tpu.matmul %237, %241, %cst_113 {dimension_numbers = #tpu.dot_dimension_numbers<[1], [1], [0], [0], [0, 0, 1, 0], [], []>} : vector<16x4xbf16>, vector<16x4xbf16>, vector<16x16xf32> -> vector<16x16xf32>
    %cst_114 = arith.constant dense<0xFF800000> : vector<16xf32>
    %244 = vector.multi_reduction <maximumf>, %243, %cst_114 [1] : vector<16x16xf32> to vector<16xf32>
    %245 = vector.shape_cast %244 : vector<16xf32> to vector<16x1xf32>
    %246 = arith.maximumf %238, %245 : vector<16x1xf32>
    %247 = arith.subf %238, %246 : vector<16x1xf32>
    %248 = math.exp %247 : vector<16x1xf32>
    %249 = vector.broadcast %246 : vector<16x1xf32> to vector<16x16xf32>
    %250 = arith.subf %243, %249 : vector<16x16xf32>
    %251 = math.exp %250 : vector<16x16xf32>
    %252 = arith.mulf %248, %239 : vector<16x1xf32>
    %cst_115 = arith.constant dense<0.000000e+00> : vector<16xf32>
    %253 = vector.multi_reduction <add>, %251, %cst_115 [1] : vector<16x16xf32> to vector<16xf32>
    %254 = vector.shape_cast %253 : vector<16xf32> to vector<16x1xf32>
    %255 = arith.addf %252, %254 : vector<16x1xf32>
    %256 = vector.broadcast %248 : vector<16x1xf32> to vector<16x4xf32>
    %257 = arith.mulf %256, %240 : vector<16x4xf32>
    %258 = arith.truncf %251 : vector<16x16xf32> to vector<16x16xbf16>
    %cst_116 = arith.constant dense<0.000000e+00> : vector<16x4xf32>
    %259 = tpu.matmul %258, %242, %cst_116 {dimension_numbers = #tpu.dot_dimension_numbers<[1], [0], [0], [1], [0, 0, 1, 1], [], []>} : vector<16x16xbf16>, vector<16x4xbf16>, vector<16x4xf32> -> vector<16x4xf32>
    %260 = arith.addf %257, %259 : vector<16x4xf32>
    %261 = tpu.reciprocal %255 {approx = true} : vector<16x1xf32> -> vector<16x1xf32>
    %262 = vector.broadcast %261 : vector<16x1xf32> to vector<16x4xf32>
    %263 = arith.mulf %260, %262 : vector<16x4xf32>
    %264 = arith.truncf %263 : vector<16x4xf32> to vector<16x4xbf16>
    %c0_117 = arith.constant 0 : index
    %c28_118 = arith.constant 28 : index
    %265 = vector.load %arg13[%c0_117, %c28_118] : memref<16x32xbf16, #tpu.memory_space<vmem>>, vector<16x4xbf16>
    tpu.vector_store %arg13[%c0_117, %c28_118], %264 {strides = array<i32>} : memref<16x32xbf16, #tpu.memory_space<vmem>>, vector<16x4xbf16>,
    %c0_119 = arith.constant 0 : index
    %c0_120 = arith.constant 0 : index
    %266 = vector.load %arg13[%c0_119, %c0_120] : memref<16x32xbf16, #tpu.memory_space<vmem>>, vector<16x32xbf16>
    %267 = arith.extf %266 : vector<16x32xbf16> to vector<16x32xf32>
    %268 = arith.addf %4, %267 : vector<16x32xf32>
    %c4_121 = arith.constant 4 : index
    %c0_122 = arith.constant 0 : index
    %269 = vector.load %arg4[%c4_121, %c0_122] : memref<8x32xf32, #tpu.memory_space<vmem>>, vector<1x32xf32>
    %c5 = arith.constant 5 : index
    %c0_123 = arith.constant 0 : index
    %270 = vector.load %arg4[%c5, %c0_123] : memref<8x32xf32, #tpu.memory_space<vmem>>, vector<1x32xf32>
    %cst_124 = arith.constant dense<0.000000e+00> : vector<16xf32>
    %271 = vector.multi_reduction <add>, %268, %cst_124 [1] : vector<16x32xf32> to vector<16xf32>
    %272 = vector.shape_cast %271 : vector<16xf32> to vector<16x1xf32>
    %cst_125 = arith.constant 3.200000e+01 : f32
    %273 = vector.broadcast %cst_125 : f32 to vector<16x1xf32>
    %274 = arith.divf %272, %273 : vector<16x1xf32>
    %275 = vector.broadcast %274 : vector<16x1xf32> to vector<16x32xf32>
    %276 = arith.subf %268, %275 : vector<16x32xf32>
    %277 = arith.mulf %276, %276 : vector<16x32xf32>
    %cst_126 = arith.constant dense<0.000000e+00> : vector<16xf32>
    %278 = vector.multi_reduction <add>, %277, %cst_126 [1] : vector<16x32xf32> to vector<16xf32>
    %279 = vector.shape_cast %278 : vector<16xf32> to vector<16x1xf32>
    %cst_127 = arith.constant 3.200000e+01 : f32
    %280 = vector.broadcast %cst_127 : f32 to vector<16x1xf32>
    %281 = arith.divf %279, %280 : vector<16x1xf32>
    %282 = vector.broadcast %274 : vector<16x1xf32> to vector<16x32xf32>
    %283 = arith.subf %268, %282 : vector<16x32xf32>
    %cst_128 = arith.constant 9.99999974E-6 : f32
    %284 = vector.broadcast %cst_128 : f32 to vector<16x1xf32>
    %285 = arith.addf %281, %284 : vector<16x1xf32>
    %286 = math.rsqrt %285 : vector<16x1xf32>
    %287 = vector.broadcast %286 : vector<16x1xf32> to vector<16x32xf32>
    %288 = arith.mulf %283, %287 : vector<16x32xf32>
    %289 = vector.broadcast %269 : vector<1x32xf32> to vector<16x32xf32>
    %290 = arith.mulf %288, %289 : vector<16x32xf32>
    %291 = vector.broadcast %270 : vector<1x32xf32> to vector<16x32xf32>
    %292 = arith.addf %290, %291 : vector<16x32xf32>
    %c6 = arith.constant 6 : index
    %c0_129 = arith.constant 0 : index
    %293 = vector.load %arg4[%c6, %c0_129] : memref<8x32xf32, #tpu.memory_space<vmem>>, vector<1x32xf32>
    %c7 = arith.constant 7 : index
    %c0_130 = arith.constant 0 : index
    %294 = vector.load %arg4[%c7, %c0_130] : memref<8x32xf32, #tpu.memory_space<vmem>>, vector<1x32xf32>
    %cst_131 = arith.constant dense<0.000000e+00> : vector<16xf32>
    %295 = vector.multi_reduction <add>, %292, %cst_131 [1] : vector<16x32xf32> to vector<16xf32>
    %296 = vector.shape_cast %295 : vector<16xf32> to vector<16x1xf32>
    %cst_132 = arith.constant 3.200000e+01 : f32
    %297 = vector.broadcast %cst_132 : f32 to vector<16x1xf32>
    %298 = arith.divf %296, %297 : vector<16x1xf32>
    %299 = vector.broadcast %298 : vector<16x1xf32> to vector<16x32xf32>
    %300 = arith.subf %292, %299 : vector<16x32xf32>
    %301 = arith.mulf %300, %300 : vector<16x32xf32>
    %cst_133 = arith.constant dense<0.000000e+00> : vector<16xf32>
    %302 = vector.multi_reduction <add>, %301, %cst_133 [1] : vector<16x32xf32> to vector<16xf32>
    %303 = vector.shape_cast %302 : vector<16xf32> to vector<16x1xf32>
    %cst_134 = arith.constant 3.200000e+01 : f32
    %304 = vector.broadcast %cst_134 : f32 to vector<16x1xf32>
    %305 = arith.divf %303, %304 : vector<16x1xf32>
    %306 = vector.broadcast %298 : vector<16x1xf32> to vector<16x32xf32>
    %307 = arith.subf %292, %306 : vector<16x32xf32>
    %cst_135 = arith.constant 9.99999974E-6 : f32
    %308 = vector.broadcast %cst_135 : f32 to vector<16x1xf32>
    %309 = arith.addf %305, %308 : vector<16x1xf32>
    %310 = math.rsqrt %309 : vector<16x1xf32>
    %311 = vector.broadcast %310 : vector<16x1xf32> to vector<16x32xf32>
    %312 = arith.mulf %307, %311 : vector<16x32xf32>
    %313 = vector.broadcast %293 : vector<1x32xf32> to vector<16x32xf32>
    %314 = arith.mulf %312, %313 : vector<16x32xf32>
    %315 = vector.broadcast %294 : vector<1x32xf32> to vector<16x32xf32>
    %316 = arith.addf %314, %315 : vector<16x32xf32>
    %317 = arith.truncf %316 : vector<16x32xf32> to vector<16x32xbf16>
    %c0_136 = arith.constant 0 : index
    %c0_137 = arith.constant 0 : index
    %318 = vector.load %arg6[%c0_136, %c0_137] : memref<32x128xbf16, #tpu.memory_space<vmem>>, vector<32x128xbf16>
    %cst_138 = arith.constant dense<0.000000e+00> : vector<16x128xf32>
    %319 = tpu.matmul %317, %318, %cst_138 {dimension_numbers = #tpu.dot_dimension_numbers<[1], [0], [0], [1], [0, 0, 1, 1], [], []>} : vector<16x32xbf16>, vector<32x128xbf16>, vector<16x128xf32> -> vector<16x128xf32>
    %c0_139 = arith.constant 0 : index
    %c0_140 = arith.constant 0 : index
    %320 = vector.load %arg7[%c0_139, %c0_140] : memref<1x128xf32, #tpu.memory_space<vmem>>, vector<1x128xf32>
    %321 = vector.broadcast %320 : vector<1x128xf32> to vector<16x128xf32>
    %322 = arith.addf %319, %321 : vector<16x128xf32>
    %cst_141 = arith.constant 5.000000e-01 : f32
    %323 = vector.broadcast %cst_141 : f32 to vector<16x128xf32>
    %324 = arith.mulf %323, %322 : vector<16x128xf32>
    %cst_142 = arith.constant 0.707106769 : f32
    %325 = vector.broadcast %cst_142 : f32 to vector<16x128xf32>
    %326 = arith.mulf %322, %325 : vector<16x128xf32>
    %327 = math.absf %326 : vector<16x128xf32>
    %cst_143 = arith.constant 0.327591091 : f32
    %328 = vector.broadcast %cst_143 : f32 to vector<16x128xf32>
    %329 = arith.mulf %328, %327 : vector<16x128xf32>
    %cst_144 = arith.constant 1.000000e+00 : f32
    %330 = vector.broadcast %cst_144 : f32 to vector<16x128xf32>
    %331 = arith.addf %330, %329 : vector<16x128xf32>
    %cst_145 = arith.constant 1.000000e+00 : f32
    %332 = vector.broadcast %cst_145 : f32 to vector<16x128xf32>
    %333 = arith.divf %332, %331 : vector<16x128xf32>
    %cst_146 = arith.constant 1.06140542 : f32
    %334 = vector.broadcast %cst_146 : f32 to vector<16x128xf32>
    %335 = arith.mulf %334, %333 : vector<16x128xf32>
    %cst_147 = arith.constant -1.45315206 : f32
    %336 = vector.broadcast %cst_147 : f32 to vector<16x128xf32>
    %337 = arith.addf %335, %336 : vector<16x128xf32>
    %338 = arith.mulf %337, %333 : vector<16x128xf32>
    %cst_148 = arith.constant 1.42141378 : f32
    %339 = vector.broadcast %cst_148 : f32 to vector<16x128xf32>
    %340 = arith.addf %338, %339 : vector<16x128xf32>
    %341 = arith.mulf %340, %333 : vector<16x128xf32>
    %cst_149 = arith.constant -0.284496725 : f32
    %342 = vector.broadcast %cst_149 : f32 to vector<16x128xf32>
    %343 = arith.addf %341, %342 : vector<16x128xf32>
    %344 = arith.mulf %343, %333 : vector<16x128xf32>
    %cst_150 = arith.constant 0.254829586 : f32
    %345 = vector.broadcast %cst_150 : f32 to vector<16x128xf32>
    %346 = arith.addf %344, %345 : vector<16x128xf32>
    %347 = arith.mulf %346, %333 : vector<16x128xf32>
    %cst_151 = arith.constant 0.000000e+00 : f32
    %348 = vector.broadcast %cst_151 : f32 to vector<16x128xf32>
    %349 = arith.subf %348, %327 : vector<16x128xf32>
    %350 = arith.mulf %349, %327 : vector<16x128xf32>
    %351 = math.exp %350 : vector<16x128xf32>
    %352 = arith.mulf %347, %351 : vector<16x128xf32>
    %cst_152 = arith.constant 1.000000e+00 : f32
    %353 = vector.broadcast %cst_152 : f32 to vector<16x128xf32>
    %354 = arith.subf %353, %352 : vector<16x128xf32>
    %cst_153 = arith.constant 0.000000e+00 : f32
    %355 = vector.broadcast %cst_153 : f32 to vector<16x128xf32>
    %356 = arith.cmpf oge, %326, %355 : vector<16x128xf32>
    %cst_154 = arith.constant 0.000000e+00 : f32
    %357 = vector.broadcast %cst_154 : f32 to vector<16x128xf32>
    %358 = arith.subf %357, %354 : vector<16x128xf32>
    %359 = arith.select %356, %354, %358 : vector<16x128xi1>, vector<16x128xf32>
    %cst_155 = arith.constant 1.000000e+00 : f32
    %360 = vector.broadcast %cst_155 : f32 to vector<16x128xf32>
    %361 = arith.addf %360, %359 : vector<16x128xf32>
    %362 = arith.mulf %324, %361 : vector<16x128xf32>
    %363 = arith.truncf %362 : vector<16x128xf32> to vector<16x128xbf16>
    %c0_156 = arith.constant 0 : index
    %c0_157 = arith.constant 0 : index
    %364 = vector.load %arg8[%c0_156, %c0_157] : memref<128x32xbf16, #tpu.memory_space<vmem>>, vector<128x32xbf16>
    %cst_158 = arith.constant dense<0.000000e+00> : vector<16x32xf32>
    %365 = tpu.matmul %363, %364, %cst_158 {dimension_numbers = #tpu.dot_dimension_numbers<[1], [0], [0], [1], [0, 0, 1, 1], [], []>} : vector<16x128xbf16>, vector<128x32xbf16>, vector<16x32xf32> -> vector<16x32xf32>
    %c0_159 = arith.constant 0 : index
    %c0_160 = arith.constant 0 : index
    %366 = vector.load %arg9[%c0_159, %c0_160] : memref<1x32xf32, #tpu.memory_space<vmem>>, vector<1x32xf32>
    %367 = vector.broadcast %366 : vector<1x32xf32> to vector<16x32xf32>
    %368 = arith.addf %365, %367 : vector<16x32xf32>
    %369 = arith.addf %268, %368 : vector<16x32xf32>
    %c0_161 = arith.constant 0 : index
    %c0_162 = arith.constant 0 : index
    %c0_163 = arith.constant 0 : index
    %370 = vector.load %arg10[%c0_161, %c0_162, %c0_163] : memref<1x16x32xf32, #tpu.memory_space<vmem>>, vector<1x16x32xf32>
    %371 = vector.shape_cast %370 : vector<1x16x32xf32> to vector<16x32xf32>
    %372 = vector.shape_cast %369 : vector<16x32xf32> to vector<1x16x32xf32>
    tpu.vector_store %arg10[%c0_161, %c0_162, %c0_163], %372 {strides = array<i32>} : memref<1x16x32xf32, #tpu.memory_space<vmem>>, vector<1x16x32xf32>,
    return
  }
  func.func @transform_0(%arg0: i32, %arg1: i32) -> (i32, i32, i32) {
    %c0_i32 = arith.constant 0 : i32
    %c0_i32_0 = arith.constant 0 : i32
    return %arg0, %arg1, %c0_i32 : i32, i32, i32
  }
  func.func @transform_1(%arg0: i32, %arg1: i32) -> (i32, i32, i32) {
    %c0_i32 = arith.constant 0 : i32
    %c0_i32_0 = arith.constant 0 : i32
    %c0_i32_1 = arith.constant 0 : i32
    return %arg0, %c0_i32, %c0_i32_0 : i32, i32, i32
  }
  func.func @transform_2(%arg0: i32, %arg1: i32) -> (i32, i32) {
    %c0_i32 = arith.constant 0 : i32
    %c0_i32_0 = arith.constant 0 : i32
    %c0_i32_1 = arith.constant 0 : i32
    return %c0_i32, %c0_i32_0 : i32, i32
  }
  func.func @transform_3(%arg0: i32, %arg1: i32) -> (i32, i32) {
    %c0_i32 = arith.constant 0 : i32
    %c0_i32_0 = arith.constant 0 : i32
    %c0_i32_1 = arith.constant 0 : i32
    return %c0_i32, %c0_i32_0 : i32, i32
  }
  func.func @transform_4(%arg0: i32, %arg1: i32) -> (i32, i32) {
    %c0_i32 = arith.constant 0 : i32
    %c0_i32_0 = arith.constant 0 : i32
    %c0_i32_1 = arith.constant 0 : i32
    return %c0_i32, %c0_i32_0 : i32, i32
  }
  func.func @transform_5(%arg0: i32, %arg1: i32) -> (i32, i32) {
    %c0_i32 = arith.constant 0 : i32
    %c0_i32_0 = arith.constant 0 : i32
    %c0_i32_1 = arith.constant 0 : i32
    return %c0_i32, %c0_i32_0 : i32, i32
  }
  func.func @transform_6(%arg0: i32, %arg1: i32) -> (i32, i32) {
    %c0_i32 = arith.constant 0 : i32
    %c0_i32_0 = arith.constant 0 : i32
    %c0_i32_1 = arith.constant 0 : i32
    return %c0_i32, %c0_i32_0 : i32, i32
  }
  func.func @transform_7(%arg0: i32, %arg1: i32) -> (i32, i32) {
    %c0_i32 = arith.constant 0 : i32
    %c0_i32_0 = arith.constant 0 : i32
    %c0_i32_1 = arith.constant 0 : i32
    return %c0_i32, %c0_i32_0 : i32, i32
  }
  func.func @transform_8(%arg0: i32, %arg1: i32) -> (i32, i32, i32) {
    %c0_i32 = arith.constant 0 : i32
    %c0_i32_0 = arith.constant 0 : i32
    return %arg0, %arg1, %c0_i32 : i32, i32, i32
  }
}

</mosaic_0001>

<bundles_post_ra>
// kernel: tpu_custom_call.1
= control target key start
LH: loop header
LB: loop body
LE: loop exit
PB: predicated region body
PF: predicated region fallthrough
CT: control target
= control target key end

     0   :  { %13 = vsyncpa [#allocation6], 0  ;;  %s3504_s0 = inlined_call_operand.vmem [shape: f32[2,16,32], index: 0, kind: input, shape index: {}]   ;;  %s3505_s1 = inlined_call_operand.vmem [shape: f32[2,16,32], index: 1, kind: input, shape index: {}]   ;;  %s3506_s2 = inlined_call_operand.hbm [shape: f32[8,32], index: 2, kind: input, shape index: {}]   ;;  %s3507_s3 = inlined_call_operand.vmem [shape: bf16[32,96], index: 3, kind: input, shape index: {}]   ;;  %s3508_s4 = inlined_call_operand.hbm [shape: bf16[32,128], index: 4, kind: input, shape index: {}]   ;;  %s3509_s5 = inlined_call_operand.vmem [shape: f32[1,128], index: 5, kind: input, shape index: {}]   ;;  %s3510_s6 = inlined_call_operand.vmem [shape: bf16[128,32], index: 6, kind: input, shape index: {}]   ;;  %s3511_s7 = inlined_call_operand.vmem [shape: f32[1,32], index: 7, kind: input, shape index: {}]   ;;  %s3512_s8 = inlined_call_operand.hbm [shape: f32[2,16,32], index: 8, kind: output, shape index: {}]  }
   0x1   :  { %14 = vsyncpa [#allocation9], 0 }
   0x2   :  { %15 = vsyncpa [#allocation7], 0 }
   0x3   :  { %17 = vsyncpa [#allocation7 + $0x1], 0  ;;  %s2920_s27 = smov 0   ;;  %s2922_s28 = smov 0  }
   0x4   :  { %s2924_s29 = smov 0   ;;  %s2926_s30 = smov 0  }
   0x5   :  { %s2928_s9 = smov 0   ;;  %s2930_s10 = smov 0  }
   0x6 LB: > { %3519 = sst [smem:[#allocation14_spill]] %s2839_s9  ;;  %s2207_s11 = sadd.s32 4294967295, %s2843_s10   ;;  %s2843_s10 = sphi %s2930_s10, %s23_s10   ;;  %s2839_s9 = sphi %s2928_s9, %s3531_s9   ;;  %s2835_s30 = sphi %s2926_s30, %s3530_s30   ;;  %s2831_s29 = sphi %s2924_s29, %s3534_s29   ;;  %s2827_s28 = sphi %s2922_s28, %s3533_s28   ;;  %s2823_s27 = sphi %s2920_s27, %s3532_s27  }
   0x7   : > { %s2208_s12 = sadd.s32 4294967294, %s2843_s10   ;;  %s35_s13 = sadd.s32 1, %s2839_s9 }
   0x8   : > { %s224_s14 = sadd.s32 1, %s2831_s29  ;;  %p37_p0 = scmp.ge.s32.totalorder %s35_s13, 2 }
   0x9   : > { %p234_p1 = scmp.ne.s32.totalorder %s2831_s29, %s2827_s28  ;;  %p235_p2 = scmp.eq.s32.totalorder %s2207_s11, 1 }
   0xa   : > { %p240_p3 = scmp.ne.s32.totalorder %s2827_s28, %s2823_s27  ;;  %s3536_s13 = smov (%p37_p0, %s35_s13), 0 }
   0xb   : > { %3520 = sst [smem:[#allocation15_spill]] %s3536_s13  ;;  %p2960_p4 = por %p235_p2, %p234_p1 }
   0xc   : > { %p241_p5 = scmp.eq.s32.totalorder %s2208_s12, 1  ;;  %s219_s16 = ssub.s32 %s2839_s9, %s3536_s13 }
   0xd   : > { %s3521_s15 = scalar_select %p2960_p4, 1, 0 }
   0xe   : > { %p2209_p6 = scmp.ge.s32.totalorder %s2843_s10, 1  ;;  %p222_p7 = scmp.eq.s32.totalorder %s219_s16, 0 }
   0xf   : > { %p2967_p8 = por %p241_p5, %p240_p3  ;;  %p248_p9 = scmp.lt.s32.totalorder %s2843_s10, 3 }
  0x10   : > { %s2973_s18 = scalar_select %p222_p7, %s2831_s29, %s224_s14  }
  0x11   : > { %s3522_s17 = scalar_select %p2967_p8, 1, 0 }
  0x12   : > { %p2975_p10 = pnand %p2209_p6, %p248_p9  ;;  %p2979_p11 = scmp.eq.s32.totalorder %s2207_s11, 0 }
  0x13   : > { %s2845_s21 = smov [#allocation5]   ;;  %s2846_s23 = smov [#allocation8]  }
  0x14   : > { %s3523_s19 = scalar_select %p2975_p10, 1, 0 }
  0x15   : > { %s3524_s20 = scalar_select %p2979_p11, 1, 0 }
  0x16   : > { %p2472_p12 = pneg %p2975_p10  ;;  %s269_s22 = sshll.u32 %s2845_s21, 4  ;;  %s270_s22 = int_to_ptr.vmem [resolvable:$true] %s269_s22 }
  0x17   : > { %s282_s24 = sshll.u32 %s2846_s23, 4  ;;  %s2701_s12 = scalar_lea.hbm %s3506_s2, 128  ;;  %s2991_s24 = int_to_ptr.vmem [resolvable:$true] %s282_s24 }
  0x18   : > { %p2987_p13 = pnand %p2979_p11, %p2472_p12  ;;  %p2702_p0 = scmp.ne.s32.totalorder %s3506_s2, %s2701_s12 }
  0x19   : > { %p2708_p5 = scmp.lt.u32.totalorder %s2701_s12, %s3506_s2 }
  0x1a   : > { %p2703_p1 = pneg %p2987_p13 }
  0x1c   : > { %p2704_p2 = pnand %p2703_p1, %p2702_p0 }
  0x1e   : > { %p2705_p3 = pneg %p2704_p2 }
  0x20   : > { %p2710_p6 = pnand %p2708_p5, %p2705_p3 }
  0x22   : > { %2713 = shalt.err (!%p2710_p6)
}
  0x23   : > { %s2714_s13 = scalar_lea.vmem %s270_s22, 128  ;;  %p2722_p8 = scmp.lt.s32.totalorder %s270_s22, %s270_s22 }
  0x24   : > { %p2715_p7 = scmp.ne.s32.totalorder %s270_s22, %s2714_s13  ;;  %p2723_p4 = scmp.lt.s32.totalorder %s2714_s13, %s2714_s13 }
  0x26   : > { %p2717_p9 = pnand %p2715_p7, %p2703_p1  ;;  %p2724_p11 = por %p2723_p4, %p2722_p8 }
  0x28   : > { %p2718_p12 = pneg %p2717_p9 }
  0x2a   : > { %p2725_p10 = pnand %p2724_p11, %p2718_p12 }
  0x2c   : > { %2728 = shalt.err (!%p2725_p10)
}
  0x2d   : > { %2475 = dma.hbm_to_vmem [thread:$0]  (!%p2987_p13), %s3506_s2, 128, %s270_s22, [#allocation6]  }
  0x2e   : > { %s2729_s16 = scalar_lea.hbm %s3508_s4, 256 }
  0x2f   : > { %p2730_p0 = scmp.ne.s32.totalorder %s3508_s4, %s2729_s16  ;;  %p2736_p10 = scmp.lt.u32.totalorder %s2729_s16, %s3508_s4 }
  0x31   : > { %p2732_p4 = pnand %p2730_p0, %p2703_p1 }
  0x33   : > { %p2733_p8 = pneg %p2732_p4 }
  0x35   : > { %p2738_p11 = pnand %p2736_p10, %p2733_p8 }
  0x37   : > { %2741 = shalt.err (!%p2738_p11)
}
  0x38   : > { %s2742_s22 = scalar_lea.vmem %s2991_s24, 256  ;;  %p2750_p6 = scmp.lt.s32.totalorder %s2991_s24, %s2991_s24 }
  0x39   : > { %p2743_p2 = scmp.ne.s32.totalorder %s2991_s24, %s2742_s22  ;;  %p2751_p7 = scmp.lt.s32.totalorder %s2742_s22, %s2742_s22 }
  0x3b   : > { %p2745_p3 = pnand %p2743_p2, %p2703_p1  ;;  %p2752_p9 = por %p2751_p7, %p2750_p6 }
  0x3d   : > { %p2746_p5 = pneg %p2745_p3 }
  0x3f   : > { %p2753_p12 = pnand %p2752_p9, %p2746_p5 }
  0x41   : > { %2756 = shalt.err (!%p2753_p12)
}
  0x42   : > { %s2847_s9 = smov 64   ;;  %s2848_s26 = smov 4  }
  0x43   : > { %2478 = dma.hbm_to_vmem [thread:$0]  (!%p2987_p13), %s3508_s4, 256, %s2991_s24, [#allocation9], %s2847_s9, %s2847_s9, %s2848_s26  }
  0x44   : > { %p3526_p0 = scmp.ne.s32.totalorder %s3523_s19, 0 }
  0x45   : > { %p3527_p1 = scmp.ne.s32.totalorder (!%p3526_p0), %s3524_s20, 0 }
  0x46   : > { %320 = sbr.rel (%p3526_p0) target bundleno = 2688 (0xa80), region = 52 }
  0x4d   : > { %2810 = dma.done.wait (%p3527_p1), [#allocation6], 128  }
  0x4e   : > { %2812 = vsyncadd (%p3527_p1), [#allocation6], 4294967168 }
  0x4f   : > { %2814 = dma.done.wait (%p3527_p1), [#allocation9], 256  }
  0x50   : > { %2816 = vsyncadd (%p3527_p1), [#allocation9], 4294967040  ;;  %p368_p4 = scmp.lt.s32.totalorder %s2835_s30, 1  ;;  %vm392_vm0 = vcmask 261120   ;;  %v2566_v28 = vld [vmem:[%s3507_s3 + $0x8] sm:$0xff]   ;;  %v2565_v29 = vld [vmem:[%s3507_s3] sm:$0xff]  }
  0x51   : > { %s2849_s11 = smov 96   ;;  %v2850_v30 = vmov 0.0   ;;  %vm2851_vm1 = vmmov 0   ;;  %v2221_v47 = vld [vmem:[#allocation5] ss:$0 sm:$0xff]  ;;  %v2567_v60 = vld [vmem:[%s3507_s3] sm:$0xff]  }
  0x52   : > { %s369_s25 = scalar_select %p368_p4, %s2835_s30, 1  ;;  %2322 = vmatprep.subr.bf16.mxu0 %v2850_v30  ;;  %2344 = vmatprep.subr.bf16.mxu1 %v2850_v30  ;;  %v2222_v52 = vld [vmem:[#allocation5 + $0x1] ss:$0 sm:$0xff]  ;;  %v2226_v59 = vld [vmem:[#allocation5 + $0x2] ss:$0 sm:$0xff]  ;;  %vm498_vm2 = vcmask 523264  }
  0x53   : > { %2326 = vmatprep.mubr.msk.bf16.mxu0 %vm2851_vm1, %v2850_v30  ;;  %2346 = vmatprep.mubr.msk.bf16.mxu1 %vm2851_vm1, %v2850_v30  ;;  %vm609_vm3 = vcmask 31744   ;;  %s2852_s19 = smov 120   ;;  %s2854_s21 = smov 116   ;;  %vm657_vm4 = vcmask 130048   ;;  %vm885_vm5 = vcmask 64544   ;;  %vm1029_vm6 = vcmask 97344  }
  0x54   : > { %s2269_s24 = sshll.u32 %s369_s25, 4  ;;  %s2855_s23 = smov 112   ;;  %vm1173_vm7 = vcmask 130144   ;;  %vm1317_vm8 = vcmask 162944   ;;  %vm1461_vm9 = vcmask 195744   ;;  %vm1605_vm10 = vcmask 228544  }
  0x55   : > { %s381_s16 = scalar_lea.vmem %s3505_s1, %s2269_s24  ;;  %s3058_s13 = scalar_lea.vmem %s3504_s0, %s2269_s24  ;;  %vm1749_vm11 = vcmask 261344  }
  0x56   : > { %v388_v0 = vld [vmem:[%s381_s16] sm:$0xff]  ;;  %v389_v2 = vld [vmem:[%s381_s16 + $0x8] sm:$0xff]  ;;  %s2853_s16 = smov 124   ;;  %s2856_s20 = smov 108  }
  0x57   : > { %v500_v1 = vld [vmem:[%s3058_s13] sm:$0xff]  ;;  %v393_v3 = vsel %vm392_vm0, %v388_v0, 0.0  ;;  %v501_v5 = vld [vmem:[%s3058_s13 + $0x8] sm:$0xff]  ;;  %v396_v6 = vsel %vm392_vm0, %v389_v2, 0.0  ;;  %s2857_s22 = smov 104   ;;  %s2858_s9 = smov 100  }
  0x58   : > { %v505_v4 = vsel %vm392_vm0, %v500_v1, 0.0  ;;  %394 = vadd.xlane.f32.xlu0 %v393_v3  ;;  %v508_v7 = vsel %vm392_vm0, %v501_v5, 0.0  ;;  %s2859_s26 = smov 88   ;;  %s2860_s12 = smov 92  }
  0x59   : > { %506 = vadd.xlane.f32.xlu1 %v505_v4  ;;  %s2861_s25 = smov 84   ;;  %s2863_s24 = smov 76  }
  0x5a   : > { %s2864_s14 = smov 72   ;;  %p3528_p8 = scmp.ne.s32.totalorder %s3521_s15, 0 }
  0x5c   : > { %397 = vadd.xlane.f32.xlu0 %v396_v6 }
  0x5d   : > { %509 = vadd.xlane.f32.xlu1 %v508_v7 }
  0xe5   : > { %v395_v8 = vpop.xlane.xlu0 %394 }
  0xe6   : > { %v507_v9 = vpop.xlane.xlu1 %506  ;;  %v400_v10 = vmul.f32 0.03125, %v395_v8 }
  0xe7   : > { %v512_v11 = vmul.f32 0.03125, %v507_v9 }
  0xe8   : > { %v402_v12 = vsub.f32 %v388_v0, %v400_v10  ;;  %v2568_v0 = vld [vmem:[%s3507_s3 + $0x8] sm:$0xff]  }
  0xe9   : > { %v514_v13 = vsub.f32 %v500_v1, %v512_v11  ;;  %v398_v14 = vpop.xlane.xlu0 %397  ;;  %v2227_v1 = vld [vmem:[#allocation5 + $0x3] ss:$0 sm:$0xff] }
  0xea   : > { %v510_v15 = vpop.xlane.xlu1 %509  ;;  %v401_v16 = vmul.f32 0.03125, %v398_v14  ;;  %v404_v18 = vmul.f32 %v402_v12, %v402_v12 }
  0xeb   : > { %v513_v17 = vmul.f32 0.03125, %v510_v15  ;;  %v516_v19 = vmul.f32 %v514_v13, %v514_v13 }
  0xec   : > { %v403_v20 = vsub.f32 %v389_v2, %v401_v16  ;;  %v406_v22 = vsel %vm392_vm0, %v404_v18, 0.0 }
  0xed   : > { %v515_v21 = vsub.f32 %v501_v5, %v513_v17  ;;  %407 = vadd.xlane.f32.xlu0 %v406_v22  ;;  %v518_v23 = vsel %vm392_vm0, %v516_v19, 0.0 }
  0xee   : > { %v405_v24 = vmul.f32 %v403_v20, %v403_v20 }
  0xef   : > { %v517_v25 = vmul.f32 %v515_v21, %v515_v21 }
  0xf0   : > { %v409_v26 = vsel %vm392_vm0, %v405_v24, 0.0 }
  0xf1   : > { %519 = vadd.xlane.f32.xlu0 %v518_v23  ;;  %410 = vadd.xlane.f32.xlu1 %v409_v26  ;;  %v521_v27 = vsel %vm392_vm0, %v517_v25, 0.0 }
  0xf5   : > { %522 = vadd.xlane.f32.xlu1 %v521_v27 }
 0x106   : > { %449 = vrot.lane.b32.xlu1 %v2566_v28, %s2849_s11 }
 0x107   : > { %447 = vrot.lane.b32.xlu0 %v2565_v29, %s2849_s11 }
 0x17a   : > { %v408_v31 = vpop.xlane.xlu0 %407 }
 0x17b   : > { %v412_v32 = vmul.f32 0.03125, %v408_v31 }
 0x17d   : > { %v414_v33 = vadd.f32 1e-05, %v412_v32 }
 0x17e   : > { %v411_v34 = vpop.xlane.xlu1 %410  ;;  %v520_v35 = vpop.xlane.xlu0 %519 }
 0x17f   : > { %2579 = vrsqrt.f32 %v414_v33  ;;  %v413_v36 = vmul.f32 0.03125, %v411_v34  ;;  %v524_v37 = vmul.f32 0.03125, %v520_v35 }
 0x181   : > { %v415_v38 = vadd.f32 1e-05, %v413_v36  ;;  %v526_v39 = vadd.f32 1e-05, %v524_v37 }
 0x182   : > { %v523_v40 = vpop.xlane.xlu1 %522  ;;  %v448_v41 = vpop.permute.xlu0 %447 }
 0x183   : > { %2581 = vrsqrt.f32 %v415_v38  ;;  %v525_v42 = vmul.f32 0.03125, %v523_v40  ;;  %2323 = vmatpush3.bf16.msra.mxu0 %v448_v41 }
 0x184   : > { %2324 = vmatprep.subr.bf16.mxu0 %v2850_v30  ;;  %2583 = vrsqrt.f32 %v526_v39 }
 0x185   : > { %v527_v43 = vadd.f32 1e-05, %v525_v42 }
 0x186   : > { %v450_v44 = vpop.permute.xlu1 %449 }
 0x187   : > { %2585 = vrsqrt.f32 %v527_v43  ;;  %2325 = vmatpush3.bf16.msra.mxu0 %v450_v44 }
 0x188   : > { %2330 = vmatprep.subr.bf16.mxu0 %v2850_v30 }
 0x189   : > { %v2580_v45 = vpop.eup %2579 }
 0x18a   : > { %v418_v46 = vmul.f32 %v2580_v45, %v402_v12 }
 0x18c   : > { %v424_v50 = vmul.f32 %v2221_v47, %v418_v46 }
 0x18d   : > { %v2582_v48 = vpop.eup %2581 }
 0x18e   : > { %v419_v49 = vmul.f32 %v2582_v48, %v403_v20  ;;  %v2584_v51 = vpop.eup %2583  ;;  %v430_v57 = vadd.f32 %v2222_v52, %v424_v50 }
 0x18f   : > { %v530_v55 = vmul.f32 %v2584_v51, %v514_v13 }
 0x190   : > { %v425_v53 = vmul.f32 %v2221_v47, %v419_v49 }
 0x191   : > { %v2586_v54 = vpop.eup %2585  ;;  %v536_v63 = vmul.f32 %v2226_v59, %v530_v55 }
 0x192   : > { %v531_v56 = vmul.f32 %v2586_v54, %v515_v21  ;;  %v431_v58 = vadd.f32 %v2222_v52, %v425_v53 }
 0x193   : > { %v542_v3 = vadd.f32 %v2227_v1, %v536_v63 }
 0x194   : > { %v537_v61 = vmul.f32 %v2226_v59, %v531_v56  ;;  %v432_v62 = vpack.c.bf16 %v431_v58, %v430_v57 }
 0x196   : > { %2327 = vmatmul.mubr.msk.bf16.vlgmr.msra.gmra.mrb[0].mxu0 %vm392_vm0, %v432_v62  ;;  %v543_v2 = vadd.f32 %v2227_v1, %v537_v61 }
 0x197   : > { %2331 = vmatpush3.bf16.msra.mxu0 %v2567_v60  ;;  %2334 = vmatprep.mubr.msk.bf16.mxu0 %vm2851_vm1, %v2850_v30 }
 0x198   : > { %2332 = vmatprep.subr.bf16.mxu0 %v2850_v30  ;;  %v544_v4 = vpack.c.bf16 %v543_v2, %v542_v3 }
 0x19b   : > { %2333 = vmatpush3.bf16.msra.mxu0 %v2568_v0 }
 0x19c   : > { %2338 = vmatprep.subr.bf16.mxu0 %v2850_v30 }
 0x19e   : > { %2335 = vmatmul.mubr.msk.bf16.vlgmr.msra.gmra.mrb[4].mxu0 %vm392_vm0, %v544_v4 }
 0x19f   : > { %2340 = vmatprep.mubr.msk.bf16.mxu0 %vm2851_vm1, %v2850_v30 }
 0x269   : > { %v490_v5 = vpop.f32.mrb[0].mxu0 }
 0x26a   : > { %v2328_v6 = vpop.f32.mrb[1].mxu0 }
 0x26b   : > { %v493_v7 = vpop.f32.mrb[2].mxu0 }
 0x26c   : > { %v497_v8 = vpack.c.bf16 %v493_v7, %v490_v5  ;;  %v2329_v9 = vpop.f32.mrb[3].mxu0 }
 0x26e   : > { %499 = vst.msk [vmem:[#allocation2] sm:$0xff] %vm498_vm2, %v497_v8 }
 0x271   : > { %v598_v10 = vpop.f32.mrb[4].mxu0 }
 0x272   : > { %v2336_v11 = vpop.f32.mrb[5].mxu0 }
 0x273   : > { %v601_v12 = vpop.f32.mrb[6].mxu0 }
 0x274   : > { %v605_v13 = vpack.c.bf16 %v601_v12, %v598_v10  ;;  %v2337_v14 = vpop.f32.mrb[7].mxu0 }
 0x275   : > { %v3100_v15 = vld [vmem:[#allocation2] sm:$0xff] }
 0x276   : > { %606 = vst.msk [vmem:[#allocation3] sm:$0xff] %vm392_vm0, %v605_v13  ;;  %893 = vrot.lane.b32.xlu0 %v3100_v15, %s2852_s19  ;;  %749 = vrot.lane.b32.xlu1 %v3100_v15, %s2853_s16  ;;  %v614_v16 = vsel %vm609_vm3, %v3100_v15, 0 }
 0x277   : > { %2339 = vmatpush3.bf16.xpose.msra.mxu0 %v614_v16 }
 0x278   : > { %2350 = vmatprep.subr.bf16.mxu0 %v2850_v30 }
 0x27a   : > { %1037 = vrot.lane.b32.xlu0 %v3100_v15, %s2854_s21 }
 0x27d   : > { %v743_v17 = vld [vmem:[#allocation3] sm:$0xff] }
 0x27e   : > { %1181 = vrot.lane.b32.xlu0 %v3100_v15, %s2855_s23  ;;  %746 = vrot.lane.b32.xlu1 %v743_v17, %s2853_s16  ;;  %s2866_s16 = smov 4  }
 0x27f   : > { %2341 = vmatmul.mubr.msk.bf16.vlgmr.msra.gmra.mrb[8].mxu0 %vm609_vm3, %v743_v17 }
 0x280   : > { %2352 = vmatprep.mubr.msk.bf16.mxu0 %vm2851_vm1, %v2850_v30 }
 0x282   : > { %1325 = vrot.lane.b32.xlu0 %v3100_v15, %s2856_s20  ;;  %890 = vrot.lane.b32.xlu1 %v743_v17, %s2852_s19  ;;  %s2865_s19 = smov 68  }
 0x286   : > { %1469 = vrot.lane.b32.xlu0 %v3100_v15, %s2857_s22  ;;  %1034 = vrot.lane.b32.xlu1 %v743_v17, %s2854_s21  ;;  %s2867_s21 = smov 8  }
 0x28a   : > { %1613 = vrot.lane.b32.xlu0 %v3100_v15, %s2858_s9  ;;  %1178 = vrot.lane.b32.xlu1 %v743_v17, %s2855_s23  ;;  %s2868_s23 = smov 12  }
 0x28e   : > { %688 = vrot.lane.b32.xlu0 %v3100_v15, %s2849_s11  ;;  %1322 = vrot.lane.b32.xlu1 %v743_v17, %s2856_s20  ;;  %s2862_s11 = smov 80   ;;  %s2869_s20 = smov 16  }
 0x292   : > { %971 = vrot.lane.b32.xlu0 %v3100_v15, %s2859_s26  ;;  %1466 = vrot.lane.b32.xlu1 %v743_v17, %s2857_s22  ;;  %s2870_s22 = smov 20   ;;  %s2872_s26 = smov 28  }
 0x296   : > { %1610 = vrot.lane.b32.xlu1 %v743_v17, %s2858_s9  ;;  %s2871_s9 = smov 24  }
 0x29a   : > { %827 = vrot.lane.b32.xlu1 %v3100_v15, %s2860_s12 }
 0x29e   : > { %1115 = vrot.lane.b32.xlu1 %v3100_v15, %s2861_s25 }
 0x2e8   : > { %v894_v18 = vpop.permute.xlu0 %893  ;;  %v750_v19 = vpop.permute.xlu1 %749 }
 0x2e9   : > { %v755_v20 = vsel %vm609_vm3, %v750_v19, 0  ;;  %v899_v24 = vsel %vm609_vm3, %v894_v18, 0 }
 0x2ea   : > { %2351 = vmatpush3.bf16.xpose.msra.mxu0 %v755_v20 }
 0x2eb   : > { %2362 = vmatprep.subr.bf16.mxu0 %v2850_v30 }
 0x2ec   : > { %v1038_v21 = vpop.permute.xlu0 %1037 }
 0x2ed   : > { %v1043_v28 = vsel %vm609_vm3, %v1038_v21, 0 }
 0x2f0   : > { %v1182_v22 = vpop.permute.xlu0 %1181  ;;  %v747_v23 = vpop.permute.xlu1 %746 }
 0x2f1   : > { %2353 = vmatmul.mubr.msk.bf16.vlgmr.msra.gmra.mrb[12].mxu0 %vm609_vm3, %v747_v23  ;;  %v1187_v33 = vsel %vm609_vm3, %v1182_v22, 0 }
 0x2f2   : > { %2363 = vmatpush3.bf16.xpose.msra.mxu0 %v899_v24  ;;  %2364 = vmatprep.mubr.msk.bf16.mxu0 %vm2851_vm1, %v2850_v30 }
 0x2f3   : > { %2374 = vmatprep.subr.bf16.mxu0 %v2850_v30 }
 0x2f4   : > { %v1326_v25 = vpop.permute.xlu0 %1325  ;;  %v891_v26 = vpop.permute.xlu1 %890 }
 0x2f5   : > { %v1331_v35 = vsel %vm609_vm3, %v1326_v25, 0 }
 0x2f8   : > { %v1470_v27 = vpop.permute.xlu0 %1469  ;;  %v1035_v31 = vpop.permute.xlu1 %1034 }
 0x2f9   : > { %2365 = vmatmul.mubr.msk.bf16.vlgmr.msra.gmra.mrb[16].mxu0 %vm609_vm3, %v891_v26  ;;  %v1475_v37 = vsel %vm609_vm3, %v1470_v27, 0 }
 0x2fa   : > { %2375 = vmatpush3.bf16.xpose.msra.mxu0 %v1043_v28  ;;  %2376 = vmatprep.mubr.msk.bf16.mxu0 %vm2851_vm1, %v2850_v30 }
 0x2fb   : > { %2386 = vmatprep.subr.bf16.mxu0 %v2850_v30 }
 0x2fc   : > { %v1614_v29 = vpop.permute.xlu0 %1613  ;;  %v1179_v34 = vpop.permute.xlu1 %1178 }
 0x2fd   : > { %v1619_v39 = vsel %vm609_vm3, %v1614_v29, 0 }
 0x300   : > { %v689_v32 = vpop.permute.xlu0 %688  ;;  %v1323_v36 = vpop.permute.xlu1 %1322 }
 0x301   : > { %2345 = vmatpush3.bf16.msra.mxu1 %v689_v32  ;;  %2377 = vmatmul.mubr.msk.bf16.vlgmr.msra.gmra.mrb[20].mxu0 %vm609_vm3, %v1035_v31 }
 0x302   : > { %2387 = vmatpush3.bf16.xpose.msra.mxu0 %v1187_v33  ;;  %2388 = vmatprep.mubr.msk.bf16.mxu0 %vm2851_vm1, %v2850_v30 }
 0x303   : > { %2398 = vmatprep.subr.bf16.mxu0 %v2850_v30  ;;  %2356 = vmatprep.subr.bf16.mxu1 %v2850_v30 }
 0x304   : > { %v1467_v38 = vpop.permute.xlu1 %1466  ;;  %v3185_v3 = vpop.permute.xlu0 %971 }
 0x308   : > { %v1611_v40 = vpop.permute.xlu1 %1610 }
 0x309   : > { %2389 = vmatmul.mubr.msk.bf16.vlgmr.msra.gmra.mrb[24].mxu0 %vm609_vm3, %v1179_v34 }
 0x30a   : > { %2399 = vmatpush3.bf16.xpose.msra.mxu0 %v1331_v35  ;;  %2400 = vmatprep.mubr.msk.bf16.mxu0 %vm2851_vm1, %v2850_v30 }
 0x30b   : > { %2410 = vmatprep.subr.bf16.mxu0 %v2850_v30 }
 0x30c   : > { %v828_v1 = vpop.permute.xlu1 %827 }
 0x310   : > { %v3191_v7 = vpop.permute.xlu1 %1115 }
 0x311   : > { %2401 = vmatmul.mubr.msk.bf16.vlgmr.msra.gmra.mrb[28].mxu0 %vm609_vm3, %v1323_v36 }
 0x312   : > { %2411 = vmatpush3.bf16.xpose.msra.mxu0 %v1475_v37  ;;  %2412 = vmatprep.mubr.msk.bf16.mxu0 %vm2851_vm1, %v2850_v30 }
 0x313   : > { %2422 = vmatprep.subr.bf16.mxu0 %v2850_v30 }
 0x319   : > { %2413 = vmatmul.mubr.msk.bf16.vlgmr.msra.gmra.mrb[32].mxu0 %vm609_vm3, %v1467_v38 }
 0x31a   : > { %2423 = vmatpush3.bf16.xpose.msra.mxu0 %v1619_v39  ;;  %2424 = vmatprep.mubr.msk.bf16.mxu0 %vm2851_vm1, %v2850_v30 }
 0x31b   : > { %2434 = vmatprep.subr.bf16.mxu0 %v2850_v30 }
 0x321   : > { %2425 = vmatmul.mubr.msk.bf16.vlgmr.msra.gmra.mrb[36].mxu0 %vm609_vm3, %v1611_v40 }
 0x322   : > { %2438 = vmatprep.mubr.msk.bf16.mxu0 %vm2851_vm1, %v2850_v30 }
 0x352   : > { %v650_v41 = vpop.f32.mrb[8].mxu0 }
 0x353   : > { %v2342_v42 = vpop.f32.mrb[9].mxu0  ;;  %v658_v43 = vsel %vm657_vm4, %v650_v41, -inf }
 0x354   : > { %659 = vmax.xlane.f32.xlu0 %v658_v43  ;;  %v653_v44 = vpop.f32.mrb[10].mxu0 }
 0x355   : > { %v2343_v45 = vpop.f32.mrb[11].mxu0  ;;  %v661_v46 = vsel %vm657_vm4, %v653_v44, -inf }
 0x356   : > { %662 = vmax.xlane.f32.xlu1 %v661_v46 }
 0x3c4   : > { %v3159_v47 = vpop.f32.mrb[12].mxu0 }
 0x3c5   : > { %v2354_v48 = vpop.f32.mrb[13].mxu0  ;;  %v798_v49 = vsel %vm657_vm4, %v3159_v47, -inf }
 0x3c6   : > { %799 = vmax.xlane.f32.xlu0 %v798_v49  ;;  %v3163_v50 = vpop.f32.mrb[14].mxu0 }
 0x3c7   : > { %v2355_v51 = vpop.f32.mrb[15].mxu0  ;;  %v801_v52 = vsel %vm657_vm4, %v3163_v50, -inf }
 0x3ca   : > { %802 = vmax.xlane.f32.xlu0 %v801_v52 }
 0x3cc   : > { %v3167_v53 = vpop.f32.mrb[16].mxu0 }
 0x3cd   : > { %v2366_v54 = vpop.f32.mrb[17].mxu0  ;;  %v942_v55 = vsel %vm657_vm4, %v3167_v53, -inf }
 0x3ce   : > { %943 = vmax.xlane.f32.xlu0 %v942_v55  ;;  %v3171_v56 = vpop.f32.mrb[18].mxu0 }
 0x3cf   : > { %v2367_v57 = vpop.f32.mrb[19].mxu0  ;;  %v945_v58 = vsel %vm657_vm4, %v3171_v56, -inf }
 0x3d0   : > { %946 = vmax.xlane.f32.xlu1 %v945_v58 }
 0x3d4   : > { %v3175_v59 = vpop.f32.mrb[20].mxu0 }
 0x3d5   : > { %v2378_v60 = vpop.f32.mrb[21].mxu0  ;;  %v1086_v61 = vsel %vm657_vm4, %v3175_v59, -inf }
 0x3d6   : > { %1087 = vmax.xlane.f32.xlu0 %v1086_v61  ;;  %v3179_v62 = vpop.f32.mrb[22].mxu0 }
 0x3d7   : > { %v2379_v63 = vpop.f32.mrb[23].mxu0  ;;  %v1089_v0 = vsel %vm657_vm4, %v3179_v62, -inf }
 0x3d8   : > { %1090 = vmax.xlane.f32.xlu1 %v1089_v0 }
 0x3dc   : > { %v3183_v2 = vpop.f32.mrb[24].mxu0 }
 0x3dd   : > { %v2390_v4 = vpop.f32.mrb[25].mxu0  ;;  %v1230_v5 = vsel %vm657_vm4, %v3183_v2, -inf }
 0x3de   : > { %1231 = vmax.xlane.f32.xlu1 %v1230_v5  ;;  %v3189_v6 = vpop.f32.mrb[26].mxu0 }
 0x3df   : > { %v2391_v8 = vpop.f32.mrb[27].mxu0  ;;  %v1233_v10 = vsel %vm657_vm4, %v3189_v6, -inf }
 0x3e1   : > { %v3193_v9 = vpop.xlane.xlu0 %659 }
 0x3e2   : > { %v670_v11 = vsub.f32 %v650_v41, %v3193_v9  ;;  %1234 = vmax.xlane.f32.xlu1 %v1233_v10 }
 0x3e3   : > { %v3198_v12 = vpop.xlane.xlu1 %662 }
 0x3e4   : > { %v672_v13 = vmul.f32 1.442695, %v670_v11  ;;  %v671_v14 = vsub.f32 %v653_v44, %v3198_v12  ;;  %v3201_v16 = vpop.f32.mrb[28].mxu0 }
 0x3e5   : > { %v2402_v17 = vpop.f32.mrb[29].mxu0  ;;  %v1374_v18 = vsel %vm657_vm4, %v3201_v16, -inf }
 0x3e6   : > { %v674_v19 = vmul.f32 1.442695, %v671_v14  ;;  %1375 = vmax.xlane.f32.xlu0 %v1374_v18  ;;  %v3205_v20 = vpop.f32.mrb[30].mxu0  ;;  %2587 = vpow2.f32 %v672_v13 }
 0x3e7   : > { %v2403_v21 = vpop.f32.mrb[31].mxu0  ;;  %v1377_v22 = vsel %vm657_vm4, %v3205_v20, -inf }
 0x3e8   : > { %1378 = vmax.xlane.f32.xlu1 %v1377_v22  ;;  %2589 = vpow2.f32 %v674_v19 }
 0x3ec   : > { %v3209_v23 = vpop.f32.mrb[32].mxu0 }
 0x3ed   : > { %v2414_v24 = vpop.f32.mrb[33].mxu0  ;;  %v1518_v25 = vsel %vm657_vm4, %v3209_v23, -inf }
 0x3ee   : > { %1519 = vmax.xlane.f32.xlu1 %v1518_v25  ;;  %v3213_v26 = vpop.f32.mrb[34].mxu0 }
 0x3ef   : > { %v2415_v27 = vpop.f32.mrb[35].mxu0  ;;  %v1521_v28 = vsel %vm657_vm4, %v3213_v26, -inf }
 0x3f0   : > { %v3217_v29 = vpop.eup %2587 }
 0x3f2   : > { %1522 = vmax.xlane.f32.xlu1 %v1521_v28  ;;  %v3219_v31 = vpop.eup %2589 }
 0x3f3   : > { %v686_v32 = vpack.c.bf16 %v3219_v31, %v3217_v29 }
 0x3f4   : > { %v3223_v33 = vpop.f32.mrb[36].mxu0 }
 0x3f5   : > { %v2426_v34 = vpop.f32.mrb[37].mxu0  ;;  %2347 = vmatmul.mubr.msk.bf16.vlgmr.msra.gmra.mrb[0].mxu1 %vm657_vm4, %v686_v32  ;;  %v1662_v38 = vsel %vm657_vm4, %v3223_v33, -inf }
 0x3f6   : > { %v3226_v35 = vpop.f32.mrb[38].mxu0  ;;  %2357 = vmatpush3.bf16.msra.mxu1 %v828_v1  ;;  %2358 = vmatprep.mubr.msk.bf16.mxu1 %vm2851_vm1, %v2850_v30 }
 0x3f7   : > { %v2427_v36 = vpop.f32.mrb[39].mxu0  ;;  %v1665_v37 = vsel %vm657_vm4, %v3226_v35, -inf  ;;  %2368 = vmatprep.subr.bf16.mxu1 %v2850_v30 }
 0x3f8   : > { %1666 = vmax.xlane.f32.xlu1 %v1665_v37 }
 0x3fc   : > { %1259 = vrot.lane.b32.xlu0 %v3100_v15, %s2862_s11  ;;  %s2873_s11 = smov [#allocation10]  }
 0x409   : > { %1403 = vrot.lane.b32.xlu1 %v3100_v15, %s2863_s24  ;;  %s2761_s24 = sshll.u32 %s2873_s11, 4  ;;  %s2762_s24 = int_to_ptr.vmem [resolvable:$false] %s2761_s24 }
 0x41b   : > { %1663 = vmax.xlane.f32.xlu0 %v1662_v38 }
 0x431   : > { %1547 = vrot.lane.b32.xlu0 %v3100_v15, %s2864_s14  ;;  %s364_s14 = sand.u32 1, %s2827_s28  }
 0x435   : > { %1691 = vrot.lane.b32.xlu0 %v3100_v15, %s2865_s19  ;;  %s2216_s19 = sshll.u32 %s364_s14, 4 }
 0x453   : > { %v3239_v39 = vpop.xlane.xlu0 %799 }
 0x454   : > { %v810_v40 = vsub.f32 %v3159_v47, %v3239_v39 }
 0x456   : > { %v812_v41 = vmul.f32 1.442695, %v810_v40 }
 0x457   : > { %v3243_v42 = vpop.xlane.xlu0 %802 }
 0x458   : > { %v811_v43 = vsub.f32 %v3163_v50, %v3243_v42  ;;  %2591 = vpow2.f32 %v812_v41 }
 0x45a   : > { %v814_v44 = vmul.f32 1.442695, %v811_v43 }
 0x45b   : > { %v3247_v45 = vpop.xlane.xlu0 %943 }
 0x45c   : > { %v954_v46 = vsub.f32 %v3167_v53, %v3247_v45  ;;  %2593 = vpow2.f32 %v814_v44 }
 0x45d   : > { %v3251_v15 = vpop.xlane.xlu1 %946 }
 0x45e   : > { %v956_v48 = vmul.f32 1.442695, %v954_v46  ;;  %v955_v47 = vsub.f32 %v3171_v56, %v3251_v15 }
 0x460   : > { %v958_v49 = vmul.f32 1.442695, %v955_v47  ;;  %2595 = vpow2.f32 %v956_v48 }
 0x462   : > { %v2592_v51 = vpop.eup %2591  ;;  %2597 = vpow2.f32 %v958_v49 }
 0x463   : > { %v3255_v52 = vpop.xlane.xlu0 %1087  ;;  %v818_v54 = vsel %vm657_vm4, %v2592_v51, 0.0 }
 0x464   : > { %v1098_v50 = vsub.f32 %v3175_v59, %v3255_v52  ;;  %819 = vadd.xlane.f32.xlu0 %v818_v54 }
 0x465   : > { %v3260_v53 = vpop.xlane.xlu1 %1090 }
 0x466   : > { %v1100_v55 = vmul.f32 1.442695, %v1098_v50  ;;  %v1099_v57 = vsub.f32 %v3179_v62, %v3260_v53  ;;  %v2594_v58 = vpop.eup %2593 }
 0x467   : > { %v821_v60 = vsel %vm657_vm4, %v2594_v58, 0.0  ;;  %v826_v61 = vpack.c.bf16 %v2594_v58, %v2592_v51 }
 0x468   : > { %v1102_v56 = vmul.f32 1.442695, %v1099_v57  ;;  %2599 = vpow2.f32 %v1100_v55  ;;  %822 = vadd.xlane.f32.xlu1 %v821_v60  ;;  %v681_v60 = vsel %vm657_vm4, %v3219_v31, 0.0 }
 0x469   : > { %2359 = vmatmul.mubr.msk.bf16.vlgmr.msra.gmra.mrb[4].mxu1 %vm657_vm4, %v826_v61 }
 0x46a   : > { %v2596_v63 = vpop.eup %2595  ;;  %2601 = vpow2.f32 %v1102_v56  ;;  %2369 = vmatpush3.bf16.msra.mxu1 %v3185_v3  ;;  %2370 = vmatprep.mubr.msk.bf16.mxu1 %vm2851_vm1, %v2850_v30 }
 0x46b   : > { %v3266_v59 = vpop.xlane.xlu1 %1231  ;;  %v962_v62 = vsel %vm657_vm4, %v2596_v63, 0.0  ;;  %2380 = vmatprep.subr.bf16.mxu1 %v2850_v30 }
 0x46c   : > { %v1242_v0 = vsub.f32 %v3183_v2, %v3266_v59  ;;  %v2598_v1 = vpop.eup %2597  ;;  %963 = vadd.xlane.f32.xlu0 %v962_v62 }
 0x46d   : > { %v970_v5 = vpack.c.bf16 %v2598_v1, %v2596_v63  ;;  %v965_v3 = vsel %vm657_vm4, %v2598_v1, 0.0 }
 0x46e   : > { %v1244_v4 = vmul.f32 1.442695, %v1242_v0 }
 0x46f   : > { %v3275_v8 = vpop.xlane.xlu1 %1234 }
 0x470   : > { %v1243_v10 = vsub.f32 %v3189_v6, %v3275_v8  ;;  %2603 = vpow2.f32 %v1244_v4  ;;  %966 = vadd.xlane.f32.xlu0 %v965_v3 }
 0x471   : > { %2371 = vmatmul.mubr.msk.bf16.vlgmr.msra.gmra.mrb[8].mxu1 %vm657_vm4, %v970_v5 }
 0x472   : > { %v1246_v2 = vmul.f32 1.442695, %v1243_v10  ;;  %v2600_v11 = vpop.eup %2599  ;;  %2381 = vmatpush3.bf16.msra.mxu1 %v3191_v7  ;;  %2382 = vmatprep.mubr.msk.bf16.mxu1 %vm2851_vm1, %v2850_v30 }
 0x473   : > { %v3281_v13 = vpop.xlane.xlu0 %1375  ;;  %v1106_v17 = vsel %vm657_vm4, %v2600_v11, 0.0  ;;  %2392 = vmatprep.subr.bf16.mxu1 %v2850_v30 }
 0x474   : > { %v1386_v14 = vsub.f32 %v3201_v16, %v3281_v13  ;;  %v2602_v6 = vpop.eup %2601  ;;  %2605 = vpow2.f32 %v1246_v2  ;;  %1107 = vadd.xlane.f32.xlu0 %v1106_v17  ;;  %v805_v17 = vsub.f32 -inf, %v3243_v42 }
 0x475   : > { %v3289_v18 = vpop.xlane.xlu1 %1378  ;;  %v1109_v7 = vsel %vm657_vm4, %v2602_v6, 0.0  ;;  %v1114_v22 = vpack.c.bf16 %v2602_v6, %v2600_v11 }
 0x476   : > { %v1388_v19 = vmul.f32 1.442695, %v1386_v14  ;;  %v1387_v21 = vsub.f32 %v3205_v20, %v3289_v18  ;;  %1110 = vadd.xlane.f32.xlu1 %v1109_v7  ;;  %v804_v14 = vsub.f32 -inf, %v3239_v39  ;;  %v949_v7 = vsub.f32 -inf, %v3251_v15 }
 0x477   : > { %v1260_v24 = vpop.permute.xlu0 %1259  ;;  %v1093_v39 = vsub.f32 -inf, %v3260_v53 }
 0x478   : > { %v1390_v16 = vmul.f32 1.442695, %v1387_v21  ;;  %2607 = vpow2.f32 %v1388_v19  ;;  %v806_v6 = vmul.f32 1.442695, %v804_v14  ;;  %v808_v19 = vmul.f32 1.442695, %v805_v17 }
 0x479   : > { %2383 = vmatmul.mubr.msk.bf16.vlgmr.msra.gmra.mrb[12].mxu1 %vm657_vm4, %v1114_v22  ;;  %v948_v21 = vsub.f32 -inf, %v3247_v45  ;;  %v1096_v15 = vmul.f32 1.442695, %v1093_v39 }
 0x47a   : > { %v2604_v25 = vpop.eup %2603  ;;  %2609 = vpow2.f32 %v1390_v16  ;;  %2393 = vmatpush3.bf16.msra.mxu1 %v1260_v24  ;;  %2394 = vmatprep.mubr.msk.bf16.mxu1 %vm2851_vm1, %v2850_v30  ;;  %v952_v16 = vmul.f32 1.442695, %v949_v7 }
 0x47b   : > { %v3296_v27 = vpop.xlane.xlu1 %1519  ;;  %v1250_v32 = vsel %vm657_vm4, %v2604_v25, 0.0  ;;  %2404 = vmatprep.subr.bf16.mxu1 %v2850_v30  ;;  %v950_v22 = vmul.f32 1.442695, %v948_v21 }
 0x47c   : > { %v1530_v28 = vsub.f32 %v3209_v23, %v3296_v27  ;;  %1251 = vadd.xlane.f32.xlu0 %v1250_v32 }
 0x47e   : > { %v1532_v20 = vmul.f32 1.442695, %v1530_v28  ;;  %v2606_v34 = vpop.eup %2605 }
 0x47f   : > { %v3304_v36 = vpop.xlane.xlu1 %1522  ;;  %v1253_v38 = vsel %vm657_vm4, %v2606_v34, 0.0  ;;  %v1258_v23 = vpack.c.bf16 %v2606_v34, %v2604_v25  ;;  %v1092_v25 = vsub.f32 -inf, %v3255_v52  ;;  %v664_v52 = vsub.f32 -inf, %v3193_v9 }
 0x480   : > { %v1531_v37 = vsub.f32 %v3213_v26, %v3304_v36  ;;  %2611 = vpow2.f32 %v1532_v20  ;;  %1254 = vadd.xlane.f32.xlu1 %v1253_v38  ;;  %v665_v38 = vsub.f32 -inf, %v3198_v12 }
 0x481   : > { %2395 = vmatmul.mubr.msk.bf16.vlgmr.msra.gmra.mrb[16].mxu1 %vm657_vm4, %v1258_v23  ;;  %v1094_v20 = vmul.f32 1.442695, %v1092_v25  ;;  %v1236_v23 = vsub.f32 -inf, %v3266_v59  ;;  %v666_v59 = vmul.f32 1.442695, %v664_v52 }
 0x482   : > { %v1534_v40 = vmul.f32 1.442695, %v1531_v37  ;;  %v2608_v41 = vpop.eup %2607  ;;  %2406 = vmatprep.mubr.msk.bf16.mxu1 %vm2851_vm1, %v2850_v30  ;;  %v668_v53 = vmul.f32 1.442695, %v665_v38 }
 0x483   : > { %v1394_v43 = vsel %vm657_vm4, %v2608_v41, 0.0 }
 0x484   : > { %v2610_v44 = vpop.eup %2609  ;;  %2613 = vpow2.f32 %v1534_v40  ;;  %1395 = vadd.xlane.f32.xlu0 %v1394_v43 }
 0x485   : > { %v3313_v46 = vpop.xlane.xlu1 %1666  ;;  %v1397_v48 = vsel %vm657_vm4, %v2610_v44, 0.0  ;;  %v1402_v47 = vpack.c.bf16 %v2610_v44, %v2608_v41 }
 0x486   : > { %v1675_v26 = vsub.f32 %v3226_v35, %v3313_v46  ;;  %1398 = vadd.xlane.f32.xlu1 %v1397_v48  ;;  %v1237_v48 = vsub.f32 -inf, %v3275_v8 }
 0x488   : > { %v1678_v49 = vmul.f32 1.442695, %v1675_v26 }
 0x489   : > { %v1404_v51 = vpop.permute.xlu1 %1403 }
 0x48a   : > { %2405 = vmatpush3.bf16.msra.mxu1 %v1404_v51  ;;  %v2612_v50 = vpop.eup %2611  ;;  %2615 = vpow2.f32 %v1678_v49 }
 0x48b   : > { %2416 = vmatprep.subr.bf16.mxu1 %v2850_v30  ;;  %v1538_v54 = vsel %vm657_vm4, %v2612_v50, 0.0 }
 0x48c   : > { %1539 = vadd.xlane.f32.xlu0 %v1538_v54  ;;  %v1240_v54 = vmul.f32 1.442695, %v1237_v48 }
 0x48d   : > { %2407 = vmatmul.mubr.msk.bf16.vlgmr.msra.gmra.mrb[20].mxu1 %vm657_vm4, %v1402_v47  ;;  %v1238_v47 = vmul.f32 1.442695, %v1236_v23 }
 0x48e   : > { %2418 = vmatprep.mubr.msk.bf16.mxu1 %vm2851_vm1, %v2850_v30  ;;  %v2614_v35 = vpop.eup %2613 }
 0x48f   : > { %v1541_v55 = vsel %vm657_vm4, %v2614_v35, 0.0  ;;  %v1546_v57 = vpack.c.bf16 %v2614_v35, %v2612_v50 }
 0x490   : > { %1542 = vadd.xlane.f32.xlu1 %v1541_v55 }
 0x494   : > { %v2616_v58 = vpop.eup %2615 }
 0x495   : > { %v1685_v56 = vsel %vm657_vm4, %v2616_v58, 0.0 }
 0x496   : > { %1686 = vadd.xlane.f32.xlu1 %v1685_v56  ;;  %v1380_v56 = vsub.f32 -inf, %v3281_v13 }
 0x49a   : > { %682 = vadd.xlane.f32.xlu1 %v681_v60 }
 0x4a8   : > { %v3327_v61 = vpop.xlane.xlu0 %1663 }
 0x4a9   : > { %v1674_v63 = vsub.f32 %v3223_v33, %v3327_v61  ;;  %v678_v33 = vsel %vm657_vm4, %v3217_v29, 0.0 }
 0x4ab   : > { %v1676_v0 = vmul.f32 1.442695, %v1674_v63 }
 0x4ac   : > { %v1548_v62 = vpop.permute.xlu0 %1547 }
 0x4ad   : > { %2417 = vmatpush3.bf16.msra.mxu1 %v1548_v62  ;;  %2617 = vpow2.f32 %v1676_v0  ;;  %v1381_v62 = vsub.f32 -inf, %v3289_v18 }
 0x4ae   : > { %2428 = vmatprep.subr.bf16.mxu1 %v2850_v30  ;;  %2619 = vpow2.f32 %v806_v6 }
 0x4af   : > { %2621 = vpow2.f32 %v808_v19 }
 0x4b0   : > { %v1692_v1 = vpop.permute.xlu0 %1691  ;;  %2419 = vmatmul.mubr.msk.bf16.vlgmr.msra.gmra.mrb[24].mxu1 %vm657_vm4, %v1546_v57  ;;  %2623 = vpow2.f32 %v950_v22 }
 0x4b1   : > { %2429 = vmatpush3.bf16.msra.mxu1 %v1692_v1  ;;  %2430 = vmatprep.mubr.msk.bf16.mxu1 %vm2851_vm1, %v2850_v30  ;;  %2625 = vpow2.f32 %v952_v16 }
 0x4b2   : > { %2442 = vmatprep.subr.bf16.mxu1 %v2850_v30  ;;  %2627 = vpow2.f32 %v1094_v20 }
 0x4b3   : > { %2629 = vpow2.f32 %v1096_v15 }
 0x4b7   : > { %v2618_v31 = vpop.eup %2617 }
 0x4b8   : > { %v1682_v4 = vsel %vm657_vm4, %v2618_v31, 0.0  ;;  %v1690_v5 = vpack.c.bf16 %v2616_v58, %v2618_v31  ;;  %v2620_v32 = vpop.eup %2619 }
 0x4b9   : > { %1683 = vadd.xlane.f32.xlu0 %v1682_v4  ;;  %v2622_v42 = vpop.eup %2621  ;;  %v816_v37 = vmul.f32 0.0, %v2620_v32 }
 0x4ba   : > { %2431 = vmatmul.mubr.msk.bf16.vlgmr.msra.gmra.mrb[28].mxu1 %vm657_vm4, %v1690_v5  ;;  %v817_v41 = vmul.f32 0.0, %v2622_v42  ;;  %v2624_v26 = vpop.eup %2623 }
 0x4bb   : > { %2458 = vmatprep.mubr.msk.bf16.mxu1 %vm2851_vm1, %v2850_v30  ;;  %v2626_v12 = vpop.eup %2625  ;;  %v960_v50 = vmul.f32 0.0, %v2624_v26 }
 0x4bc   : > { %v961_v9 = vmul.f32 0.0, %v2626_v12  ;;  %v2628_v8 = vpop.eup %2627 }
 0x4bd   : > { %679 = vadd.xlane.f32.xlu0 %v678_v33  ;;  %v2630_v0 = vpop.eup %2629  ;;  %v1104_v33 = vmul.f32 0.0, %v2628_v8 }
 0x4be   : > { %v1105_v21 = vmul.f32 0.0, %v2630_v0 }
 0x4c8   : > { %v3342_v10 = vpop.f32.mrb[0].mxu1 }
 0x4c9   : > { %v2348_v3 = vpop.f32.mrb[1].mxu1 }
 0x4ca   : > { %v3344_v2 = vpop.f32.mrb[2].mxu1 }
 0x4cb   : > { %v2349_v11 = vpop.f32.mrb[3].mxu1 }
 0x4cc   : > { %v1382_v11 = vmul.f32 1.442695, %v1380_v56 }
 0x4f1   : > { %v820_v29 = vpop.xlane.xlu0 %819 }
 0x4f2   : > { %v824_v40 = vadd.f32 %v820_v29, %v816_v37  ;;  %v1384_v29 = vmul.f32 1.442695, %v1381_v62 }
 0x4f4   : > { %2631 = vrcp.f32 %v824_v40 }
 0x4f5   : > { %v823_v28 = vpop.xlane.xlu1 %822 }
 0x4f6   : > { %v825_v44 = vadd.f32 %v823_v28, %v817_v41 }
 0x4f8   : > { %2633 = vrcp.f32 %v825_v44 }
 0x4f9   : > { %v964_v24 = vpop.xlane.xlu0 %963  ;;  %2635 = vpow2.f32 %v668_v53 }
 0x4fa   : > { %2637 = vpow2.f32 %v1238_v47  ;;  %v968_v35 = vadd.f32 %v964_v24, %v960_v50 }
 0x4fb   : > { %2639 = vpow2.f32 %v666_v59 }
 0x4fc   : > { %2641 = vpow2.f32 %v1240_v54 }
 0x4fd   : > { %v967_v45 = vpop.xlane.xlu0 %966  ;;  %2643 = vrcp.f32 %v968_v35 }
 0x4fe   : > { %v969_v58 = vadd.f32 %v967_v45, %v961_v9  ;;  %v2632_v5 = vpop.eup %2631 }
 0x500   : > { %2645 = vrcp.f32 %v969_v58 }
 0x501   : > { %v1108_v49 = vpop.xlane.xlu0 %1107  ;;  %2647 = vpow2.f32 %v1382_v11 }
 0x502   : > { %v2634_v13 = vpop.eup %2633  ;;  %v1112_v19 = vadd.f32 %v1108_v49, %v1104_v33 }
 0x503   : > { %v1111_v34 = vpop.xlane.xlu1 %1110  ;;  %v2636_v7 = vpop.eup %2635 }
 0x504   : > { %v2638_v16 = vpop.eup %2637  ;;  %v1113_v24 = vadd.f32 %v1111_v34, %v1105_v21  ;;  %v677_v39 = vmul.f32 0.0, %v2636_v7  ;;  %2649 = vrcp.f32 %v1112_v19 }
 0x505   : > { %v2640_v32 = vpop.eup %2639  ;;  %2651 = vpow2.f32 %v1384_v29 }
 0x506   : > { %v2642_v20 = vpop.eup %2641  ;;  %2653 = vrcp.f32 %v1113_v24  ;;  %v676_v48 = vmul.f32 0.0, %v2640_v32  ;;  %v736_v7 = vadd.f32 %v3344_v2, %v677_v39 }
 0x507   : > { %v2644_v23 = vpop.eup %2643  ;;  %v1249_v47 = vmul.f32 0.0, %v2642_v20 }
 0x508   : > { %v735_v19 = vadd.f32 %v3342_v10, %v676_v48  ;;  %v1524_v10 = vsub.f32 -inf, %v3296_v27  ;;  %v1668_v27 = vsub.f32 -inf, %v3327_v61 }
 0x509   : > { %v1252_v55 = vpop.xlane.xlu0 %1251 }
 0x50a   : > { %v2646_v53 = vpop.eup %2645 }
 0x50b   : > { %v2648_v58 = vpop.eup %2647 }
 0x50d   : > { %v3354_v43 = vpop.xlane.xlu1 %1254 }
 0x50e   : > { %v1257_v59 = vadd.f32 %v3354_v43, %v1249_v47 }
 0x511   : > { %v3363_v60 = vpop.xlane.xlu0 %1395 }
 0x513   : > { %v3358_v51 = vpop.xlane.xlu1 %1398 }
 0x519   : > { %v3368_v22 = vpop.xlane.xlu0 %1539 }
 0x51d   : > { %v3360_v57 = vpop.xlane.xlu1 %1542 }
 0x523   : > { %v3366_v1 = vpop.xlane.xlu1 %1686 }
 0x527   : > { %v683_v25 = vpop.xlane.xlu1 %682 }
 0x528   : > { %v685_v40 = vadd.f32 %v683_v25, %v677_v39 }
 0x52a   : > { %2655 = vrcp.f32 %v685_v40 }
 0x53c   : > { %v867_v63 = vpop.f32.mrb[4].mxu1 }
 0x53d   : > { %v874_v31 = vadd.f32 %v867_v63, %v816_v37  ;;  %v2360_v4 = vpop.f32.mrb[5].mxu1  ;;  %v1248_v37 = vmul.f32 0.0, %v2638_v16 }
 0x53e   : > { %v870_v3 = vpop.f32.mrb[6].mxu1  ;;  %v1392_v4 = vmul.f32 0.0, %v2648_v58 }
 0x53f   : > { %v878_v14 = vmul.f32 %v2632_v5, %v874_v31  ;;  %v875_v17 = vadd.f32 %v870_v3, %v817_v41  ;;  %v2361_v6 = vpop.f32.mrb[7].mxu1  ;;  %v1256_v41 = vadd.f32 %v1252_v55, %v1248_v37 }
 0x540   : > { %v1400_v3 = vadd.f32 %v3363_v60, %v1392_v4 }
 0x541   : > { %v879_v18 = vmul.f32 %v2634_v13, %v875_v17  ;;  %2657 = vrcp.f32 %v1256_v41 }
 0x543   : > { %v880_v28 = vpack.c.bf16 %v879_v18, %v878_v14 }
 0x544   : > { %v1011_v42 = vpop.f32.mrb[8].mxu1 }
 0x545   : > { %v1018_v45 = vadd.f32 %v1011_v42, %v960_v50  ;;  %v2372_v38 = vpop.f32.mrb[9].mxu1  ;;  %882 = vrot.lane.b32.xlu0 %v880_v28, %s2866_s16 }
 0x546   : > { %v3370_v15 = vpop.xlane.xlu0 %1683  ;;  %v1014_v34 = vpop.f32.mrb[10].mxu1 }
 0x547   : > { %v1022_v52 = vmul.f32 %v2644_v23, %v1018_v45  ;;  %v1019_v44 = vadd.f32 %v1014_v34, %v961_v9  ;;  %v2373_v26 = vpop.f32.mrb[11].mxu1  ;;  %v2650_v9 = vpop.eup %2649  ;;  %v1525_v23 = vsub.f32 -inf, %v3304_v36 }
 0x548   : > { %v2652_v63 = vpop.eup %2651  ;;  %v1526_v26 = vmul.f32 1.442695, %v1524_v10  ;;  %v2699_v10 = vld [vmem:[%s3058_s13 + $0x8] sm:$0xff] }
 0x549   : > { %v1023_v49 = vmul.f32 %v2646_v53, %v1019_v44  ;;  %v2654_v43 = vpop.eup %2653  ;;  %v1393_v11 = vmul.f32 0.0, %v2652_v63 }
 0x54a   : > { %v680_v12 = vpop.xlane.xlu0 %679  ;;  %v2656_v17 = vpop.eup %2655 }
 0x54b   : > { %v684_v50 = vadd.f32 %v680_v12, %v676_v48  ;;  %v1024_v54 = vpack.c.bf16 %v1023_v49, %v1022_v52  ;;  %v2658_v13 = vpop.eup %2657  ;;  %v740_v24 = vmul.f32 %v2656_v17, %v736_v7  ;;  %v1528_v48 = vmul.f32 1.442695, %v1525_v23 }
 0x54c   : > { %v1155_v35 = vpop.f32.mrb[12].mxu1  ;;  %v1669_v49 = vsub.f32 -inf, %v3313_v46  ;;  %v1670_v12 = vmul.f32 1.442695, %v1668_v27 }
 0x54d   : > { %2659 = vrcp.f32 %v684_v50  ;;  %v1162_v8 = vadd.f32 %v1155_v35, %v1104_v33  ;;  %v2384_v56 = vpop.f32.mrb[13].mxu1  ;;  %1026 = vrot.lane.b32.xlu1 %v1024_v54, %s2867_s21  ;;  %v1401_v33 = vadd.f32 %v3358_v51, %v1393_v11 }
 0x54e   : > { %2661 = vrcp.f32 %v1257_v59  ;;  %v1158_v55 = vpop.f32.mrb[14].mxu1  ;;  %v1672_v59 = vmul.f32 1.442695, %v1669_v49 }
 0x54f   : > { %v1166_v0 = vmul.f32 %v2650_v9, %v1162_v8  ;;  %v1163_v62 = vadd.f32 %v1158_v55, %v1105_v21  ;;  %v2385_v31 = vpop.f32.mrb[15].mxu1  ;;  %2663 = vrcp.f32 %v1400_v3 }
 0x550   : > { %2665 = vrcp.f32 %v1401_v33 }
 0x551   : > { %v1167_v5 = vmul.f32 %v2654_v43, %v1163_v62  ;;  %2667 = vpow2.f32 %v1526_v26 }
 0x552   : > { %2669 = vpow2.f32 %v1528_v48 }
 0x553   : > { %v1168_v14 = vpack.c.bf16 %v1167_v5, %v1166_v0  ;;  %2671 = vpow2.f32 %v1670_v12 }
 0x554   : > { %v1299_v6 = vpop.f32.mrb[16].mxu1  ;;  %2673 = vpow2.f32 %v1672_v59 }
 0x555   : > { %v1306_v29 = vadd.f32 %v1299_v6, %v1248_v37  ;;  %v2396_v18 = vpop.f32.mrb[17].mxu1  ;;  %1170 = vrot.lane.b32.xlu1 %v1168_v14, %s2868_s23 }
 0x556   : > { %v1302_v16 = vpop.f32.mrb[18].mxu1 }
 0x557   : > { %v2660_v21 = vpop.eup %2659  ;;  %v1310_v25 = vmul.f32 %v2658_v13, %v1306_v29  ;;  %v1307_v28 = vadd.f32 %v1302_v16, %v1249_v47  ;;  %v2397_v32 = vpop.f32.mrb[19].mxu1 }
 0x558   : > { %v739_v60 = vmul.f32 %v2660_v21, %v735_v19  ;;  %v2662_v42 = vpop.eup %2661 }
 0x559   : > { %v1311_v51 = vmul.f32 %v2662_v42, %v1307_v28  ;;  %v2664_v38 = vpop.eup %2663 }
 0x55a   : > { %v741_v20 = vpack.c.bf16 %v740_v24, %v739_v60  ;;  %v2666_v44 = vpop.eup %2665 }
 0x55b   : > { %v1312_v45 = vpack.c.bf16 %v1311_v51, %v1310_v25  ;;  %v2668_v36 = vpop.eup %2667 }
 0x55c   : > { %742 = vst.msk [vmem:[#allocation4] sm:$0xff] %vm609_vm3, %v741_v20  ;;  %v2670_v50 = vpop.eup %2669  ;;  %v1536_v54 = vmul.f32 0.0, %v2668_v36 }
 0x55d   : > { %1314 = vrot.lane.b32.xlu1 %v1312_v45, %s2869_s20  ;;  %v1537_v58 = vmul.f32 0.0, %v2670_v50  ;;  %v2672_v56 = vpop.eup %2671  ;;  %s2271_s20 = sshll.u32 %s2835_s30, 8  ;;  %s3457_s30 = scalar_lea.sflag [#allocation7], %s364_s14 }
 0x55e   : > { %v1544_v35 = vadd.f32 %v3368_v22, %v1536_v54  ;;  %v2674_v9 = vpop.eup %2673  ;;  %v1680_v55 = vmul.f32 0.0, %v2672_v56  ;;  %v2248_v56 = vld [vmem:[#allocation5 + $0x5] ss:$0 sm:$0xff]  ;;  %s3450_s12 = scalar_lea.hbm %s3512_s8, %s2271_s20 }
 0x55f   : > { %v1545_v8 = vadd.f32 %v3360_v57, %v1537_v58  ;;  %v1681_v61 = vmul.f32 0.0, %v2674_v9 }
 0x560   : > { %v1443_v2 = vpop.f32.mrb[20].mxu1  ;;  %2675 = vrcp.f32 %v1544_v35  ;;  %v1688_v46 = vadd.f32 %v3370_v15, %v1680_v55 }
 0x561   : > { %v1450_v39 = vadd.f32 %v1443_v2, %v1392_v4  ;;  %v2408_v37 = vpop.f32.mrb[21].mxu1  ;;  %2677 = vrcp.f32 %v1545_v8  ;;  %v1689_v0 = vadd.f32 %v3366_v1, %v1681_v61 }
 0x562   : > { %v1446_v40 = vpop.f32.mrb[22].mxu1  ;;  %2679 = vrcp.f32 %v1688_v46 }
 0x563   : > { %v1454_v34 = vmul.f32 %v2664_v38, %v1450_v39  ;;  %v1451_v41 = vadd.f32 %v1446_v40, %v1393_v11  ;;  %v2409_v52 = vpop.f32.mrb[23].mxu1  ;;  %2681 = vrcp.f32 %v1689_v0  ;;  %v2700_v39 = vld [vmem:[%s3058_s13] sm:$0xff] }
 0x565   : > { %v1455_v53 = vmul.f32 %v2666_v44, %v1451_v41 }
 0x567   : > { %v1456_v47 = vpack.c.bf16 %v1455_v53, %v1454_v34 }
 0x569   : > { %1458 = vrot.lane.b32.xlu0 %v1456_v47, %s2870_s22  ;;  %s366_s22 = scalar_lea.vmem [#allocation10], %s2216_s19  ;;  %s2763_s19 = scalar_lea.vmem %s2762_s24, 512 }
 0x56a   : > { %v2676_v43 = vpop.eup %2675 }
 0x56b   : > { %v2678_v57 = vpop.eup %2677 }
 0x56c   : > { %v2680_v6 = vpop.eup %2679 }
 0x56d   : > { %v2682_v29 = vpop.eup %2681 }
 0x583   : > { %v1587_v63 = vpop.f32.mrb[24].mxu1 }
 0x584   : > { %v1594_v62 = vadd.f32 %v1587_v63, %v1536_v54  ;;  %v2420_v31 = vpop.f32.mrb[25].mxu1 }
 0x585   : > { %v1590_v4 = vpop.f32.mrb[26].mxu1 }
 0x586   : > { %v1598_v22 = vmul.f32 %v2676_v43, %v1594_v62  ;;  %v1595_v5 = vadd.f32 %v1590_v4, %v1537_v58  ;;  %v2421_v3 = vpop.f32.mrb[27].mxu1  ;;  %v2247_v58 = vld [vmem:[#allocation5 + $0x4] ss:$0 sm:$0xff] }
 0x588   : > { %v1599_v11 = vmul.f32 %v2678_v57, %v1595_v5 }
 0x58a   : > { %v1600_v14 = vpack.c.bf16 %v1599_v11, %v1598_v22 }
 0x58c   : > { %1602 = vrot.lane.b32.xlu1 %v1600_v14, %s2871_s9  ;;  %s2091_s9 = sshll.u32 %s366_s22, 4  ;;  %s3454_s9 = int_to_ptr.vmem [resolvable:$true] %s2091_s9 }
 0x58d   : > { %v1731_v17 = vpop.f32.mrb[28].mxu1  ;;  %s2757_s25 = scalar_lea.vmem %s3454_s9, 256  ;;  %p2764_p2 = scmp.lt.s32.totalorder %s3454_s9, %s2762_s24 }
 0x58e   : > { %v1738_v33 = vadd.f32 %v1731_v17, %v1680_v55  ;;  %v2432_v15 = vpop.f32.mrb[29].mxu1  ;;  %p2758_p13 = scmp.ne.s32.totalorder %s3454_s9, %s2757_s25  ;;  %p2765_p3 = scmp.lt.s32.totalorder %s2763_s19, %s2757_s25 }
 0x58f   : > { %v1734_v13 = vpop.f32.mrb[30].mxu1  ;;  %v2569_v15 = vld [vmem:[#allocation8] sm:$0xff]  }
 0x590   : > { %v1742_v1 = vmul.f32 %v2680_v6, %v1738_v33  ;;  %v1739_v19 = vadd.f32 %v1734_v13, %v1681_v61  ;;  %v2433_v7 = vpop.f32.mrb[31].mxu1  ;;  %2435 = vmatpush3.bf16.msra.mxu0 %v2569_v15  ;;  %v2570_v6 = vld [vmem:[#allocation8 + $0x8] sm:$0xff]   ;;  %p2759_p10 = pnand %p2758_p13, %p3528_p8  ;;  %p2766_p5 = por %p2765_p3, %p2764_p2 }
 0x591   : > { %2436 = vmatprep.subr.bf16.mxu0 %v2850_v30 }
 0x592   : > { %v1743_v18 = vmul.f32 %v2682_v29, %v1739_v19  ;;  %p2760_p11 = pneg %p2759_p10 }
 0x594   : > { %v1744_v21 = vpack.c.bf16 %v1743_v18, %v1742_v1  ;;  %2437 = vmatpush3.bf16.msra.mxu0 %v2570_v6  ;;  %p2767_p6 = pnand %p2766_p5, %p2760_p11 }
 0x596   : > { %1746 = vrot.lane.b32.xlu0 %v1744_v21, %s2872_s26 }
 0x5b7   : > { %v883_v16 = vpop.permute.xlu0 %882 }
 0x5b8   : > { %886 = vst.msk [vmem:[#allocation4] sm:$0xff] %vm885_vm5, %v883_v16 }
 0x5bf   : > { %v1027_v24 = vpop.permute.xlu1 %1026 }
 0x5c0   : > { %1030 = vst.msk [vmem:[#allocation4] sm:$0xff] %vm1029_vm6, %v1027_v24  ;;  %v2249_v24 = vld [vmem:[#allocation5 + $0x6] ss:$0 sm:$0xff] }
 0x5c7   : > { %v1171_v60 = vpop.permute.xlu1 %1170 }
 0x5c8   : > { %1174 = vst.msk [vmem:[#allocation4] sm:$0xff] %vm1173_vm7, %v1171_v60 }
 0x5cf   : > { %v1315_v25 = vpop.permute.xlu1 %1314 }
 0x5d0   : > { %1318 = vst.msk [vmem:[#allocation4] sm:$0xff] %vm1317_vm8, %v1315_v25 }
 0x5db   : > { %v1459_v28 = vpop.permute.xlu0 %1458 }
 0x5dc   : > { %1462 = vst.msk [vmem:[#allocation4] sm:$0xff] %vm1461_vm9, %v1459_v28 }
 0x5fe   : > { %v1603_v32 = vpop.permute.xlu1 %1602 }
 0x5ff   : > { %1606 = vst.msk [vmem:[#allocation4] sm:$0xff] %vm1605_vm10, %v1603_v32  ;;  %v2250_v32 = vld [vmem:[#allocation5 + $0x7] ss:$0 sm:$0xff] }
 0x608   : > { %v1747_v42 = vpop.permute.xlu0 %1746 }
 0x609   : > { %1750 = vst.msk [vmem:[#allocation4] sm:$0xff] %vm1749_vm11, %v1747_v42 }
 0x610   : > { %v1751_v51 = vld [vmem:[#allocation4] sm:$0xff] }
 0x611   : > { %v1753_v20 = vunpack.c.h.bf16 %v1751_v51  ;;  %v1752_v45 = vunpack.c.l.bf16 %v1751_v51 }
 0x613   : > { %v3388_v2 = vadd.f32 %v2699_v10, %v1753_v20  ;;  %v3391_v37 = vadd.f32 %v2700_v39, %v1752_v45  ;;  %v2571_v10 = vld [vmem:[%s3510_s6] sm:$0xff]   ;;  %v2572_v39 = vld [vmem:[%s3510_s6 + $0x8] sm:$0xff]  }
 0x614   : > { %2443 = vmatpush3.bf16.msra.mxu1 %v2571_v10 }
 0x615   : > { %v1761_v38 = vsel %vm392_vm0, %v3388_v2, 0.0  ;;  %v1758_v23 = vsel %vm392_vm0, %v3391_v37, 0.0  ;;  %2444 = vmatprep.subr.bf16.mxu1 %v2850_v30 }
 0x616   : > { %1762 = vadd.xlane.f32.xlu0 %v1761_v38  ;;  %1759 = vadd.xlane.f32.xlu1 %v1758_v23  ;;  %v2573_v38 = vld [vmem:[%s3510_s6 + $0x10] sm:$0xff]   ;;  %v2574_v23 = vld [vmem:[%s3510_s6 + $0x18] sm:$0xff]  }
 0x618   : > { %2445 = vmatpush3.bf16.msra.mxu1 %v2572_v39 }
 0x619   : > { %2446 = vmatprep.subr.bf16.mxu1 %v2850_v30 }
 0x61c   : > { %2447 = vmatpush3.bf16.msra.mxu1 %v2573_v38 }
 0x61d   : > { %2448 = vmatprep.subr.bf16.mxu1 %v2850_v30 }
 0x620   : > { %2449 = vmatpush3.bf16.msra.mxu1 %v2574_v23 }
 0x621   : > { %2450 = vmatprep.subr.bf16.mxu1 %v2850_v30 }
 0x6a3   : > { %v1763_v40 = vpop.xlane.xlu0 %1762  ;;  %v1760_v34 = vpop.xlane.xlu1 %1759 }
 0x6a4   : > { %v1765_v41 = vmul.f32 0.03125, %v1763_v40  ;;  %v1764_v52 = vmul.f32 0.03125, %v1760_v34  ;;  %v2575_v40 = vld [vmem:[%s3510_s6 + $0x20] sm:$0xff]   ;;  %v2576_v34 = vld [vmem:[%s3510_s6 + $0x28] sm:$0xff]  }
 0x6a5   : > { %2451 = vmatpush3.bf16.msra.mxu1 %v2575_v40  ;;  %v2255_v40 = vld [vmem:[%s3511_s7] ss:$0 sm:$0xff] }
 0x6a6   : > { %v1767_v44 = vsub.f32 %v3388_v2, %v1765_v41  ;;  %v1766_v26 = vsub.f32 %v3391_v37, %v1764_v52  ;;  %2452 = vmatprep.subr.bf16.mxu1 %v2850_v30  ;;  %v2577_v41 = vld [vmem:[%s3510_s6 + $0x30] sm:$0xff]   ;;  %v2578_v52 = vld [vmem:[%s3510_s6 + $0x38] sm:$0xff]  }
 0x6a8   : > { %v1768_v53 = vmul.f32 %v1766_v26, %v1766_v26  ;;  %v1769_v47 = vmul.f32 %v1767_v44, %v1767_v44 }
 0x6a9   : > { %2453 = vmatpush3.bf16.msra.mxu1 %v2576_v34 }
 0x6aa   : > { %v1770_v48 = vsel %vm392_vm0, %v1768_v53, 0.0  ;;  %v1773_v27 = vsel %vm392_vm0, %v1769_v47, 0.0  ;;  %2454 = vmatprep.subr.bf16.mxu1 %v2850_v30 }
 0x6ab   : > { %1771 = vadd.xlane.f32.xlu0 %v1770_v48 }
 0x6ad   : > { %2455 = vmatpush3.bf16.msra.mxu1 %v2577_v41 }
 0x6ae   : > { %2456 = vmatprep.subr.bf16.mxu1 %v2850_v30 }
 0x6af   : > { %1774 = vadd.xlane.f32.xlu0 %v1773_v27 }
 0x6b1   : > { %2457 = vmatpush3.bf16.msra.mxu1 %v2578_v52 }
 0x738   : > { %v1772_v49 = vpop.xlane.xlu0 %1771 }
 0x739   : > { %v1776_v12 = vmul.f32 0.03125, %v1772_v49 }
 0x73b   : > { %v1778_v59 = vadd.f32 1e-05, %v1776_v12 }
 0x73c   : > { %v1775_v36 = vpop.xlane.xlu0 %1774 }
 0x73d   : > { %2683 = vrsqrt.f32 %v1778_v59  ;;  %v1777_v50 = vmul.f32 0.03125, %v1775_v36 }
 0x73f   : > { %v1779_v54 = vadd.f32 1e-05, %v1777_v50 }
 0x741   : > { %2685 = vrsqrt.f32 %v1779_v54 }
 0x747   : > { %v2684_v35 = vpop.eup %2683 }
 0x748   : > { %v1782_v8 = vmul.f32 %v2684_v35, %v1766_v26 }
 0x74a   : > { %v1788_v9 = vmul.f32 %v2247_v58, %v1782_v8 }
 0x74b   : > { %v2686_v55 = vpop.eup %2685 }
 0x74c   : > { %v1794_v61 = vadd.f32 %v2248_v56, %v1788_v9  ;;  %v1783_v46 = vmul.f32 %v2686_v55, %v1767_v44  ;;  %v2251_v44 = vld [vmem:[%s3509_s5] ss:$0 sm:$0xff] }
 0x74e   : > { %v1798_v63 = vsel %vm392_vm0, %v1794_v61, 0.0  ;;  %v1789_v0 = vmul.f32 %v2247_v58, %v1783_v46 }
 0x74f   : > { %1799 = vadd.xlane.f32.xlu1 %v1798_v63 }
 0x750   : > { %v1795_v62 = vadd.f32 %v2248_v56, %v1789_v0 }
 0x752   : > { %v1801_v31 = vsel %vm392_vm0, %v1795_v62, 0.0 }
 0x753   : > { %1802 = vadd.xlane.f32.xlu0 %v1801_v31 }
 0x7dc   : > { %v1800_v43 = vpop.xlane.xlu1 %1799 }
 0x7dd   : > { %v1804_v4 = vmul.f32 0.03125, %v1800_v43 }
 0x7df   : > { %v1806_v22 = vsub.f32 %v1794_v61, %v1804_v4 }
 0x7e0   : > { %v1803_v5 = vpop.xlane.xlu0 %1802 }
 0x7e1   : > { %v1805_v3 = vmul.f32 0.03125, %v1803_v5  ;;  %v1808_v57 = vmul.f32 %v1806_v22, %v1806_v22 }
 0x7e3   : > { %v1807_v11 = vsub.f32 %v1795_v62, %v1805_v3  ;;  %v1810_v14 = vsel %vm392_vm0, %v1808_v57, 0.0 }
 0x7e4   : > { %1811 = vadd.xlane.f32.xlu1 %v1810_v14 }
 0x7e5   : > { %v1809_v17 = vmul.f32 %v1807_v11, %v1807_v11 }
 0x7e7   : > { %v1813_v33 = vsel %vm392_vm0, %v1809_v17, 0.0 }
 0x7e8   : > { %1814 = vadd.xlane.f32.xlu0 %v1813_v33 }
 0x871   : > { %v1812_v13 = vpop.xlane.xlu1 %1811 }
 0x872   : > { %v1816_v1 = vmul.f32 0.03125, %v1812_v13 }
 0x874   : > { %v1818_v19 = vadd.f32 1e-05, %v1816_v1 }
 0x875   : > { %v1815_v7 = vpop.xlane.xlu0 %1814 }
 0x876   : > { %2687 = vrsqrt.f32 %v1818_v19  ;;  %v1817_v29 = vmul.f32 0.03125, %v1815_v7 }
 0x878   : > { %v1819_v18 = vadd.f32 1e-05, %v1817_v29 }
 0x87a   : > { %2689 = vrsqrt.f32 %v1819_v18 }
 0x880   : > { %v2688_v21 = vpop.eup %2687 }
 0x881   : > { %v1822_v16 = vmul.f32 %v2688_v21, %v1806_v22 }
 0x883   : > { %v1828_v25 = vmul.f32 %v2249_v24, %v1822_v16 }
 0x884   : > { %v2690_v60 = vpop.eup %2689 }
 0x885   : > { %v1823_v28 = vmul.f32 %v2690_v60, %v1807_v11  ;;  %v1834_v51 = vadd.f32 %v2250_v32, %v1828_v25 }
 0x887   : > { %v1829_v42 = vmul.f32 %v2249_v24, %v1823_v28 }
 0x889   : > { %v1835_v20 = vadd.f32 %v2250_v32, %v1829_v42 }
 0x88b   : > { %v1836_v45 = vpack.c.bf16 %v1835_v20, %v1834_v51 }
 0x88d   : > { %2439 = vmatmul.mubr.msk.bf16.vlgmr.msra.gmra.mrb[40].mxu0 %vm392_vm0, %v1836_v45 }
 0x960   : > { %v1897_v26 = vpop.f32.mrb[40].mxu0 }
 0x961   : > { %v1898_v53 = vadd.f32 %v2251_v44, %v1897_v26  ;;  %v2440_v48 = vpop.f32.mrb[41].mxu0 }
 0x962   : > { %v1900_v47 = vpop.f32.mrb[42].mxu0 }
 0x963   : > { %v1906_v27 = vmul.f32 0.70710677, %v1898_v53  ;;  %v1901_v49 = vadd.f32 %v2251_v44, %v1900_v47  ;;  %v2441_v12 = vpop.f32.mrb[43].mxu0  ;;  %v1904_v20 = vmul.f32 0.5, %v1898_v53 }
 0x965   : > { %v1908_v59 = vand.u32 2147483647, %v1906_v27  ;;  %v1907_v36 = vmul.f32 0.70710677, %v1901_v49  ;;  %vm1948_vm12 = vcmp.ge.f32.partialorder %v1906_v27, 0.0  ;;  %v1905_v45 = vmul.f32 0.5, %v1901_v49 }
 0x967   : > { %v1910_v50 = vmul.f32 0.3275911, %v1908_v59  ;;  %v1909_v30 = vand.u32 2147483647, %v1907_v36  ;;  %v1936_v8 = vsub.f32 0.0, %v1908_v59  ;;  %vm1949_vm13 = vcmp.ge.f32.partialorder %v1907_v36, 0.0 }
 0x969   : > { %v1912_v54 = vadd.f32 1.0, %v1910_v50  ;;  %v1911_v35 = vmul.f32 0.3275911, %v1909_v30  ;;  %v1937_v56 = vsub.f32 0.0, %v1909_v30  ;;  %v1938_v55 = vmul.f32 %v1936_v8, %v1908_v59 }
 0x96b   : > { %2691 = vrcp.f32 %v1912_v54  ;;  %v1913_v58 = vadd.f32 1.0, %v1911_v35  ;;  %v1939_v0 = vmul.f32 %v1937_v56, %v1909_v30  ;;  %v1940_v62 = vmul.f32 1.442695, %v1938_v55 }
 0x96d   : > { %2693 = vrcp.f32 %v1913_v58  ;;  %v1942_v5 = vmul.f32 1.442695, %v1939_v0 }
 0x96e   : > { %2695 = vpow2.f32 %v1940_v62 }
 0x96f   : > { %2697 = vpow2.f32 %v1942_v5 }
 0x975   : > { %v2692_v9 = vpop.eup %2691 }
 0x976   : > { %v1918_v61 = vmul.f32 1.0614054, %v2692_v9 }
 0x977   : > { %v2694_v46 = vpop.eup %2693 }
 0x978   : > { %v1920_v63 = vadd.f32 -1.4531521, %v1918_v61  ;;  %v1919_v31 = vmul.f32 1.0614054, %v2694_v46  ;;  %v2696_v19 = vpop.eup %2695 }
 0x979   : > { %v2698_v21 = vpop.eup %2697 }
 0x97a   : > { %v1922_v43 = vmul.f32 %v2692_v9, %v1920_v63  ;;  %v1921_v4 = vadd.f32 -1.4531521, %v1919_v31 }
 0x97c   : > { %v1924_v22 = vadd.f32 1.4214138, %v1922_v43  ;;  %v1923_v3 = vmul.f32 %v2694_v46, %v1921_v4 }
 0x97e   : > { %v1926_v57 = vmul.f32 %v2692_v9, %v1924_v22  ;;  %v1925_v11 = vadd.f32 1.4214138, %v1923_v3 }
 0x980   : > { %v1928_v14 = vadd.f32 -0.28449672, %v1926_v57  ;;  %v1927_v17 = vmul.f32 %v2694_v46, %v1925_v11 }
 0x982   : > { %v1930_v33 = vmul.f32 %v2692_v9, %v1928_v14  ;;  %v1929_v15 = vadd.f32 -0.28449672, %v1927_v17 }
 0x984   : > { %v1932_v6 = vadd.f32 0.2548296, %v1930_v33  ;;  %v1931_v13 = vmul.f32 %v2694_v46, %v1929_v15 }
 0x986   : > { %v1934_v1 = vmul.f32 %v2692_v9, %v1932_v6  ;;  %v1933_v7 = vadd.f32 0.2548296, %v1931_v13 }
 0x988   : > { %v1944_v29 = vmul.f32 %v2696_v19, %v1934_v1  ;;  %v1935_v18 = vmul.f32 %v2694_v46, %v1933_v7 }
 0x98a   : > { %v1946_v16 = vsub.f32 1.0, %v1944_v29  ;;  %v1945_v24 = vmul.f32 %v2698_v21, %v1935_v18 }
 0x98c   : > { %v1950_v60 = vsub.f32 0.0, %v1946_v16  ;;  %v1947_v25 = vsub.f32 1.0, %v1945_v24 }
 0x98e   : > { %v1952_v28 = vsel %vm1948_vm12, %v1946_v16, %v1950_v60  ;;  %v1951_v32 = vsub.f32 0.0, %v1947_v25 }
 0x98f   : > { %v1954_v42 = vadd.f32 1.0, %v1952_v28 }
 0x990   : > { %v1953_v51 = vsel %vm1949_vm13, %v1947_v25, %v1951_v32 }
 0x991   : > { %v1955_v10 = vadd.f32 1.0, %v1953_v51  ;;  %v1956_v39 = vmul.f32 %v1954_v42, %v1904_v20 }
 0x993   : > { %v1957_v38 = vmul.f32 %v1955_v10, %v1905_v45 }
 0x995   : > { %v1958_v23 = vpack.c.bf16 %v1957_v38, %v1956_v39 }
 0x997   : > { %2459 = vmatmul.mubr.bf16.vlgmr.msra.gmra.mrb[32].mxu1 %v1958_v23 }
 0xa6a   : > { %v2064_v34 = vpop.f32.mrb[32].mxu1 }
 0xa6b   : > { %v2065_v41 = vadd.f32 %v2255_v40, %v2064_v34  ;;  %v2460_v52 = vpop.f32.mrb[33].mxu1 }
 0xa6c   : > { %v2067_v44 = vpop.f32.mrb[34].mxu1 }
 0xa6d   : > { %v2071_v26 = vadd.f32 %v2065_v41, %v3391_v37  ;;  %v2068_v53 = vadd.f32 %v2255_v40, %v2067_v44  ;;  %v2461_v48 = vpop.f32.mrb[35].mxu1 }
 0xa6f   : > { %2073 = vst.msk [vmem:[%s366_s22] sm:$0xff] %vm392_vm0, %v2071_v26  ;;  %v2072_v47 = vadd.f32 %v2068_v53, %v3388_v2 }
 0xa71   : > { %2074 = vst.msk [vmem:[%s366_s22 + $0x8] sm:$0xff] %vm392_vm0, %v2072_v47 }
 0xa72   : > { %2770 = shalt.err (!%p2767_p6)
}
 0xa73   : > { %s2771_s14 = scalar_lea.hbm %s3450_s12, 256  ;;  %s2775_s20 = scalar_lea.hbm %s3512_s8, 512 }
 0xa74   : > { %p2772_p7 = scmp.ne.s32.totalorder %s3450_s12, %s2771_s14  ;;  %p2776_p0 = scmp.lt.u32.totalorder %s3450_s12, %s3512_s8 }
 0xa75   : > { %p2777_p1 = scmp.lt.u32.totalorder %s2775_s20, %s2771_s14  ;;  %p2779_p13 = scmp.lt.u32.totalorder %s2771_s14, %s3450_s12 }
 0xa76   : > { %p2773_p9 = pnand %p2772_p7, %p3528_p8 }
 0xa77   : > { %p2778_p4 = por %p2777_p1, %p2776_p0 }
 0xa78   : > { %p2774_p12 = pneg %p2773_p9 }
 0xa79   : > { %p2780_p10 = por %p2779_p13, %p2778_p4 }
 0xa7b   : > { %p2781_p11 = pnand %p2780_p10, %p2774_p12 }
 0xa7d   : > { %2784 = shalt.err (!%p2781_p11)
}
 0xa7e   : > { %s2874_s13 = smov 128  }
 0xa7f   : > { %2470 = dma.vmem_to_hbm [thread:$0]  (%p3528_p8), %s3454_s9, 256, %s3450_s12, %s3457_s30, %s2874_s13, %s2874_s13, %s2867_s21  }
 0xa80 PF: > { %p2487_p2 = scmp.ge.s32.totalorder %s2843_s10, 2  ;;  %s2106_s25 = sand.u32 1, %s2823_s27  }
 0xa81   : > { %p3529_p3 = scmp.ne.s32.totalorder %s3522_s17, 0  ;;  %s2107_s11 = scalar_lea.sflag [#allocation7], %s2106_s25 }
 0xa83   : > { %p2480_p5 = pnand %p2487_p2, %p3529_p3 }
 0xa85   : > { %2818 = dma.done.wait (!%p2480_p5), %s2107_s11, 256  }
 0xa86   : > { %2820 = vsyncadd (!%p2480_p5), %s2107_s11, 4294967040  ;;  %s23_s10 = sadd.s32 1, %s2843_s10   ;;  %s3530_s30 = sld [smem:[#allocation14_spill]] }
 0xa87   : > { %p20_p6 = scmp.ge.s32.totalorder %s23_s10, 4   ;;  %s3531_s9 = sld [smem:[#allocation15_spill]] }
 0xa88   : > { %s3532_s27 = smov %s2827_s28  ;;  %s3533_s28 = smov %s2831_s29 }
 0xa89   : > { %s3534_s29 = smov %s2973_s18  ;;  %22 = sbr.rel (!%p20_p6) target bundleno = 6 (0x6), region = 103 }
 0xa90   :  { %2112 = vsyncpa [#allocation6], 1 }
 0xa91   :  { %2114 = vsyncpa [#allocation6 + $0x1], 1 }
 0xa92   :  { %2115 = vsyncpa [#allocation9], 1 }
 0xa93   :  { %2116 = vsyncpa [#allocation7], 1 }
 0xa94   :  { %2118 = vsyncpa [#allocation7 + $0x1], 1 }

// kernel: tpu_custom_call.1
= control target key start
LH: loop header
LB: loop body
LE: loop exit
PB: predicated region body
PF: predicated region fallthrough
CT: control target
= control target key end

     0   :  { %13 = vsyncpa [#allocation6], 0  ;;  %s3501_s0 = inlined_call_operand.vmem [shape: f32[2,16,32], index: 0, kind: input, shape index: {}]   ;;  %s3502_s1 = inlined_call_operand.vmem [shape: f32[2,16,32], index: 1, kind: input, shape index: {}]   ;;  %s3503_s2 = inlined_call_operand.hbm [shape: f32[8,32], index: 2, kind: input, shape index: {}]   ;;  %s3504_s3 = inlined_call_operand.vmem [shape: bf16[32,96], index: 3, kind: input, shape index: {}]   ;;  %s3505_s4 = inlined_call_operand.hbm [shape: bf16[32,128], index: 4, kind: input, shape index: {}]   ;;  %s3506_s5 = inlined_call_operand.vmem [shape: f32[1,128], index: 5, kind: input, shape index: {}]   ;;  %s3507_s6 = inlined_call_operand.vmem [shape: bf16[128,32], index: 6, kind: input, shape index: {}]   ;;  %s3508_s7 = inlined_call_operand.vmem [shape: f32[1,32], index: 7, kind: input, shape index: {}]   ;;  %s3509_s8 = inlined_call_operand.hbm [shape: f32[2,16,32], index: 8, kind: output, shape index: {}]  }
   0x1   :  { %14 = vsyncpa [#allocation9], 0 }
   0x2   :  { %15 = vsyncpa [#allocation7], 0 }
   0x3   :  { %17 = vsyncpa [#allocation7 + $0x1], 0  ;;  %s2917_s27 = smov 0   ;;  %s2919_s28 = smov 0  }
   0x4   :  { %s2921_s29 = smov 0   ;;  %s2923_s30 = smov 0  }
   0x5   :  { %s2925_s9 = smov 0   ;;  %s2927_s10 = smov 0  }
   0x6 LB: > { %3516 = sst [smem:[#allocation14_spill]] %s2836_s9  ;;  %s2204_s11 = sadd.s32 4294967295, %s2840_s10   ;;  %s2840_s10 = sphi %s2927_s10, %s23_s10   ;;  %s2836_s9 = sphi %s2925_s9, %s3528_s9   ;;  %s2832_s30 = sphi %s2923_s30, %s3527_s30   ;;  %s2828_s29 = sphi %s2921_s29, %s3531_s29   ;;  %s2824_s28 = sphi %s2919_s28, %s3530_s28   ;;  %s2820_s27 = sphi %s2917_s27, %s3529_s27  }
   0x7   : > { %s2205_s12 = sadd.s32 4294967294, %s2840_s10   ;;  %s35_s13 = sadd.s32 1, %s2836_s9 }
   0x8   : > { %s224_s14 = sadd.s32 1, %s2828_s29  ;;  %p37_p0 = scmp.ge.s32.totalorder %s35_s13, 2 }
   0x9   : > { %p234_p1 = scmp.ne.s32.totalorder %s2828_s29, %s2824_s28  ;;  %p235_p2 = scmp.eq.s32.totalorder %s2204_s11, 1 }
   0xa   : > { %p240_p3 = scmp.ne.s32.totalorder %s2824_s28, %s2820_s27  ;;  %s3533_s13 = smov (%p37_p0, %s35_s13), 0 }
   0xb   : > { %3517 = sst [smem:[#allocation15_spill]] %s3533_s13  ;;  %p2957_p4 = por %p235_p2, %p234_p1 }
   0xc   : > { %p241_p5 = scmp.eq.s32.totalorder %s2205_s12, 1  ;;  %s219_s16 = ssub.s32 %s2836_s9, %s3533_s13 }
   0xd   : > { %s3518_s15 = scalar_select %p2957_p4, 1, 0 }
   0xe   : > { %p2206_p6 = scmp.ge.s32.totalorder %s2840_s10, 1  ;;  %p222_p7 = scmp.eq.s32.totalorder %s219_s16, 0 }
   0xf   : > { %p2964_p8 = por %p241_p5, %p240_p3  ;;  %p248_p9 = scmp.lt.s32.totalorder %s2840_s10, 3 }
  0x10   : > { %s2970_s18 = scalar_select %p222_p7, %s2828_s29, %s224_s14  }
  0x11   : > { %s3519_s17 = scalar_select %p2964_p8, 1, 0 }
  0x12   : > { %p2972_p10 = pnand %p2206_p6, %p248_p9  ;;  %p2976_p11 = scmp.eq.s32.totalorder %s2204_s11, 0 }
  0x13   : > { %s2842_s21 = smov [#allocation5]   ;;  %s2843_s23 = smov [#allocation8]  }
  0x14   : > { %s3520_s19 = scalar_select %p2972_p10, 1, 0 }
  0x15   : > { %s3521_s20 = scalar_select %p2976_p11, 1, 0 }
  0x16   : > { %p2469_p12 = pneg %p2972_p10  ;;  %s261_s22 = sshll.u32 %s2842_s21, 4  ;;  %s262_s22 = int_to_ptr.vmem [resolvable:$true] %s261_s22 }
  0x17   : > { %s274_s24 = sshll.u32 %s2843_s23, 4  ;;  %s2698_s12 = scalar_lea.hbm %s3503_s2, 128  ;;  %s2988_s24 = int_to_ptr.vmem [resolvable:$true] %s274_s24 }
  0x18   : > { %p2984_p13 = pnand %p2976_p11, %p2469_p12  ;;  %p2699_p0 = scmp.ne.s32.totalorder %s3503_s2, %s2698_s12 }
  0x19   : > { %p2705_p5 = scmp.lt.u32.totalorder %s2698_s12, %s3503_s2 }
  0x1a   : > { %p2700_p1 = pneg %p2984_p13 }
  0x1c   : > { %p2701_p2 = pnand %p2700_p1, %p2699_p0 }
  0x1e   : > { %p2702_p3 = pneg %p2701_p2 }
  0x20   : > { %p2707_p6 = pnand %p2705_p5, %p2702_p3 }
  0x22   : > { %2710 = shalt.err (!%p2707_p6)
}
  0x23   : > { %s2711_s13 = scalar_lea.vmem %s262_s22, 128  ;;  %p2719_p8 = scmp.lt.s32.totalorder %s262_s22, %s262_s22 }
  0x24   : > { %p2712_p7 = scmp.ne.s32.totalorder %s262_s22, %s2711_s13  ;;  %p2720_p4 = scmp.lt.s32.totalorder %s2711_s13, %s2711_s13 }
  0x26   : > { %p2714_p9 = pnand %p2712_p7, %p2700_p1  ;;  %p2721_p11 = por %p2720_p4, %p2719_p8 }
  0x28   : > { %p2715_p12 = pneg %p2714_p9 }
  0x2a   : > { %p2722_p10 = pnand %p2721_p11, %p2715_p12 }
  0x2c   : > { %2725 = shalt.err (!%p2722_p10)
}
  0x2d   : > { %2472 = dma.hbm_to_vmem [thread:$0]  (!%p2984_p13), %s3503_s2, 128, %s262_s22, [#allocation6]  }
  0x2e   : > { %s2726_s16 = scalar_lea.hbm %s3505_s4, 256 }
  0x2f   : > { %p2727_p0 = scmp.ne.s32.totalorder %s3505_s4, %s2726_s16  ;;  %p2733_p10 = scmp.lt.u32.totalorder %s2726_s16, %s3505_s4 }
  0x31   : > { %p2729_p4 = pnand %p2727_p0, %p2700_p1 }
  0x33   : > { %p2730_p8 = pneg %p2729_p4 }
  0x35   : > { %p2735_p11 = pnand %p2733_p10, %p2730_p8 }
  0x37   : > { %2738 = shalt.err (!%p2735_p11)
}
  0x38   : > { %s2739_s22 = scalar_lea.vmem %s2988_s24, 256  ;;  %p2747_p6 = scmp.lt.s32.totalorder %s2988_s24, %s2988_s24 }
  0x39   : > { %p2740_p2 = scmp.ne.s32.totalorder %s2988_s24, %s2739_s22  ;;  %p2748_p7 = scmp.lt.s32.totalorder %s2739_s22, %s2739_s22 }
  0x3b   : > { %p2742_p3 = pnand %p2740_p2, %p2700_p1  ;;  %p2749_p9 = por %p2748_p7, %p2747_p6 }
  0x3d   : > { %p2743_p5 = pneg %p2742_p3 }
  0x3f   : > { %p2750_p12 = pnand %p2749_p9, %p2743_p5 }
  0x41   : > { %2753 = shalt.err (!%p2750_p12)
}
  0x42   : > { %s2844_s9 = smov 64   ;;  %s2845_s26 = smov 4  }
  0x43   : > { %2475 = dma.hbm_to_vmem [thread:$0]  (!%p2984_p13), %s3505_s4, 256, %s2988_s24, [#allocation9], %s2844_s9, %s2844_s9, %s2845_s26  }
  0x44   : > { %p3523_p0 = scmp.ne.s32.totalorder %s3520_s19, 0 }
  0x45   : > { %p3524_p1 = scmp.ne.s32.totalorder (!%p3523_p0), %s3521_s20, 0 }
  0x46   : > { %320 = sbr.rel (%p3523_p0) target bundleno = 2688 (0xa80), region = 52 }
  0x4d   : > { %2807 = dma.done.wait (%p3524_p1), [#allocation6], 128  }
  0x4e   : > { %2809 = vsyncadd (%p3524_p1), [#allocation6], 4294967168 }
  0x4f   : > { %2811 = dma.done.wait (%p3524_p1), [#allocation9], 256  }
  0x50   : > { %2813 = vsyncadd (%p3524_p1), [#allocation9], 4294967040  ;;  %p368_p4 = scmp.lt.s32.totalorder %s2832_s30, 1  ;;  %vm392_vm0 = vcmask 261120   ;;  %v2563_v28 = vld [vmem:[%s3504_s3 + $0x8] sm:$0xff]   ;;  %v2562_v29 = vld [vmem:[%s3504_s3] sm:$0xff]  }
  0x51   : > { %s2846_s11 = smov 96   ;;  %v2847_v30 = vmov 0.0   ;;  %vm2848_vm1 = vmmov 0   ;;  %v2218_v47 = vld [vmem:[#allocation5] ss:$0 sm:$0xff]  ;;  %v2564_v60 = vld [vmem:[%s3504_s3] sm:$0xff]  }
  0x52   : > { %s369_s25 = scalar_select %p368_p4, %s2832_s30, 1  ;;  %2319 = vmatprep.subr.bf16.mxu0 %v2847_v30  ;;  %2341 = vmatprep.subr.bf16.mxu1 %v2847_v30  ;;  %v2219_v52 = vld [vmem:[#allocation5 + $0x1] ss:$0 sm:$0xff]  ;;  %v2223_v59 = vld [vmem:[#allocation5 + $0x2] ss:$0 sm:$0xff]  ;;  %vm498_vm2 = vcmask 523264  }
  0x53   : > { %2323 = vmatprep.mubr.msk.bf16.mxu0 %vm2848_vm1, %v2847_v30  ;;  %2343 = vmatprep.mubr.msk.bf16.mxu1 %vm2848_vm1, %v2847_v30  ;;  %vm609_vm3 = vcmask 31744   ;;  %s2849_s19 = smov 120   ;;  %s2851_s21 = smov 116   ;;  %vm657_vm4 = vcmask 130048   ;;  %vm885_vm5 = vcmask 64544   ;;  %vm1029_vm6 = vcmask 97344  }
  0x54   : > { %s2266_s24 = sshll.u32 %s369_s25, 4  ;;  %s2852_s23 = smov 112   ;;  %vm1173_vm7 = vcmask 130144   ;;  %vm1317_vm8 = vcmask 162944   ;;  %vm1461_vm9 = vcmask 195744   ;;  %vm1605_vm10 = vcmask 228544  }
  0x55   : > { %s381_s16 = scalar_lea.vmem %s3502_s1, %s2266_s24  ;;  %s3055_s13 = scalar_lea.vmem %s3501_s0, %s2266_s24  ;;  %vm1749_vm11 = vcmask 261344  }
  0x56   : > { %v388_v0 = vld [vmem:[%s381_s16] sm:$0xff]  ;;  %v389_v2 = vld [vmem:[%s381_s16 + $0x8] sm:$0xff]  ;;  %s2850_s16 = smov 124   ;;  %s2853_s20 = smov 108  }
  0x57   : > { %v500_v1 = vld [vmem:[%s3055_s13] sm:$0xff]  ;;  %v393_v3 = vsel %vm392_vm0, %v388_v0, 0.0  ;;  %v501_v5 = vld [vmem:[%s3055_s13 + $0x8] sm:$0xff]  ;;  %v396_v6 = vsel %vm392_vm0, %v389_v2, 0.0  ;;  %s2854_s22 = smov 104   ;;  %s2855_s9 = smov 100  }
  0x58   : > { %v505_v4 = vsel %vm392_vm0, %v500_v1, 0.0  ;;  %394 = vadd.xlane.f32.xlu0 %v393_v3  ;;  %v508_v7 = vsel %vm392_vm0, %v501_v5, 0.0  ;;  %s2856_s26 = smov 88   ;;  %s2857_s12 = smov 92  }
  0x59   : > { %506 = vadd.xlane.f32.xlu1 %v505_v4  ;;  %s2858_s25 = smov 84   ;;  %s2860_s24 = smov 76  }
  0x5a   : > { %s2861_s14 = smov 72   ;;  %p3525_p8 = scmp.ne.s32.totalorder %s3518_s15, 0 }
  0x5c   : > { %397 = vadd.xlane.f32.xlu0 %v396_v6 }
  0x5d   : > { %509 = vadd.xlane.f32.xlu1 %v508_v7 }
  0xe5   : > { %v395_v8 = vpop.xlane.xlu0 %394 }
  0xe6   : > { %v507_v9 = vpop.xlane.xlu1 %506  ;;  %v400_v10 = vmul.f32 0.03125, %v395_v8 }
  0xe7   : > { %v512_v11 = vmul.f32 0.03125, %v507_v9 }
  0xe8   : > { %v402_v12 = vsub.f32 %v388_v0, %v400_v10  ;;  %v2565_v0 = vld [vmem:[%s3504_s3 + $0x8] sm:$0xff]  }
  0xe9   : > { %v514_v13 = vsub.f32 %v500_v1, %v512_v11  ;;  %v398_v14 = vpop.xlane.xlu0 %397  ;;  %v2224_v1 = vld [vmem:[#allocation5 + $0x3] ss:$0 sm:$0xff] }
  0xea   : > { %v510_v15 = vpop.xlane.xlu1 %509  ;;  %v401_v16 = vmul.f32 0.03125, %v398_v14  ;;  %v404_v18 = vmul.f32 %v402_v12, %v402_v12 }
  0xeb   : > { %v513_v17 = vmul.f32 0.03125, %v510_v15  ;;  %v516_v19 = vmul.f32 %v514_v13, %v514_v13 }
  0xec   : > { %v403_v20 = vsub.f32 %v389_v2, %v401_v16  ;;  %v406_v22 = vsel %vm392_vm0, %v404_v18, 0.0 }
  0xed   : > { %v515_v21 = vsub.f32 %v501_v5, %v513_v17  ;;  %407 = vadd.xlane.f32.xlu0 %v406_v22  ;;  %v518_v23 = vsel %vm392_vm0, %v516_v19, 0.0 }
  0xee   : > { %v405_v24 = vmul.f32 %v403_v20, %v403_v20 }
  0xef   : > { %v517_v25 = vmul.f32 %v515_v21, %v515_v21 }
  0xf0   : > { %v409_v26 = vsel %vm392_vm0, %v405_v24, 0.0 }
  0xf1   : > { %519 = vadd.xlane.f32.xlu0 %v518_v23  ;;  %410 = vadd.xlane.f32.xlu1 %v409_v26  ;;  %v521_v27 = vsel %vm392_vm0, %v517_v25, 0.0 }
  0xf5   : > { %522 = vadd.xlane.f32.xlu1 %v521_v27 }
 0x106   : > { %449 = vrot.lane.b32.xlu1 %v2563_v28, %s2846_s11 }
 0x107   : > { %447 = vrot.lane.b32.xlu0 %v2562_v29, %s2846_s11 }
 0x17a   : > { %v408_v31 = vpop.xlane.xlu0 %407 }
 0x17b   : > { %v412_v32 = vmul.f32 0.03125, %v408_v31 }
 0x17d   : > { %v414_v33 = vadd.f32 1e-05, %v412_v32 }
 0x17e   : > { %v411_v34 = vpop.xlane.xlu1 %410  ;;  %v520_v35 = vpop.xlane.xlu0 %519 }
 0x17f   : > { %2576 = vrsqrt.f32 %v414_v33  ;;  %v413_v36 = vmul.f32 0.03125, %v411_v34  ;;  %v524_v37 = vmul.f32 0.03125, %v520_v35 }
 0x181   : > { %v415_v38 = vadd.f32 1e-05, %v413_v36  ;;  %v526_v39 = vadd.f32 1e-05, %v524_v37 }
 0x182   : > { %v523_v40 = vpop.xlane.xlu1 %522  ;;  %v448_v41 = vpop.permute.xlu0 %447 }
 0x183   : > { %2578 = vrsqrt.f32 %v415_v38  ;;  %v525_v42 = vmul.f32 0.03125, %v523_v40  ;;  %2320 = vmatpush3.bf16.msra.mxu0 %v448_v41 }
 0x184   : > { %2321 = vmatprep.subr.bf16.mxu0 %v2847_v30  ;;  %2580 = vrsqrt.f32 %v526_v39 }
 0x185   : > { %v527_v43 = vadd.f32 1e-05, %v525_v42 }
 0x186   : > { %v450_v44 = vpop.permute.xlu1 %449 }
 0x187   : > { %2582 = vrsqrt.f32 %v527_v43  ;;  %2322 = vmatpush3.bf16.msra.mxu0 %v450_v44 }
 0x188   : > { %2327 = vmatprep.subr.bf16.mxu0 %v2847_v30 }
 0x189   : > { %v2577_v45 = vpop.eup %2576 }
 0x18a   : > { %v418_v46 = vmul.f32 %v2577_v45, %v402_v12 }
 0x18c   : > { %v424_v50 = vmul.f32 %v2218_v47, %v418_v46 }
 0x18d   : > { %v2579_v48 = vpop.eup %2578 }
 0x18e   : > { %v419_v49 = vmul.f32 %v2579_v48, %v403_v20  ;;  %v2581_v51 = vpop.eup %2580  ;;  %v430_v57 = vadd.f32 %v2219_v52, %v424_v50 }
 0x18f   : > { %v530_v55 = vmul.f32 %v2581_v51, %v514_v13 }
 0x190   : > { %v425_v53 = vmul.f32 %v2218_v47, %v419_v49 }
 0x191   : > { %v2583_v54 = vpop.eup %2582  ;;  %v536_v63 = vmul.f32 %v2223_v59, %v530_v55 }
 0x192   : > { %v531_v56 = vmul.f32 %v2583_v54, %v515_v21  ;;  %v431_v58 = vadd.f32 %v2219_v52, %v425_v53 }
 0x193   : > { %v542_v3 = vadd.f32 %v2224_v1, %v536_v63 }
 0x194   : > { %v537_v61 = vmul.f32 %v2223_v59, %v531_v56  ;;  %v432_v62 = vpack.c.bf16 %v431_v58, %v430_v57 }
 0x196   : > { %2324 = vmatmul.mubr.msk.bf16.vlgmr.msra.gmra.mrb[0].mxu0 %vm392_vm0, %v432_v62  ;;  %v543_v2 = vadd.f32 %v2224_v1, %v537_v61 }
 0x197   : > { %2328 = vmatpush3.bf16.msra.mxu0 %v2564_v60  ;;  %2331 = vmatprep.mubr.msk.bf16.mxu0 %vm2848_vm1, %v2847_v30 }
 0x198   : > { %2329 = vmatprep.subr.bf16.mxu0 %v2847_v30  ;;  %v544_v4 = vpack.c.bf16 %v543_v2, %v542_v3 }
 0x19b   : > { %2330 = vmatpush3.bf16.msra.mxu0 %v2565_v0 }
 0x19c   : > { %2335 = vmatprep.subr.bf16.mxu0 %v2847_v30 }
 0x19e   : > { %2332 = vmatmul.mubr.msk.bf16.vlgmr.msra.gmra.mrb[4].mxu0 %vm392_vm0, %v544_v4 }
 0x19f   : > { %2337 = vmatprep.mubr.msk.bf16.mxu0 %vm2848_vm1, %v2847_v30 }
 0x269   : > { %v490_v5 = vpop.f32.mrb[0].mxu0 }
 0x26a   : > { %v2325_v6 = vpop.f32.mrb[1].mxu0 }
 0x26b   : > { %v493_v7 = vpop.f32.mrb[2].mxu0 }
 0x26c   : > { %v497_v8 = vpack.c.bf16 %v493_v7, %v490_v5  ;;  %v2326_v9 = vpop.f32.mrb[3].mxu0 }
 0x26e   : > { %499 = vst.msk [vmem:[#allocation2] sm:$0xff] %vm498_vm2, %v497_v8 }
 0x271   : > { %v598_v10 = vpop.f32.mrb[4].mxu0 }
 0x272   : > { %v2333_v11 = vpop.f32.mrb[5].mxu0 }
 0x273   : > { %v601_v12 = vpop.f32.mrb[6].mxu0 }
 0x274   : > { %v605_v13 = vpack.c.bf16 %v601_v12, %v598_v10  ;;  %v2334_v14 = vpop.f32.mrb[7].mxu0 }
 0x275   : > { %v3097_v15 = vld [vmem:[#allocation2] sm:$0xff] }
 0x276   : > { %606 = vst.msk [vmem:[#allocation3] sm:$0xff] %vm392_vm0, %v605_v13  ;;  %893 = vrot.lane.b32.xlu0 %v3097_v15, %s2849_s19  ;;  %749 = vrot.lane.b32.xlu1 %v3097_v15, %s2850_s16  ;;  %v614_v16 = vsel %vm609_vm3, %v3097_v15, 0 }
 0x277   : > { %2336 = vmatpush3.bf16.xpose.msra.mxu0 %v614_v16 }
 0x278   : > { %2347 = vmatprep.subr.bf16.mxu0 %v2847_v30 }
 0x27a   : > { %1037 = vrot.lane.b32.xlu0 %v3097_v15, %s2851_s21 }
 0x27d   : > { %v743_v17 = vld [vmem:[#allocation3] sm:$0xff] }
 0x27e   : > { %1181 = vrot.lane.b32.xlu0 %v3097_v15, %s2852_s23  ;;  %746 = vrot.lane.b32.xlu1 %v743_v17, %s2850_s16  ;;  %s2863_s16 = smov 4  }
 0x27f   : > { %2338 = vmatmul.mubr.msk.bf16.vlgmr.msra.gmra.mrb[8].mxu0 %vm609_vm3, %v743_v17 }
 0x280   : > { %2349 = vmatprep.mubr.msk.bf16.mxu0 %vm2848_vm1, %v2847_v30 }
 0x282   : > { %1325 = vrot.lane.b32.xlu0 %v3097_v15, %s2853_s20  ;;  %890 = vrot.lane.b32.xlu1 %v743_v17, %s2849_s19  ;;  %s2862_s19 = smov 68  }
 0x286   : > { %1469 = vrot.lane.b32.xlu0 %v3097_v15, %s2854_s22  ;;  %1034 = vrot.lane.b32.xlu1 %v743_v17, %s2851_s21  ;;  %s2864_s21 = smov 8  }
 0x28a   : > { %1613 = vrot.lane.b32.xlu0 %v3097_v15, %s2855_s9  ;;  %1178 = vrot.lane.b32.xlu1 %v743_v17, %s2852_s23  ;;  %s2865_s23 = smov 12  }
 0x28e   : > { %688 = vrot.lane.b32.xlu0 %v3097_v15, %s2846_s11  ;;  %1322 = vrot.lane.b32.xlu1 %v743_v17, %s2853_s20  ;;  %s2859_s11 = smov 80   ;;  %s2866_s20 = smov 16  }
 0x292   : > { %971 = vrot.lane.b32.xlu0 %v3097_v15, %s2856_s26  ;;  %1466 = vrot.lane.b32.xlu1 %v743_v17, %s2854_s22  ;;  %s2867_s22 = smov 20   ;;  %s2869_s26 = smov 28  }
 0x296   : > { %1610 = vrot.lane.b32.xlu1 %v743_v17, %s2855_s9  ;;  %s2868_s9 = smov 24  }
 0x29a   : > { %827 = vrot.lane.b32.xlu1 %v3097_v15, %s2857_s12 }
 0x29e   : > { %1115 = vrot.lane.b32.xlu1 %v3097_v15, %s2858_s25 }
 0x2e8   : > { %v894_v18 = vpop.permute.xlu0 %893  ;;  %v750_v19 = vpop.permute.xlu1 %749 }
 0x2e9   : > { %v755_v20 = vsel %vm609_vm3, %v750_v19, 0  ;;  %v899_v24 = vsel %vm609_vm3, %v894_v18, 0 }
 0x2ea   : > { %2348 = vmatpush3.bf16.xpose.msra.mxu0 %v755_v20 }
 0x2eb   : > { %2359 = vmatprep.subr.bf16.mxu0 %v2847_v30 }
 0x2ec   : > { %v1038_v21 = vpop.permute.xlu0 %1037 }
 0x2ed   : > { %v1043_v28 = vsel %vm609_vm3, %v1038_v21, 0 }
 0x2f0   : > { %v1182_v22 = vpop.permute.xlu0 %1181  ;;  %v747_v23 = vpop.permute.xlu1 %746 }
 0x2f1   : > { %2350 = vmatmul.mubr.msk.bf16.vlgmr.msra.gmra.mrb[12].mxu0 %vm609_vm3, %v747_v23  ;;  %v1187_v33 = vsel %vm609_vm3, %v1182_v22, 0 }
 0x2f2   : > { %2360 = vmatpush3.bf16.xpose.msra.mxu0 %v899_v24  ;;  %2361 = vmatprep.mubr.msk.bf16.mxu0 %vm2848_vm1, %v2847_v30 }
 0x2f3   : > { %2371 = vmatprep.subr.bf16.mxu0 %v2847_v30 }
 0x2f4   : > { %v1326_v25 = vpop.permute.xlu0 %1325  ;;  %v891_v26 = vpop.permute.xlu1 %890 }
 0x2f5   : > { %v1331_v35 = vsel %vm609_vm3, %v1326_v25, 0 }
 0x2f8   : > { %v1470_v27 = vpop.permute.xlu0 %1469  ;;  %v1035_v31 = vpop.permute.xlu1 %1034 }
 0x2f9   : > { %2362 = vmatmul.mubr.msk.bf16.vlgmr.msra.gmra.mrb[16].mxu0 %vm609_vm3, %v891_v26  ;;  %v1475_v37 = vsel %vm609_vm3, %v1470_v27, 0 }
 0x2fa   : > { %2372 = vmatpush3.bf16.xpose.msra.mxu0 %v1043_v28  ;;  %2373 = vmatprep.mubr.msk.bf16.mxu0 %vm2848_vm1, %v2847_v30 }
 0x2fb   : > { %2383 = vmatprep.subr.bf16.mxu0 %v2847_v30 }
 0x2fc   : > { %v1614_v29 = vpop.permute.xlu0 %1613  ;;  %v1179_v34 = vpop.permute.xlu1 %1178 }
 0x2fd   : > { %v1619_v39 = vsel %vm609_vm3, %v1614_v29, 0 }
 0x300   : > { %v689_v32 = vpop.permute.xlu0 %688  ;;  %v1323_v36 = vpop.permute.xlu1 %1322 }
 0x301   : > { %2342 = vmatpush3.bf16.msra.mxu1 %v689_v32  ;;  %2374 = vmatmul.mubr.msk.bf16.vlgmr.msra.gmra.mrb[20].mxu0 %vm609_vm3, %v1035_v31 }
 0x302   : > { %2384 = vmatpush3.bf16.xpose.msra.mxu0 %v1187_v33  ;;  %2385 = vmatprep.mubr.msk.bf16.mxu0 %vm2848_vm1, %v2847_v30 }
 0x303   : > { %2395 = vmatprep.subr.bf16.mxu0 %v2847_v30  ;;  %2353 = vmatprep.subr.bf16.mxu1 %v2847_v30 }
 0x304   : > { %v1467_v38 = vpop.permute.xlu1 %1466  ;;  %v3182_v3 = vpop.permute.xlu0 %971 }
 0x308   : > { %v1611_v40 = vpop.permute.xlu1 %1610 }
 0x309   : > { %2386 = vmatmul.mubr.msk.bf16.vlgmr.msra.gmra.mrb[24].mxu0 %vm609_vm3, %v1179_v34 }
 0x30a   : > { %2396 = vmatpush3.bf16.xpose.msra.mxu0 %v1331_v35  ;;  %2397 = vmatprep.mubr.msk.bf16.mxu0 %vm2848_vm1, %v2847_v30 }
 0x30b   : > { %2407 = vmatprep.subr.bf16.mxu0 %v2847_v30 }
 0x30c   : > { %v828_v1 = vpop.permute.xlu1 %827 }
 0x310   : > { %v3188_v7 = vpop.permute.xlu1 %1115 }
 0x311   : > { %2398 = vmatmul.mubr.msk.bf16.vlgmr.msra.gmra.mrb[28].mxu0 %vm609_vm3, %v1323_v36 }
 0x312   : > { %2408 = vmatpush3.bf16.xpose.msra.mxu0 %v1475_v37  ;;  %2409 = vmatprep.mubr.msk.bf16.mxu0 %vm2848_vm1, %v2847_v30 }
 0x313   : > { %2419 = vmatprep.subr.bf16.mxu0 %v2847_v30 }
 0x319   : > { %2410 = vmatmul.mubr.msk.bf16.vlgmr.msra.gmra.mrb[32].mxu0 %vm609_vm3, %v1467_v38 }
 0x31a   : > { %2420 = vmatpush3.bf16.xpose.msra.mxu0 %v1619_v39  ;;  %2421 = vmatprep.mubr.msk.bf16.mxu0 %vm2848_vm1, %v2847_v30 }
 0x31b   : > { %2431 = vmatprep.subr.bf16.mxu0 %v2847_v30 }
 0x321   : > { %2422 = vmatmul.mubr.msk.bf16.vlgmr.msra.gmra.mrb[36].mxu0 %vm609_vm3, %v1611_v40 }
 0x322   : > { %2435 = vmatprep.mubr.msk.bf16.mxu0 %vm2848_vm1, %v2847_v30 }
 0x352   : > { %v650_v41 = vpop.f32.mrb[8].mxu0 }
 0x353   : > { %v2339_v42 = vpop.f32.mrb[9].mxu0  ;;  %v658_v43 = vsel %vm657_vm4, %v650_v41, -inf }
 0x354   : > { %659 = vmax.xlane.f32.xlu0 %v658_v43  ;;  %v653_v44 = vpop.f32.mrb[10].mxu0 }
 0x355   : > { %v2340_v45 = vpop.f32.mrb[11].mxu0  ;;  %v661_v46 = vsel %vm657_vm4, %v653_v44, -inf }
 0x356   : > { %662 = vmax.xlane.f32.xlu1 %v661_v46 }
 0x3c4   : > { %v3156_v47 = vpop.f32.mrb[12].mxu0 }
 0x3c5   : > { %v2351_v48 = vpop.f32.mrb[13].mxu0  ;;  %v798_v49 = vsel %vm657_vm4, %v3156_v47, -inf }
 0x3c6   : > { %799 = vmax.xlane.f32.xlu0 %v798_v49  ;;  %v3160_v50 = vpop.f32.mrb[14].mxu0 }
 0x3c7   : > { %v2352_v51 = vpop.f32.mrb[15].mxu0  ;;  %v801_v52 = vsel %vm657_vm4, %v3160_v50, -inf }
 0x3ca   : > { %802 = vmax.xlane.f32.xlu0 %v801_v52 }
 0x3cc   : > { %v3164_v53 = vpop.f32.mrb[16].mxu0 }
 0x3cd   : > { %v2363_v54 = vpop.f32.mrb[17].mxu0  ;;  %v942_v55 = vsel %vm657_vm4, %v3164_v53, -inf }
 0x3ce   : > { %943 = vmax.xlane.f32.xlu0 %v942_v55  ;;  %v3168_v56 = vpop.f32.mrb[18].mxu0 }
 0x3cf   : > { %v2364_v57 = vpop.f32.mrb[19].mxu0  ;;  %v945_v58 = vsel %vm657_vm4, %v3168_v56, -inf }
 0x3d0   : > { %946 = vmax.xlane.f32.xlu1 %v945_v58 }
 0x3d4   : > { %v3172_v59 = vpop.f32.mrb[20].mxu0 }
 0x3d5   : > { %v2375_v60 = vpop.f32.mrb[21].mxu0  ;;  %v1086_v61 = vsel %vm657_vm4, %v3172_v59, -inf }
 0x3d6   : > { %1087 = vmax.xlane.f32.xlu0 %v1086_v61  ;;  %v3176_v62 = vpop.f32.mrb[22].mxu0 }
 0x3d7   : > { %v2376_v63 = vpop.f32.mrb[23].mxu0  ;;  %v1089_v0 = vsel %vm657_vm4, %v3176_v62, -inf }
 0x3d8   : > { %1090 = vmax.xlane.f32.xlu1 %v1089_v0 }
 0x3dc   : > { %v3180_v2 = vpop.f32.mrb[24].mxu0 }
 0x3dd   : > { %v2387_v4 = vpop.f32.mrb[25].mxu0  ;;  %v1230_v5 = vsel %vm657_vm4, %v3180_v2, -inf }
 0x3de   : > { %1231 = vmax.xlane.f32.xlu1 %v1230_v5  ;;  %v3186_v6 = vpop.f32.mrb[26].mxu0 }
 0x3df   : > { %v2388_v8 = vpop.f32.mrb[27].mxu0  ;;  %v1233_v10 = vsel %vm657_vm4, %v3186_v6, -inf }
 0x3e1   : > { %v3190_v9 = vpop.xlane.xlu0 %659 }
 0x3e2   : > { %v670_v11 = vsub.f32 %v650_v41, %v3190_v9  ;;  %1234 = vmax.xlane.f32.xlu1 %v1233_v10 }
 0x3e3   : > { %v3195_v12 = vpop.xlane.xlu1 %662 }
 0x3e4   : > { %v672_v13 = vmul.f32 1.442695, %v670_v11  ;;  %v671_v14 = vsub.f32 %v653_v44, %v3195_v12  ;;  %v3198_v16 = vpop.f32.mrb[28].mxu0 }
 0x3e5   : > { %v2399_v17 = vpop.f32.mrb[29].mxu0  ;;  %v1374_v18 = vsel %vm657_vm4, %v3198_v16, -inf }
 0x3e6   : > { %v674_v19 = vmul.f32 1.442695, %v671_v14  ;;  %1375 = vmax.xlane.f32.xlu0 %v1374_v18  ;;  %v3202_v20 = vpop.f32.mrb[30].mxu0  ;;  %2584 = vpow2.f32 %v672_v13 }
 0x3e7   : > { %v2400_v21 = vpop.f32.mrb[31].mxu0  ;;  %v1377_v22 = vsel %vm657_vm4, %v3202_v20, -inf }
 0x3e8   : > { %1378 = vmax.xlane.f32.xlu1 %v1377_v22  ;;  %2586 = vpow2.f32 %v674_v19 }
 0x3ec   : > { %v3206_v23 = vpop.f32.mrb[32].mxu0 }
 0x3ed   : > { %v2411_v24 = vpop.f32.mrb[33].mxu0  ;;  %v1518_v25 = vsel %vm657_vm4, %v3206_v23, -inf }
 0x3ee   : > { %1519 = vmax.xlane.f32.xlu1 %v1518_v25  ;;  %v3210_v26 = vpop.f32.mrb[34].mxu0 }
 0x3ef   : > { %v2412_v27 = vpop.f32.mrb[35].mxu0  ;;  %v1521_v28 = vsel %vm657_vm4, %v3210_v26, -inf }
 0x3f0   : > { %v3214_v29 = vpop.eup %2584 }
 0x3f2   : > { %1522 = vmax.xlane.f32.xlu1 %v1521_v28  ;;  %v3216_v31 = vpop.eup %2586 }
 0x3f3   : > { %v686_v32 = vpack.c.bf16 %v3216_v31, %v3214_v29 }
 0x3f4   : > { %v3220_v33 = vpop.f32.mrb[36].mxu0 }
 0x3f5   : > { %v2423_v34 = vpop.f32.mrb[37].mxu0  ;;  %2344 = vmatmul.mubr.msk.bf16.vlgmr.msra.gmra.mrb[0].mxu1 %vm657_vm4, %v686_v32  ;;  %v1662_v38 = vsel %vm657_vm4, %v3220_v33, -inf }
 0x3f6   : > { %v3223_v35 = vpop.f32.mrb[38].mxu0  ;;  %2354 = vmatpush3.bf16.msra.mxu1 %v828_v1  ;;  %2355 = vmatprep.mubr.msk.bf16.mxu1 %vm2848_vm1, %v2847_v30 }
 0x3f7   : > { %v2424_v36 = vpop.f32.mrb[39].mxu0  ;;  %v1665_v37 = vsel %vm657_vm4, %v3223_v35, -inf  ;;  %2365 = vmatprep.subr.bf16.mxu1 %v2847_v30 }
 0x3f8   : > { %1666 = vmax.xlane.f32.xlu1 %v1665_v37 }
 0x3fc   : > { %1259 = vrot.lane.b32.xlu0 %v3097_v15, %s2859_s11  ;;  %s2870_s11 = smov [#allocation10]  }
 0x409   : > { %1403 = vrot.lane.b32.xlu1 %v3097_v15, %s2860_s24  ;;  %s2758_s24 = sshll.u32 %s2870_s11, 4  ;;  %s2759_s24 = int_to_ptr.vmem [resolvable:$false] %s2758_s24 }
 0x41b   : > { %1663 = vmax.xlane.f32.xlu0 %v1662_v38 }
 0x431   : > { %1547 = vrot.lane.b32.xlu0 %v3097_v15, %s2861_s14  ;;  %s364_s14 = sand.u32 1, %s2824_s28  }
 0x435   : > { %1691 = vrot.lane.b32.xlu0 %v3097_v15, %s2862_s19  ;;  %s2213_s19 = sshll.u32 %s364_s14, 4 }
 0x453   : > { %v3236_v39 = vpop.xlane.xlu0 %799 }
 0x454   : > { %v810_v40 = vsub.f32 %v3156_v47, %v3236_v39 }
 0x456   : > { %v812_v41 = vmul.f32 1.442695, %v810_v40 }
 0x457   : > { %v3240_v42 = vpop.xlane.xlu0 %802 }
 0x458   : > { %v811_v43 = vsub.f32 %v3160_v50, %v3240_v42  ;;  %2588 = vpow2.f32 %v812_v41 }
 0x45a   : > { %v814_v44 = vmul.f32 1.442695, %v811_v43 }
 0x45b   : > { %v3244_v45 = vpop.xlane.xlu0 %943 }
 0x45c   : > { %v954_v46 = vsub.f32 %v3164_v53, %v3244_v45  ;;  %2590 = vpow2.f32 %v814_v44 }
 0x45d   : > { %v3248_v15 = vpop.xlane.xlu1 %946 }
 0x45e   : > { %v956_v48 = vmul.f32 1.442695, %v954_v46  ;;  %v955_v47 = vsub.f32 %v3168_v56, %v3248_v15 }
 0x460   : > { %v958_v49 = vmul.f32 1.442695, %v955_v47  ;;  %2592 = vpow2.f32 %v956_v48 }
 0x462   : > { %v2589_v51 = vpop.eup %2588  ;;  %2594 = vpow2.f32 %v958_v49 }
 0x463   : > { %v3252_v52 = vpop.xlane.xlu0 %1087  ;;  %v818_v54 = vsel %vm657_vm4, %v2589_v51, 0.0 }
 0x464   : > { %v1098_v50 = vsub.f32 %v3172_v59, %v3252_v52  ;;  %819 = vadd.xlane.f32.xlu0 %v818_v54 }
 0x465   : > { %v3257_v53 = vpop.xlane.xlu1 %1090 }
 0x466   : > { %v1100_v55 = vmul.f32 1.442695, %v1098_v50  ;;  %v1099_v57 = vsub.f32 %v3176_v62, %v3257_v53  ;;  %v2591_v58 = vpop.eup %2590 }
 0x467   : > { %v821_v60 = vsel %vm657_vm4, %v2591_v58, 0.0  ;;  %v826_v61 = vpack.c.bf16 %v2591_v58, %v2589_v51 }
 0x468   : > { %v1102_v56 = vmul.f32 1.442695, %v1099_v57  ;;  %2596 = vpow2.f32 %v1100_v55  ;;  %822 = vadd.xlane.f32.xlu1 %v821_v60  ;;  %v681_v60 = vsel %vm657_vm4, %v3216_v31, 0.0 }
 0x469   : > { %2356 = vmatmul.mubr.msk.bf16.vlgmr.msra.gmra.mrb[4].mxu1 %vm657_vm4, %v826_v61 }
 0x46a   : > { %v2593_v63 = vpop.eup %2592  ;;  %2598 = vpow2.f32 %v1102_v56  ;;  %2366 = vmatpush3.bf16.msra.mxu1 %v3182_v3  ;;  %2367 = vmatprep.mubr.msk.bf16.mxu1 %vm2848_vm1, %v2847_v30 }
 0x46b   : > { %v3263_v59 = vpop.xlane.xlu1 %1231  ;;  %v962_v62 = vsel %vm657_vm4, %v2593_v63, 0.0  ;;  %2377 = vmatprep.subr.bf16.mxu1 %v2847_v30 }
 0x46c   : > { %v1242_v0 = vsub.f32 %v3180_v2, %v3263_v59  ;;  %v2595_v1 = vpop.eup %2594  ;;  %963 = vadd.xlane.f32.xlu0 %v962_v62 }
 0x46d   : > { %v970_v5 = vpack.c.bf16 %v2595_v1, %v2593_v63  ;;  %v965_v3 = vsel %vm657_vm4, %v2595_v1, 0.0 }
 0x46e   : > { %v1244_v4 = vmul.f32 1.442695, %v1242_v0 }
 0x46f   : > { %v3272_v8 = vpop.xlane.xlu1 %1234 }
 0x470   : > { %v1243_v10 = vsub.f32 %v3186_v6, %v3272_v8  ;;  %2600 = vpow2.f32 %v1244_v4  ;;  %966 = vadd.xlane.f32.xlu0 %v965_v3 }
 0x471   : > { %2368 = vmatmul.mubr.msk.bf16.vlgmr.msra.gmra.mrb[8].mxu1 %vm657_vm4, %v970_v5 }
 0x472   : > { %v1246_v2 = vmul.f32 1.442695, %v1243_v10  ;;  %v2597_v11 = vpop.eup %2596  ;;  %2378 = vmatpush3.bf16.msra.mxu1 %v3188_v7  ;;  %2379 = vmatprep.mubr.msk.bf16.mxu1 %vm2848_vm1, %v2847_v30 }
 0x473   : > { %v3278_v13 = vpop.xlane.xlu0 %1375  ;;  %v1106_v17 = vsel %vm657_vm4, %v2597_v11, 0.0  ;;  %2389 = vmatprep.subr.bf16.mxu1 %v2847_v30 }
 0x474   : > { %v1386_v14 = vsub.f32 %v3198_v16, %v3278_v13  ;;  %v2599_v6 = vpop.eup %2598  ;;  %2602 = vpow2.f32 %v1246_v2  ;;  %1107 = vadd.xlane.f32.xlu0 %v1106_v17  ;;  %v805_v17 = vsub.f32 -inf, %v3240_v42 }
 0x475   : > { %v3286_v18 = vpop.xlane.xlu1 %1378  ;;  %v1109_v7 = vsel %vm657_vm4, %v2599_v6, 0.0  ;;  %v1114_v22 = vpack.c.bf16 %v2599_v6, %v2597_v11 }
 0x476   : > { %v1388_v19 = vmul.f32 1.442695, %v1386_v14  ;;  %v1387_v21 = vsub.f32 %v3202_v20, %v3286_v18  ;;  %1110 = vadd.xlane.f32.xlu1 %v1109_v7  ;;  %v804_v14 = vsub.f32 -inf, %v3236_v39  ;;  %v949_v7 = vsub.f32 -inf, %v3248_v15 }
 0x477   : > { %v1260_v24 = vpop.permute.xlu0 %1259  ;;  %v1093_v39 = vsub.f32 -inf, %v3257_v53 }
 0x478   : > { %v1390_v16 = vmul.f32 1.442695, %v1387_v21  ;;  %2604 = vpow2.f32 %v1388_v19  ;;  %v806_v6 = vmul.f32 1.442695, %v804_v14  ;;  %v808_v19 = vmul.f32 1.442695, %v805_v17 }
 0x479   : > { %2380 = vmatmul.mubr.msk.bf16.vlgmr.msra.gmra.mrb[12].mxu1 %vm657_vm4, %v1114_v22  ;;  %v948_v21 = vsub.f32 -inf, %v3244_v45  ;;  %v1096_v15 = vmul.f32 1.442695, %v1093_v39 }
 0x47a   : > { %v2601_v25 = vpop.eup %2600  ;;  %2606 = vpow2.f32 %v1390_v16  ;;  %2390 = vmatpush3.bf16.msra.mxu1 %v1260_v24  ;;  %2391 = vmatprep.mubr.msk.bf16.mxu1 %vm2848_vm1, %v2847_v30  ;;  %v952_v16 = vmul.f32 1.442695, %v949_v7 }
 0x47b   : > { %v3293_v27 = vpop.xlane.xlu1 %1519  ;;  %v1250_v32 = vsel %vm657_vm4, %v2601_v25, 0.0  ;;  %2401 = vmatprep.subr.bf16.mxu1 %v2847_v30  ;;  %v950_v22 = vmul.f32 1.442695, %v948_v21 }
 0x47c   : > { %v1530_v28 = vsub.f32 %v3206_v23, %v3293_v27  ;;  %1251 = vadd.xlane.f32.xlu0 %v1250_v32 }
 0x47e   : > { %v1532_v20 = vmul.f32 1.442695, %v1530_v28  ;;  %v2603_v34 = vpop.eup %2602 }
 0x47f   : > { %v3301_v36 = vpop.xlane.xlu1 %1522  ;;  %v1253_v38 = vsel %vm657_vm4, %v2603_v34, 0.0  ;;  %v1258_v23 = vpack.c.bf16 %v2603_v34, %v2601_v25  ;;  %v1092_v25 = vsub.f32 -inf, %v3252_v52  ;;  %v664_v52 = vsub.f32 -inf, %v3190_v9 }
 0x480   : > { %v1531_v37 = vsub.f32 %v3210_v26, %v3301_v36  ;;  %2608 = vpow2.f32 %v1532_v20  ;;  %1254 = vadd.xlane.f32.xlu1 %v1253_v38  ;;  %v665_v38 = vsub.f32 -inf, %v3195_v12 }
 0x481   : > { %2392 = vmatmul.mubr.msk.bf16.vlgmr.msra.gmra.mrb[16].mxu1 %vm657_vm4, %v1258_v23  ;;  %v1094_v20 = vmul.f32 1.442695, %v1092_v25  ;;  %v1236_v23 = vsub.f32 -inf, %v3263_v59  ;;  %v666_v59 = vmul.f32 1.442695, %v664_v52 }
 0x482   : > { %v1534_v40 = vmul.f32 1.442695, %v1531_v37  ;;  %v2605_v41 = vpop.eup %2604  ;;  %2403 = vmatprep.mubr.msk.bf16.mxu1 %vm2848_vm1, %v2847_v30  ;;  %v668_v53 = vmul.f32 1.442695, %v665_v38 }
 0x483   : > { %v1394_v43 = vsel %vm657_vm4, %v2605_v41, 0.0 }
 0x484   : > { %v2607_v44 = vpop.eup %2606  ;;  %2610 = vpow2.f32 %v1534_v40  ;;  %1395 = vadd.xlane.f32.xlu0 %v1394_v43 }
 0x485   : > { %v3310_v46 = vpop.xlane.xlu1 %1666  ;;  %v1397_v48 = vsel %vm657_vm4, %v2607_v44, 0.0  ;;  %v1402_v47 = vpack.c.bf16 %v2607_v44, %v2605_v41 }
 0x486   : > { %v1675_v26 = vsub.f32 %v3223_v35, %v3310_v46  ;;  %1398 = vadd.xlane.f32.xlu1 %v1397_v48  ;;  %v1237_v48 = vsub.f32 -inf, %v3272_v8 }
 0x488   : > { %v1678_v49 = vmul.f32 1.442695, %v1675_v26 }
 0x489   : > { %v1404_v51 = vpop.permute.xlu1 %1403 }
 0x48a   : > { %2402 = vmatpush3.bf16.msra.mxu1 %v1404_v51  ;;  %v2609_v50 = vpop.eup %2608  ;;  %2612 = vpow2.f32 %v1678_v49 }
 0x48b   : > { %2413 = vmatprep.subr.bf16.mxu1 %v2847_v30  ;;  %v1538_v54 = vsel %vm657_vm4, %v2609_v50, 0.0 }
 0x48c   : > { %1539 = vadd.xlane.f32.xlu0 %v1538_v54  ;;  %v1240_v54 = vmul.f32 1.442695, %v1237_v48 }
 0x48d   : > { %2404 = vmatmul.mubr.msk.bf16.vlgmr.msra.gmra.mrb[20].mxu1 %vm657_vm4, %v1402_v47  ;;  %v1238_v47 = vmul.f32 1.442695, %v1236_v23 }
 0x48e   : > { %2415 = vmatprep.mubr.msk.bf16.mxu1 %vm2848_vm1, %v2847_v30  ;;  %v2611_v35 = vpop.eup %2610 }
 0x48f   : > { %v1541_v55 = vsel %vm657_vm4, %v2611_v35, 0.0  ;;  %v1546_v57 = vpack.c.bf16 %v2611_v35, %v2609_v50 }
 0x490   : > { %1542 = vadd.xlane.f32.xlu1 %v1541_v55 }
 0x494   : > { %v2613_v58 = vpop.eup %2612 }
 0x495   : > { %v1685_v56 = vsel %vm657_vm4, %v2613_v58, 0.0 }
 0x496   : > { %1686 = vadd.xlane.f32.xlu1 %v1685_v56  ;;  %v1380_v56 = vsub.f32 -inf, %v3278_v13 }
 0x49a   : > { %682 = vadd.xlane.f32.xlu1 %v681_v60 }
 0x4a8   : > { %v3324_v61 = vpop.xlane.xlu0 %1663 }
 0x4a9   : > { %v1674_v63 = vsub.f32 %v3220_v33, %v3324_v61  ;;  %v678_v33 = vsel %vm657_vm4, %v3214_v29, 0.0 }
 0x4ab   : > { %v1676_v0 = vmul.f32 1.442695, %v1674_v63 }
 0x4ac   : > { %v1548_v62 = vpop.permute.xlu0 %1547 }
 0x4ad   : > { %2414 = vmatpush3.bf16.msra.mxu1 %v1548_v62  ;;  %2614 = vpow2.f32 %v1676_v0  ;;  %v1381_v62 = vsub.f32 -inf, %v3286_v18 }
 0x4ae   : > { %2425 = vmatprep.subr.bf16.mxu1 %v2847_v30  ;;  %2616 = vpow2.f32 %v806_v6 }
 0x4af   : > { %2618 = vpow2.f32 %v808_v19 }
 0x4b0   : > { %v1692_v1 = vpop.permute.xlu0 %1691  ;;  %2416 = vmatmul.mubr.msk.bf16.vlgmr.msra.gmra.mrb[24].mxu1 %vm657_vm4, %v1546_v57  ;;  %2620 = vpow2.f32 %v950_v22 }
 0x4b1   : > { %2426 = vmatpush3.bf16.msra.mxu1 %v1692_v1  ;;  %2427 = vmatprep.mubr.msk.bf16.mxu1 %vm2848_vm1, %v2847_v30  ;;  %2622 = vpow2.f32 %v952_v16 }
 0x4b2   : > { %2439 = vmatprep.subr.bf16.mxu1 %v2847_v30  ;;  %2624 = vpow2.f32 %v1094_v20 }
 0x4b3   : > { %2626 = vpow2.f32 %v1096_v15 }
 0x4b7   : > { %v2615_v31 = vpop.eup %2614 }
 0x4b8   : > { %v1682_v4 = vsel %vm657_vm4, %v2615_v31, 0.0  ;;  %v1690_v5 = vpack.c.bf16 %v2613_v58, %v2615_v31  ;;  %v2617_v32 = vpop.eup %2616 }
 0x4b9   : > { %1683 = vadd.xlane.f32.xlu0 %v1682_v4  ;;  %v2619_v42 = vpop.eup %2618  ;;  %v816_v37 = vmul.f32 0.0, %v2617_v32 }
 0x4ba   : > { %2428 = vmatmul.mubr.msk.bf16.vlgmr.msra.gmra.mrb[28].mxu1 %vm657_vm4, %v1690_v5  ;;  %v817_v41 = vmul.f32 0.0, %v2619_v42  ;;  %v2621_v26 = vpop.eup %2620 }
 0x4bb   : > { %2455 = vmatprep.mubr.msk.bf16.mxu1 %vm2848_vm1, %v2847_v30  ;;  %v2623_v12 = vpop.eup %2622  ;;  %v960_v50 = vmul.f32 0.0, %v2621_v26 }
 0x4bc   : > { %v961_v9 = vmul.f32 0.0, %v2623_v12  ;;  %v2625_v8 = vpop.eup %2624 }
 0x4bd   : > { %679 = vadd.xlane.f32.xlu0 %v678_v33  ;;  %v2627_v0 = vpop.eup %2626  ;;  %v1104_v33 = vmul.f32 0.0, %v2625_v8 }
 0x4be   : > { %v1105_v21 = vmul.f32 0.0, %v2627_v0 }
 0x4c8   : > { %v3339_v10 = vpop.f32.mrb[0].mxu1 }
 0x4c9   : > { %v2345_v3 = vpop.f32.mrb[1].mxu1 }
 0x4ca   : > { %v3341_v2 = vpop.f32.mrb[2].mxu1 }
 0x4cb   : > { %v2346_v11 = vpop.f32.mrb[3].mxu1 }
 0x4cc   : > { %v1382_v11 = vmul.f32 1.442695, %v1380_v56 }
 0x4f1   : > { %v820_v29 = vpop.xlane.xlu0 %819 }
 0x4f2   : > { %v824_v40 = vadd.f32 %v820_v29, %v816_v37  ;;  %v1384_v29 = vmul.f32 1.442695, %v1381_v62 }
 0x4f4   : > { %2628 = vrcp.f32 %v824_v40 }
 0x4f5   : > { %v823_v28 = vpop.xlane.xlu1 %822 }
 0x4f6   : > { %v825_v44 = vadd.f32 %v823_v28, %v817_v41 }
 0x4f8   : > { %2630 = vrcp.f32 %v825_v44 }
 0x4f9   : > { %v964_v24 = vpop.xlane.xlu0 %963  ;;  %2632 = vpow2.f32 %v668_v53 }
 0x4fa   : > { %2634 = vpow2.f32 %v1238_v47  ;;  %v968_v35 = vadd.f32 %v964_v24, %v960_v50 }
 0x4fb   : > { %2636 = vpow2.f32 %v666_v59 }
 0x4fc   : > { %2638 = vpow2.f32 %v1240_v54 }
 0x4fd   : > { %v967_v45 = vpop.xlane.xlu0 %966  ;;  %2640 = vrcp.f32 %v968_v35 }
 0x4fe   : > { %v969_v58 = vadd.f32 %v967_v45, %v961_v9  ;;  %v2629_v5 = vpop.eup %2628 }
 0x500   : > { %2642 = vrcp.f32 %v969_v58 }
 0x501   : > { %v1108_v49 = vpop.xlane.xlu0 %1107  ;;  %2644 = vpow2.f32 %v1382_v11 }
 0x502   : > { %v2631_v13 = vpop.eup %2630  ;;  %v1112_v19 = vadd.f32 %v1108_v49, %v1104_v33 }
 0x503   : > { %v1111_v34 = vpop.xlane.xlu1 %1110  ;;  %v2633_v7 = vpop.eup %2632 }
 0x504   : > { %v2635_v16 = vpop.eup %2634  ;;  %v1113_v24 = vadd.f32 %v1111_v34, %v1105_v21  ;;  %v677_v39 = vmul.f32 0.0, %v2633_v7  ;;  %2646 = vrcp.f32 %v1112_v19 }
 0x505   : > { %v2637_v32 = vpop.eup %2636  ;;  %2648 = vpow2.f32 %v1384_v29 }
 0x506   : > { %v2639_v20 = vpop.eup %2638  ;;  %2650 = vrcp.f32 %v1113_v24  ;;  %v676_v48 = vmul.f32 0.0, %v2637_v32  ;;  %v736_v7 = vadd.f32 %v3341_v2, %v677_v39 }
 0x507   : > { %v2641_v23 = vpop.eup %2640  ;;  %v1249_v47 = vmul.f32 0.0, %v2639_v20 }
 0x508   : > { %v735_v19 = vadd.f32 %v3339_v10, %v676_v48  ;;  %v1524_v10 = vsub.f32 -inf, %v3293_v27  ;;  %v1668_v27 = vsub.f32 -inf, %v3324_v61 }
 0x509   : > { %v1252_v55 = vpop.xlane.xlu0 %1251 }
 0x50a   : > { %v2643_v53 = vpop.eup %2642 }
 0x50b   : > { %v2645_v58 = vpop.eup %2644 }
 0x50d   : > { %v3351_v43 = vpop.xlane.xlu1 %1254 }
 0x50e   : > { %v1257_v59 = vadd.f32 %v3351_v43, %v1249_v47 }
 0x511   : > { %v3360_v60 = vpop.xlane.xlu0 %1395 }
 0x513   : > { %v3355_v51 = vpop.xlane.xlu1 %1398 }
 0x519   : > { %v3365_v22 = vpop.xlane.xlu0 %1539 }
 0x51d   : > { %v3357_v57 = vpop.xlane.xlu1 %1542 }
 0x523   : > { %v3363_v1 = vpop.xlane.xlu1 %1686 }
 0x527   : > { %v683_v25 = vpop.xlane.xlu1 %682 }
 0x528   : > { %v685_v40 = vadd.f32 %v683_v25, %v677_v39 }
 0x52a   : > { %2652 = vrcp.f32 %v685_v40 }
 0x53c   : > { %v867_v63 = vpop.f32.mrb[4].mxu1 }
 0x53d   : > { %v874_v31 = vadd.f32 %v867_v63, %v816_v37  ;;  %v2357_v4 = vpop.f32.mrb[5].mxu1  ;;  %v1248_v37 = vmul.f32 0.0, %v2635_v16 }
 0x53e   : > { %v870_v3 = vpop.f32.mrb[6].mxu1  ;;  %v1392_v4 = vmul.f32 0.0, %v2645_v58 }
 0x53f   : > { %v878_v14 = vmul.f32 %v2629_v5, %v874_v31  ;;  %v875_v17 = vadd.f32 %v870_v3, %v817_v41  ;;  %v2358_v6 = vpop.f32.mrb[7].mxu1  ;;  %v1256_v41 = vadd.f32 %v1252_v55, %v1248_v37 }
 0x540   : > { %v1400_v3 = vadd.f32 %v3360_v60, %v1392_v4 }
 0x541   : > { %v879_v18 = vmul.f32 %v2631_v13, %v875_v17  ;;  %2654 = vrcp.f32 %v1256_v41 }
 0x543   : > { %v880_v28 = vpack.c.bf16 %v879_v18, %v878_v14 }
 0x544   : > { %v1011_v42 = vpop.f32.mrb[8].mxu1 }
 0x545   : > { %v1018_v45 = vadd.f32 %v1011_v42, %v960_v50  ;;  %v2369_v38 = vpop.f32.mrb[9].mxu1  ;;  %882 = vrot.lane.b32.xlu0 %v880_v28, %s2863_s16 }
 0x546   : > { %v3367_v15 = vpop.xlane.xlu0 %1683  ;;  %v1014_v34 = vpop.f32.mrb[10].mxu1 }
 0x547   : > { %v1022_v52 = vmul.f32 %v2641_v23, %v1018_v45  ;;  %v1019_v44 = vadd.f32 %v1014_v34, %v961_v9  ;;  %v2370_v26 = vpop.f32.mrb[11].mxu1  ;;  %v2647_v9 = vpop.eup %2646  ;;  %v1525_v23 = vsub.f32 -inf, %v3301_v36 }
 0x548   : > { %v2649_v63 = vpop.eup %2648  ;;  %v1526_v26 = vmul.f32 1.442695, %v1524_v10  ;;  %v2696_v10 = vld [vmem:[%s3055_s13 + $0x8] sm:$0xff] }
 0x549   : > { %v1023_v49 = vmul.f32 %v2643_v53, %v1019_v44  ;;  %v2651_v43 = vpop.eup %2650  ;;  %v1393_v11 = vmul.f32 0.0, %v2649_v63 }
 0x54a   : > { %v680_v12 = vpop.xlane.xlu0 %679  ;;  %v2653_v17 = vpop.eup %2652 }
 0x54b   : > { %v684_v50 = vadd.f32 %v680_v12, %v676_v48  ;;  %v1024_v54 = vpack.c.bf16 %v1023_v49, %v1022_v52  ;;  %v2655_v13 = vpop.eup %2654  ;;  %v740_v24 = vmul.f32 %v2653_v17, %v736_v7  ;;  %v1528_v48 = vmul.f32 1.442695, %v1525_v23 }
 0x54c   : > { %v1155_v35 = vpop.f32.mrb[12].mxu1  ;;  %v1669_v49 = vsub.f32 -inf, %v3310_v46  ;;  %v1670_v12 = vmul.f32 1.442695, %v1668_v27 }
 0x54d   : > { %2656 = vrcp.f32 %v684_v50  ;;  %v1162_v8 = vadd.f32 %v1155_v35, %v1104_v33  ;;  %v2381_v56 = vpop.f32.mrb[13].mxu1  ;;  %1026 = vrot.lane.b32.xlu1 %v1024_v54, %s2864_s21  ;;  %v1401_v33 = vadd.f32 %v3355_v51, %v1393_v11 }
 0x54e   : > { %2658 = vrcp.f32 %v1257_v59  ;;  %v1158_v55 = vpop.f32.mrb[14].mxu1  ;;  %v1672_v59 = vmul.f32 1.442695, %v1669_v49 }
 0x54f   : > { %v1166_v0 = vmul.f32 %v2647_v9, %v1162_v8  ;;  %v1163_v62 = vadd.f32 %v1158_v55, %v1105_v21  ;;  %v2382_v31 = vpop.f32.mrb[15].mxu1  ;;  %2660 = vrcp.f32 %v1400_v3 }
 0x550   : > { %2662 = vrcp.f32 %v1401_v33 }
 0x551   : > { %v1167_v5 = vmul.f32 %v2651_v43, %v1163_v62  ;;  %2664 = vpow2.f32 %v1526_v26 }
 0x552   : > { %2666 = vpow2.f32 %v1528_v48 }
 0x553   : > { %v1168_v14 = vpack.c.bf16 %v1167_v5, %v1166_v0  ;;  %2668 = vpow2.f32 %v1670_v12 }
 0x554   : > { %v1299_v6 = vpop.f32.mrb[16].mxu1  ;;  %2670 = vpow2.f32 %v1672_v59 }
 0x555   : > { %v1306_v29 = vadd.f32 %v1299_v6, %v1248_v37  ;;  %v2393_v18 = vpop.f32.mrb[17].mxu1  ;;  %1170 = vrot.lane.b32.xlu1 %v1168_v14, %s2865_s23 }
 0x556   : > { %v1302_v16 = vpop.f32.mrb[18].mxu1 }
 0x557   : > { %v2657_v21 = vpop.eup %2656  ;;  %v1310_v25 = vmul.f32 %v2655_v13, %v1306_v29  ;;  %v1307_v28 = vadd.f32 %v1302_v16, %v1249_v47  ;;  %v2394_v32 = vpop.f32.mrb[19].mxu1 }
 0x558   : > { %v739_v60 = vmul.f32 %v2657_v21, %v735_v19  ;;  %v2659_v42 = vpop.eup %2658 }
 0x559   : > { %v1311_v51 = vmul.f32 %v2659_v42, %v1307_v28  ;;  %v2661_v38 = vpop.eup %2660 }
 0x55a   : > { %v741_v20 = vpack.c.bf16 %v740_v24, %v739_v60  ;;  %v2663_v44 = vpop.eup %2662 }
 0x55b   : > { %v1312_v45 = vpack.c.bf16 %v1311_v51, %v1310_v25  ;;  %v2665_v36 = vpop.eup %2664 }
 0x55c   : > { %742 = vst.msk [vmem:[#allocation4] sm:$0xff] %vm609_vm3, %v741_v20  ;;  %v2667_v50 = vpop.eup %2666  ;;  %v1536_v54 = vmul.f32 0.0, %v2665_v36 }
 0x55d   : > { %1314 = vrot.lane.b32.xlu1 %v1312_v45, %s2866_s20  ;;  %v1537_v58 = vmul.f32 0.0, %v2667_v50  ;;  %v2669_v56 = vpop.eup %2668  ;;  %s2268_s20 = sshll.u32 %s2832_s30, 8  ;;  %s3454_s30 = scalar_lea.sflag [#allocation7], %s364_s14 }
 0x55e   : > { %v1544_v35 = vadd.f32 %v3365_v22, %v1536_v54  ;;  %v2671_v9 = vpop.eup %2670  ;;  %v1680_v55 = vmul.f32 0.0, %v2669_v56  ;;  %v2245_v56 = vld [vmem:[#allocation5 + $0x5] ss:$0 sm:$0xff]  ;;  %s3447_s12 = scalar_lea.hbm %s3509_s8, %s2268_s20 }
 0x55f   : > { %v1545_v8 = vadd.f32 %v3357_v57, %v1537_v58  ;;  %v1681_v61 = vmul.f32 0.0, %v2671_v9 }
 0x560   : > { %v1443_v2 = vpop.f32.mrb[20].mxu1  ;;  %2672 = vrcp.f32 %v1544_v35  ;;  %v1688_v46 = vadd.f32 %v3367_v15, %v1680_v55 }
 0x561   : > { %v1450_v39 = vadd.f32 %v1443_v2, %v1392_v4  ;;  %v2405_v37 = vpop.f32.mrb[21].mxu1  ;;  %2674 = vrcp.f32 %v1545_v8  ;;  %v1689_v0 = vadd.f32 %v3363_v1, %v1681_v61 }
 0x562   : > { %v1446_v40 = vpop.f32.mrb[22].mxu1  ;;  %2676 = vrcp.f32 %v1688_v46 }
 0x563   : > { %v1454_v34 = vmul.f32 %v2661_v38, %v1450_v39  ;;  %v1451_v41 = vadd.f32 %v1446_v40, %v1393_v11  ;;  %v2406_v52 = vpop.f32.mrb[23].mxu1  ;;  %2678 = vrcp.f32 %v1689_v0  ;;  %v2697_v39 = vld [vmem:[%s3055_s13] sm:$0xff] }
 0x565   : > { %v1455_v53 = vmul.f32 %v2663_v44, %v1451_v41 }
 0x567   : > { %v1456_v47 = vpack.c.bf16 %v1455_v53, %v1454_v34 }
 0x569   : > { %1458 = vrot.lane.b32.xlu0 %v1456_v47, %s2867_s22  ;;  %s366_s22 = scalar_lea.vmem [#allocation10], %s2213_s19  ;;  %s2760_s19 = scalar_lea.vmem %s2759_s24, 512 }
 0x56a   : > { %v2673_v43 = vpop.eup %2672 }
 0x56b   : > { %v2675_v57 = vpop.eup %2674 }
 0x56c   : > { %v2677_v6 = vpop.eup %2676 }
 0x56d   : > { %v2679_v29 = vpop.eup %2678 }
 0x583   : > { %v1587_v63 = vpop.f32.mrb[24].mxu1 }
 0x584   : > { %v1594_v62 = vadd.f32 %v1587_v63, %v1536_v54  ;;  %v2417_v31 = vpop.f32.mrb[25].mxu1 }
 0x585   : > { %v1590_v4 = vpop.f32.mrb[26].mxu1 }
 0x586   : > { %v1598_v22 = vmul.f32 %v2673_v43, %v1594_v62  ;;  %v1595_v5 = vadd.f32 %v1590_v4, %v1537_v58  ;;  %v2418_v3 = vpop.f32.mrb[27].mxu1  ;;  %v2244_v58 = vld [vmem:[#allocation5 + $0x4] ss:$0 sm:$0xff] }
 0x588   : > { %v1599_v11 = vmul.f32 %v2675_v57, %v1595_v5 }
 0x58a   : > { %v1600_v14 = vpack.c.bf16 %v1599_v11, %v1598_v22 }
 0x58c   : > { %1602 = vrot.lane.b32.xlu1 %v1600_v14, %s2868_s9  ;;  %s2091_s9 = sshll.u32 %s366_s22, 4  ;;  %s3451_s9 = int_to_ptr.vmem [resolvable:$true] %s2091_s9 }
 0x58d   : > { %v1731_v17 = vpop.f32.mrb[28].mxu1  ;;  %s2754_s25 = scalar_lea.vmem %s3451_s9, 256  ;;  %p2761_p2 = scmp.lt.s32.totalorder %s3451_s9, %s2759_s24 }
 0x58e   : > { %v1738_v33 = vadd.f32 %v1731_v17, %v1680_v55  ;;  %v2429_v15 = vpop.f32.mrb[29].mxu1  ;;  %p2755_p13 = scmp.ne.s32.totalorder %s3451_s9, %s2754_s25  ;;  %p2762_p3 = scmp.lt.s32.totalorder %s2760_s19, %s2754_s25 }
 0x58f   : > { %v1734_v13 = vpop.f32.mrb[30].mxu1  ;;  %v2566_v15 = vld [vmem:[#allocation8] sm:$0xff]  }
 0x590   : > { %v1742_v1 = vmul.f32 %v2677_v6, %v1738_v33  ;;  %v1739_v19 = vadd.f32 %v1734_v13, %v1681_v61  ;;  %v2430_v7 = vpop.f32.mrb[31].mxu1  ;;  %2432 = vmatpush3.bf16.msra.mxu0 %v2566_v15  ;;  %v2567_v6 = vld [vmem:[#allocation8 + $0x8] sm:$0xff]   ;;  %p2756_p10 = pnand %p2755_p13, %p3525_p8  ;;  %p2763_p5 = por %p2762_p3, %p2761_p2 }
 0x591   : > { %2433 = vmatprep.subr.bf16.mxu0 %v2847_v30 }
 0x592   : > { %v1743_v18 = vmul.f32 %v2679_v29, %v1739_v19  ;;  %p2757_p11 = pneg %p2756_p10 }
 0x594   : > { %v1744_v21 = vpack.c.bf16 %v1743_v18, %v1742_v1  ;;  %2434 = vmatpush3.bf16.msra.mxu0 %v2567_v6  ;;  %p2764_p6 = pnand %p2763_p5, %p2757_p11 }
 0x596   : > { %1746 = vrot.lane.b32.xlu0 %v1744_v21, %s2869_s26 }
 0x5b7   : > { %v883_v16 = vpop.permute.xlu0 %882 }
 0x5b8   : > { %886 = vst.msk [vmem:[#allocation4] sm:$0xff] %vm885_vm5, %v883_v16 }
 0x5bf   : > { %v1027_v24 = vpop.permute.xlu1 %1026 }
 0x5c0   : > { %1030 = vst.msk [vmem:[#allocation4] sm:$0xff] %vm1029_vm6, %v1027_v24  ;;  %v2246_v24 = vld [vmem:[#allocation5 + $0x6] ss:$0 sm:$0xff] }
 0x5c7   : > { %v1171_v60 = vpop.permute.xlu1 %1170 }
 0x5c8   : > { %1174 = vst.msk [vmem:[#allocation4] sm:$0xff] %vm1173_vm7, %v1171_v60 }
 0x5cf   : > { %v1315_v25 = vpop.permute.xlu1 %1314 }
 0x5d0   : > { %1318 = vst.msk [vmem:[#allocation4] sm:$0xff] %vm1317_vm8, %v1315_v25 }
 0x5db   : > { %v1459_v28 = vpop.permute.xlu0 %1458 }
 0x5dc   : > { %1462 = vst.msk [vmem:[#allocation4] sm:$0xff] %vm1461_vm9, %v1459_v28 }
 0x5fe   : > { %v1603_v32 = vpop.permute.xlu1 %1602 }
 0x5ff   : > { %1606 = vst.msk [vmem:[#allocation4] sm:$0xff] %vm1605_vm10, %v1603_v32  ;;  %v2247_v32 = vld [vmem:[#allocation5 + $0x7] ss:$0 sm:$0xff] }
 0x608   : > { %v1747_v42 = vpop.permute.xlu0 %1746 }
 0x609   : > { %1750 = vst.msk [vmem:[#allocation4] sm:$0xff] %vm1749_vm11, %v1747_v42 }
 0x610   : > { %v1751_v51 = vld [vmem:[#allocation4] sm:$0xff] }
 0x611   : > { %v1753_v20 = vunpack.c.h.bf16 %v1751_v51  ;;  %v1752_v45 = vunpack.c.l.bf16 %v1751_v51 }
 0x613   : > { %v3385_v2 = vadd.f32 %v2696_v10, %v1753_v20  ;;  %v3388_v37 = vadd.f32 %v2697_v39, %v1752_v45  ;;  %v2568_v10 = vld [vmem:[%s3507_s6] sm:$0xff]   ;;  %v2569_v39 = vld [vmem:[%s3507_s6 + $0x8] sm:$0xff]  }
 0x614   : > { %2440 = vmatpush3.bf16.msra.mxu1 %v2568_v10 }
 0x615   : > { %v1761_v38 = vsel %vm392_vm0, %v3385_v2, 0.0  ;;  %v1758_v23 = vsel %vm392_vm0, %v3388_v37, 0.0  ;;  %2441 = vmatprep.subr.bf16.mxu1 %v2847_v30 }
 0x616   : > { %1762 = vadd.xlane.f32.xlu0 %v1761_v38  ;;  %1759 = vadd.xlane.f32.xlu1 %v1758_v23  ;;  %v2570_v38 = vld [vmem:[%s3507_s6 + $0x10] sm:$0xff]   ;;  %v2571_v23 = vld [vmem:[%s3507_s6 + $0x18] sm:$0xff]  }
 0x618   : > { %2442 = vmatpush3.bf16.msra.mxu1 %v2569_v39 }
 0x619   : > { %2443 = vmatprep.subr.bf16.mxu1 %v2847_v30 }
 0x61c   : > { %2444 = vmatpush3.bf16.msra.mxu1 %v2570_v38 }
 0x61d   : > { %2445 = vmatprep.subr.bf16.mxu1 %v2847_v30 }
 0x620   : > { %2446 = vmatpush3.bf16.msra.mxu1 %v2571_v23 }
 0x621   : > { %2447 = vmatprep.subr.bf16.mxu1 %v2847_v30 }
 0x6a3   : > { %v1763_v40 = vpop.xlane.xlu0 %1762  ;;  %v1760_v34 = vpop.xlane.xlu1 %1759 }
 0x6a4   : > { %v1765_v41 = vmul.f32 0.03125, %v1763_v40  ;;  %v1764_v52 = vmul.f32 0.03125, %v1760_v34  ;;  %v2572_v40 = vld [vmem:[%s3507_s6 + $0x20] sm:$0xff]   ;;  %v2573_v34 = vld [vmem:[%s3507_s6 + $0x28] sm:$0xff]  }
 0x6a5   : > { %2448 = vmatpush3.bf16.msra.mxu1 %v2572_v40  ;;  %v2252_v40 = vld [vmem:[%s3508_s7] ss:$0 sm:$0xff] }
 0x6a6   : > { %v1767_v44 = vsub.f32 %v3385_v2, %v1765_v41  ;;  %v1766_v26 = vsub.f32 %v3388_v37, %v1764_v52  ;;  %2449 = vmatprep.subr.bf16.mxu1 %v2847_v30  ;;  %v2574_v41 = vld [vmem:[%s3507_s6 + $0x30] sm:$0xff]   ;;  %v2575_v52 = vld [vmem:[%s3507_s6 + $0x38] sm:$0xff]  }
 0x6a8   : > { %v1768_v53 = vmul.f32 %v1766_v26, %v1766_v26  ;;  %v1769_v47 = vmul.f32 %v1767_v44, %v1767_v44 }
 0x6a9   : > { %2450 = vmatpush3.bf16.msra.mxu1 %v2573_v34 }
 0x6aa   : > { %v1770_v48 = vsel %vm392_vm0, %v1768_v53, 0.0  ;;  %v1773_v27 = vsel %vm392_vm0, %v1769_v47, 0.0  ;;  %2451 = vmatprep.subr.bf16.mxu1 %v2847_v30 }
 0x6ab   : > { %1771 = vadd.xlane.f32.xlu0 %v1770_v48 }
 0x6ad   : > { %2452 = vmatpush3.bf16.msra.mxu1 %v2574_v41 }
 0x6ae   : > { %2453 = vmatprep.subr.bf16.mxu1 %v2847_v30 }
 0x6af   : > { %1774 = vadd.xlane.f32.xlu0 %v1773_v27 }
 0x6b1   : > { %2454 = vmatpush3.bf16.msra.mxu1 %v2575_v52 }
 0x738   : > { %v1772_v49 = vpop.xlane.xlu0 %1771 }
 0x739   : > { %v1776_v12 = vmul.f32 0.03125, %v1772_v49 }
 0x73b   : > { %v1778_v59 = vadd.f32 1e-05, %v1776_v12 }
 0x73c   : > { %v1775_v36 = vpop.xlane.xlu0 %1774 }
 0x73d   : > { %2680 = vrsqrt.f32 %v1778_v59  ;;  %v1777_v50 = vmul.f32 0.03125, %v1775_v36 }
 0x73f   : > { %v1779_v54 = vadd.f32 1e-05, %v1777_v50 }
 0x741   : > { %2682 = vrsqrt.f32 %v1779_v54 }
 0x747   : > { %v2681_v35 = vpop.eup %2680 }
 0x748   : > { %v1782_v8 = vmul.f32 %v2681_v35, %v1766_v26 }
 0x74a   : > { %v1788_v9 = vmul.f32 %v2244_v58, %v1782_v8 }
 0x74b   : > { %v2683_v55 = vpop.eup %2682 }
 0x74c   : > { %v1794_v61 = vadd.f32 %v2245_v56, %v1788_v9  ;;  %v1783_v46 = vmul.f32 %v2683_v55, %v1767_v44  ;;  %v2248_v44 = vld [vmem:[%s3506_s5] ss:$0 sm:$0xff] }
 0x74e   : > { %v1798_v63 = vsel %vm392_vm0, %v1794_v61, 0.0  ;;  %v1789_v0 = vmul.f32 %v2244_v58, %v1783_v46 }
 0x74f   : > { %1799 = vadd.xlane.f32.xlu1 %v1798_v63 }
 0x750   : > { %v1795_v62 = vadd.f32 %v2245_v56, %v1789_v0 }
 0x752   : > { %v1801_v31 = vsel %vm392_vm0, %v1795_v62, 0.0 }
 0x753   : > { %1802 = vadd.xlane.f32.xlu0 %v1801_v31 }
 0x7dc   : > { %v1800_v43 = vpop.xlane.xlu1 %1799 }
 0x7dd   : > { %v1804_v4 = vmul.f32 0.03125, %v1800_v43 }
 0x7df   : > { %v1806_v22 = vsub.f32 %v1794_v61, %v1804_v4 }
 0x7e0   : > { %v1803_v5 = vpop.xlane.xlu0 %1802 }
 0x7e1   : > { %v1805_v3 = vmul.f32 0.03125, %v1803_v5  ;;  %v1808_v57 = vmul.f32 %v1806_v22, %v1806_v22 }
 0x7e3   : > { %v1807_v11 = vsub.f32 %v1795_v62, %v1805_v3  ;;  %v1810_v14 = vsel %vm392_vm0, %v1808_v57, 0.0 }
 0x7e4   : > { %1811 = vadd.xlane.f32.xlu1 %v1810_v14 }
 0x7e5   : > { %v1809_v17 = vmul.f32 %v1807_v11, %v1807_v11 }
 0x7e7   : > { %v1813_v33 = vsel %vm392_vm0, %v1809_v17, 0.0 }
 0x7e8   : > { %1814 = vadd.xlane.f32.xlu0 %v1813_v33 }
 0x871   : > { %v1812_v13 = vpop.xlane.xlu1 %1811 }
 0x872   : > { %v1816_v1 = vmul.f32 0.03125, %v1812_v13 }
 0x874   : > { %v1818_v19 = vadd.f32 1e-05, %v1816_v1 }
 0x875   : > { %v1815_v7 = vpop.xlane.xlu0 %1814 }
 0x876   : > { %2684 = vrsqrt.f32 %v1818_v19  ;;  %v1817_v29 = vmul.f32 0.03125, %v1815_v7 }
 0x878   : > { %v1819_v18 = vadd.f32 1e-05, %v1817_v29 }
 0x87a   : > { %2686 = vrsqrt.f32 %v1819_v18 }
 0x880   : > { %v2685_v21 = vpop.eup %2684 }
 0x881   : > { %v1822_v16 = vmul.f32 %v2685_v21, %v1806_v22 }
 0x883   : > { %v1828_v25 = vmul.f32 %v2246_v24, %v1822_v16 }
 0x884   : > { %v2687_v60 = vpop.eup %2686 }
 0x885   : > { %v1823_v28 = vmul.f32 %v2687_v60, %v1807_v11  ;;  %v1834_v51 = vadd.f32 %v2247_v32, %v1828_v25 }
 0x887   : > { %v1829_v42 = vmul.f32 %v2246_v24, %v1823_v28 }
 0x889   : > { %v1835_v20 = vadd.f32 %v2247_v32, %v1829_v42 }
 0x88b   : > { %v1836_v45 = vpack.c.bf16 %v1835_v20, %v1834_v51 }
 0x88d   : > { %2436 = vmatmul.mubr.msk.bf16.vlgmr.msra.gmra.mrb[40].mxu0 %vm392_vm0, %v1836_v45 }
 0x960   : > { %v1897_v26 = vpop.f32.mrb[40].mxu0 }
 0x961   : > { %v1898_v53 = vadd.f32 %v2248_v44, %v1897_v26  ;;  %v2437_v48 = vpop.f32.mrb[41].mxu0 }
 0x962   : > { %v1900_v47 = vpop.f32.mrb[42].mxu0 }
 0x963   : > { %v1906_v27 = vmul.f32 0.70710677, %v1898_v53  ;;  %v1901_v49 = vadd.f32 %v2248_v44, %v1900_v47  ;;  %v2438_v12 = vpop.f32.mrb[43].mxu0  ;;  %v1904_v20 = vmul.f32 0.5, %v1898_v53 }
 0x965   : > { %v1908_v59 = vand.u32 2147483647, %v1906_v27  ;;  %v1907_v36 = vmul.f32 0.70710677, %v1901_v49  ;;  %vm1948_vm12 = vcmp.ge.f32.partialorder %v1906_v27, 0.0  ;;  %v1905_v45 = vmul.f32 0.5, %v1901_v49 }
 0x967   : > { %v1910_v50 = vmul.f32 0.3275911, %v1908_v59  ;;  %v1909_v30 = vand.u32 2147483647, %v1907_v36  ;;  %v1936_v8 = vsub.f32 0.0, %v1908_v59  ;;  %vm1949_vm13 = vcmp.ge.f32.partialorder %v1907_v36, 0.0 }
 0x969   : > { %v1912_v54 = vadd.f32 1.0, %v1910_v50  ;;  %v1911_v35 = vmul.f32 0.3275911, %v1909_v30  ;;  %v1937_v56 = vsub.f32 0.0, %v1909_v30  ;;  %v1938_v55 = vmul.f32 %v1936_v8, %v1908_v59 }
 0x96b   : > { %2688 = vrcp.f32 %v1912_v54  ;;  %v1913_v58 = vadd.f32 1.0, %v1911_v35  ;;  %v1939_v0 = vmul.f32 %v1937_v56, %v1909_v30  ;;  %v1940_v62 = vmul.f32 1.442695, %v1938_v55 }
 0x96d   : > { %2690 = vrcp.f32 %v1913_v58  ;;  %v1942_v5 = vmul.f32 1.442695, %v1939_v0 }
 0x96e   : > { %2692 = vpow2.f32 %v1940_v62 }
 0x96f   : > { %2694 = vpow2.f32 %v1942_v5 }
 0x975   : > { %v2689_v9 = vpop.eup %2688 }
 0x976   : > { %v1918_v61 = vmul.f32 1.0614054, %v2689_v9 }
 0x977   : > { %v2691_v46 = vpop.eup %2690 }
 0x978   : > { %v1920_v63 = vadd.f32 -1.4531521, %v1918_v61  ;;  %v1919_v31 = vmul.f32 1.0614054, %v2691_v46  ;;  %v2693_v19 = vpop.eup %2692 }
 0x979   : > { %v2695_v21 = vpop.eup %2694 }
 0x97a   : > { %v1922_v43 = vmul.f32 %v2689_v9, %v1920_v63  ;;  %v1921_v4 = vadd.f32 -1.4531521, %v1919_v31 }
 0x97c   : > { %v1924_v22 = vadd.f32 1.4214138, %v1922_v43  ;;  %v1923_v3 = vmul.f32 %v2691_v46, %v1921_v4 }
 0x97e   : > { %v1926_v57 = vmul.f32 %v2689_v9, %v1924_v22  ;;  %v1925_v11 = vadd.f32 1.4214138, %v1923_v3 }
 0x980   : > { %v1928_v14 = vadd.f32 -0.28449672, %v1926_v57  ;;  %v1927_v17 = vmul.f32 %v2691_v46, %v1925_v11 }
 0x982   : > { %v1930_v33 = vmul.f32 %v2689_v9, %v1928_v14  ;;  %v1929_v15 = vadd.f32 -0.28449672, %v1927_v17 }
 0x984   : > { %v1932_v6 = vadd.f32 0.2548296, %v1930_v33  ;;  %v1931_v13 = vmul.f32 %v2691_v46, %v1929_v15 }
 0x986   : > { %v1934_v1 = vmul.f32 %v2689_v9, %v1932_v6  ;;  %v1933_v7 = vadd.f32 0.2548296, %v1931_v13 }
 0x988   : > { %v1944_v29 = vmul.f32 %v2693_v19, %v1934_v1  ;;  %v1935_v18 = vmul.f32 %v2691_v46, %v1933_v7 }
 0x98a   : > { %v1946_v16 = vsub.f32 1.0, %v1944_v29  ;;  %v1945_v24 = vmul.f32 %v2695_v21, %v1935_v18 }
 0x98c   : > { %v1950_v60 = vsub.f32 0.0, %v1946_v16  ;;  %v1947_v25 = vsub.f32 1.0, %v1945_v24 }
 0x98e   : > { %v1952_v28 = vsel %vm1948_vm12, %v1946_v16, %v1950_v60  ;;  %v1951_v32 = vsub.f32 0.0, %v1947_v25 }
 0x98f   : > { %v1954_v42 = vadd.f32 1.0, %v1952_v28 }
 0x990   : > { %v1953_v51 = vsel %vm1949_vm13, %v1947_v25, %v1951_v32 }
 0x991   : > { %v1955_v10 = vadd.f32 1.0, %v1953_v51  ;;  %v1956_v39 = vmul.f32 %v1954_v42, %v1904_v20 }
 0x993   : > { %v1957_v38 = vmul.f32 %v1955_v10, %v1905_v45 }
 0x995   : > { %v1958_v23 = vpack.c.bf16 %v1957_v38, %v1956_v39 }
 0x997   : > { %2456 = vmatmul.mubr.bf16.vlgmr.msra.gmra.mrb[32].mxu1 %v1958_v23 }
 0xa6a   : > { %v2064_v34 = vpop.f32.mrb[32].mxu1 }
 0xa6b   : > { %v2065_v41 = vadd.f32 %v2252_v40, %v2064_v34  ;;  %v2457_v52 = vpop.f32.mrb[33].mxu1 }
 0xa6c   : > { %v2067_v44 = vpop.f32.mrb[34].mxu1 }
 0xa6d   : > { %v2071_v26 = vadd.f32 %v2065_v41, %v3388_v37  ;;  %v2068_v53 = vadd.f32 %v2252_v40, %v2067_v44  ;;  %v2458_v48 = vpop.f32.mrb[35].mxu1 }
 0xa6f   : > { %2073 = vst.msk [vmem:[%s366_s22] sm:$0xff] %vm392_vm0, %v2071_v26  ;;  %v2072_v47 = vadd.f32 %v2068_v53, %v3385_v2 }
 0xa71   : > { %2074 = vst.msk [vmem:[%s366_s22 + $0x8] sm:$0xff] %vm392_vm0, %v2072_v47 }
 0xa72   : > { %2767 = shalt.err (!%p2764_p6)
}
 0xa73   : > { %s2768_s14 = scalar_lea.hbm %s3447_s12, 256  ;;  %s2772_s20 = scalar_lea.hbm %s3509_s8, 512 }
 0xa74   : > { %p2769_p7 = scmp.ne.s32.totalorder %s3447_s12, %s2768_s14  ;;  %p2773_p0 = scmp.lt.u32.totalorder %s3447_s12, %s3509_s8 }
 0xa75   : > { %p2774_p1 = scmp.lt.u32.totalorder %s2772_s20, %s2768_s14  ;;  %p2776_p13 = scmp.lt.u32.totalorder %s2768_s14, %s3447_s12 }
 0xa76   : > { %p2770_p9 = pnand %p2769_p7, %p3525_p8 }
 0xa77   : > { %p2775_p4 = por %p2774_p1, %p2773_p0 }
 0xa78   : > { %p2771_p12 = pneg %p2770_p9 }
 0xa79   : > { %p2777_p10 = por %p2776_p13, %p2775_p4 }
 0xa7b   : > { %p2778_p11 = pnand %p2777_p10, %p2771_p12 }
 0xa7d   : > { %2781 = shalt.err (!%p2778_p11)
}
 0xa7e   : > { %s2871_s13 = smov 128  }
 0xa7f   : > { %2467 = dma.vmem_to_hbm [thread:$0]  (%p3525_p8), %s3451_s9, 256, %s3447_s12, %s3454_s30, %s2871_s13, %s2871_s13, %s2864_s21  }
 0xa80 PF: > { %p2484_p2 = scmp.ge.s32.totalorder %s2840_s10, 2  ;;  %s2106_s25 = sand.u32 1, %s2820_s27  }
 0xa81   : > { %p3526_p3 = scmp.ne.s32.totalorder %s3519_s17, 0  ;;  %s2107_s11 = scalar_lea.sflag [#allocation7], %s2106_s25 }
 0xa83   : > { %p2477_p5 = pnand %p2484_p2, %p3526_p3 }
 0xa85   : > { %2815 = dma.done.wait (!%p2477_p5), %s2107_s11, 256  }
 0xa86   : > { %2817 = vsyncadd (!%p2477_p5), %s2107_s11, 4294967040  ;;  %s23_s10 = sadd.s32 1, %s2840_s10   ;;  %s3527_s30 = sld [smem:[#allocation14_spill]] }
 0xa87   : > { %p20_p6 = scmp.ge.s32.totalorder %s23_s10, 4   ;;  %s3528_s9 = sld [smem:[#allocation15_spill]] }
 0xa88   : > { %s3529_s27 = smov %s2824_s28  ;;  %s3530_s28 = smov %s2828_s29 }
 0xa89   : > { %s3531_s29 = smov %s2970_s18  ;;  %22 = sbr.rel (!%p20_p6) target bundleno = 6 (0x6), region = 103 }
 0xa90   :  { %2112 = vsyncpa [#allocation6], 1 }
 0xa91   :  { %2114 = vsyncpa [#allocation6 + $0x1], 1 }
 0xa92   :  { %2115 = vsyncpa [#allocation9], 1 }
 0xa93   :  { %2116 = vsyncpa [#allocation7], 1 }
 0xa94   :  { %2118 = vsyncpa [#allocation7 + $0x1], 1 }

</bundles_post_ra>
